<compile_context>
chip_gen: v7x
topology: tpu7x:2x2x1
jax: 0.10.0
libtpu: 0.0.40
codegen_flags: <defaults>
</compile_context>

<pallas_src>
import jax
import jax.numpy as jnp
from jax.experimental import pallas as pl
from jax.experimental.pallas import tpu as pltpu

EPS = 1e-5


def _residual_convlstm_kernel(patches_ref, w_ref, x_ref, c_ref,
                              gamma_ref, beta_ref, gammac_ref, betac_ref,
                              out_ref, hout_ref, cout_ref):
    Ch = c_ref.shape[-1]
    n_rows = patches_ref.shape[0]
    inv_n = 1.0 / n_rows

    # Single deep-K matmul on the MXU: (N, 9*(Cin+Ch)) @ (9*(Cin+Ch), 4*Ch),
    # bf16 operands, f32 accumulation.
    figo = jnp.dot(patches_ref[...], w_ref[...],
                   preferred_element_type=jnp.float32)          # (N, 4*Ch) f32

    # Training-mode BatchNorm2d over (N,H,W) per channel, fused across the four
    # gate norms (disjoint channel blocks).  One-pass stats: var = E[x^2]-E[x]^2.
    mean = jnp.sum(figo, axis=0, keepdims=True) * inv_n          # (1, 4*Ch)
    ex2 = jnp.sum(figo * figo, axis=0, keepdims=True) * inv_n
    var = jnp.maximum(ex2 - mean * mean, 0.0)
    scale = gamma_ref[...] * jax.lax.rsqrt(var + EPS)
    shift = beta_ref[...] - mean * scale
    figo_bn = figo * scale + shift                               # (N, 4*Ch)

    # sigmoid on the full 4*Ch-wide slab (128-lane dense, one EUP stream);
    # tanh only on the g block.
    sig = jax.nn.sigmoid(figo_bn)
    f = sig[:, 0 * Ch:1 * Ch]
    i = sig[:, 1 * Ch:2 * Ch]
    o = sig[:, 3 * Ch:4 * Ch]
    g = jnp.tanh(figo_bn[:, 2 * Ch:3 * Ch])

    c_new = f * c_ref[...] + i * g                               # (N, Ch) f32

    # BatchNorm of the new cell state, same one-pass scheme.
    cmean = jnp.sum(c_new, axis=0, keepdims=True) * inv_n
    cex2 = jnp.sum(c_new * c_new, axis=0, keepdims=True) * inv_n
    cvar = jnp.maximum(cex2 - cmean * cmean, 0.0)
    cscale = gammac_ref[...] * jax.lax.rsqrt(cvar + EPS)
    cshift = betac_ref[...] - cmean * cscale

    h_new = o * jnp.tanh(c_new * cscale + cshift)
    out_ref[...] = x_ref[...] + h_new        # residual (Cin == Ch)
    hout_ref[...] = h_new
    cout_ref[...] = c_new


@jax.jit
def residual_convlstm(x, h, c, wx, wh, bias, gamma, beta, gamma_c, beta_c):
    """x, h, c: NCHW float32. wx: (4*Ch, Cin, 3, 3), wh: (4*Ch, Ch, 3, 3) (PyTorch OIHW)."""
    del bias  # per-channel conv bias is cancelled exactly by training-mode BN mean
    B, Cin, H, W = x.shape
    Ch = h.shape[1]
    N = B * H * W

    to_nhwc = lambda t: jnp.transpose(t, (0, 2, 3, 1))
    x_nhwc = to_nhwc(x)
    xh = jnp.concatenate([x_nhwc, to_nhwc(h)], axis=-1)          # (B, H, W, Cin+Ch)
    xh_p = jnp.pad(xh, ((0, 0), (1, 1), (1, 1), (0, 0)))         # SAME padding

    # im2col in the wrapper (cheap XLA data movement): tap-major, channel-minor.
    taps = [xh_p[:, dy:dy + H, dx:dx + W, :]
            for dy in range(3) for dx in range(3)]
    patches = jnp.stack(taps, axis=3).reshape(N, 9 * (Cin + Ch))
    patches = patches.astype(jnp.bfloat16)                       # MXU operand

    # OIHW -> (ky*kx, Cin/Ch, 4*Ch); x rows first then h rows per tap, matching
    # the channel order of `patches`; flatten into one (9*(Cin+Ch), 4*Ch) weight.
    wx_k = jnp.transpose(wx, (2, 3, 1, 0)).reshape(9, Cin, 4 * Ch)
    wh_k = jnp.transpose(wh, (2, 3, 1, 0)).reshape(9, Ch, 4 * Ch)
    w_cat = jnp.concatenate([wx_k, wh_k], axis=1)
    w_cat = w_cat.reshape(9 * (Cin + Ch), 4 * Ch).astype(jnp.bfloat16)

    x_flat = x_nhwc.reshape(N, Cin)                              # f32 (residual)
    c_flat = to_nhwc(c).reshape(N, Ch)                           # f32

    # Resident-VMEM estimate (inputs + f32 intermediates + 3 outputs, with
    # headroom); raise the scoped limit above the default if needed, capped at
    # 64 MiB so the same code remains valid on v7x.
    figo_bytes = N * 4 * Ch * 4
    resident = (2 * (patches.size + w_cat.size) * 2
                + (x_flat.size + c_flat.size + 3 * N * Ch) * 4
                + 6 * figo_bytes)
    vmem_limit = int(min(64 * 2 ** 20, max(32 * 2 ** 20, resident)))

    vmem = pl.BlockSpec(memory_space=pltpu.MemorySpace.VMEM)
    out_shapes = tuple(jax.ShapeDtypeStruct((N, Ch), jnp.float32) for _ in range(3))

    out, h_new, c_new = pl.pallas_call(
        _residual_convlstm_kernel,
        out_shape=out_shapes,
        in_specs=[vmem] * 8,
        out_specs=(vmem, vmem, vmem),
        compiler_params=pltpu.CompilerParams(vmem_limit_bytes=vmem_limit),
    )(patches, w_cat, x_flat, c_flat,
      gamma.reshape(1, -1), beta.reshape(1, -1),
      gamma_c.reshape(1, -1), beta_c.reshape(1, -1))

    back = lambda t: jnp.transpose(t.reshape(B, H, W, Ch), (0, 3, 1, 2))
    return back(out), back(h_new), back(c_new)


def ref_forward(x, h, c, wx, wh, bias, gamma, beta, gamma_c, beta_c):
    """Pure-JAX f32 reference of the PyTorch forward (NCHW, training-mode BN)."""
    dn = ('NCHW', 'OIHW', 'NCHW')
    conv = lambda inp, w: jax.lax.conv_general_dilated(
        inp, w, window_strides=(1, 1), padding='SAME', dimension_numbers=dn)
    Ch = h.shape[1]
    figo = conv(h, wh) + bias[None, :, None, None] + conv(x, wx)

    def bn(t, g_, b_):
        m = t.mean(axis=(0, 2, 3), keepdims=True)
        v = ((t - m) ** 2).mean(axis=(0, 2, 3), keepdims=True)
        return (t - m) / jnp.sqrt(v + EPS) * g_[None, :, None, None] + b_[None, :, None, None]

    gates = [bn(figo[:, k * Ch:(k + 1) * Ch],
                gamma[k * Ch:(k + 1) * Ch],
                beta[k * Ch:(k + 1) * Ch]) for k in range(4)]
    f, i, g, o = gates
    c_new = jax.nn.sigmoid(f) * c + jax.nn.sigmoid(i) * jnp.tanh(g)
    h_new = jax.nn.sigmoid(o) * jnp.tanh(bn(c_new, gamma_c, beta_c))
    return x + h_new, h_new, c_new


if __name__ == "__main__":
    # Residual add requires input_size == hidden_size.
    B, Cin, Ch, H, W, K = 2, 32, 32, 16, 16, 3
    key = jax.random.PRNGKey(0)
    ks = jax.random.split(key, 10)

    x = jax.random.normal(ks[0], (B, Cin, H, W), jnp.float32)
    h = jax.random.normal(ks[1], (B, Ch, H, W), jnp.float32)
    c = jax.random.normal(ks[2], (B, Ch, H, W), jnp.float32)

    # hidden_lin: Conv2d(Ch -> 4*Ch, k=3, bias=True); input_lin: Conv2d(Cin -> 4*Ch, k=3, bias=False)
    wh = 0.1 * jax.random.normal(ks[3], (4 * Ch, Ch, K, K), jnp.float32)
    wx = 0.1 * jax.random.normal(ks[4], (4 * Ch, Cin, K, K), jnp.float32)
    bias = 0.1 * jax.random.normal(ks[5], (4 * Ch,), jnp.float32)
    # BatchNorm affine params for the 4 gate norms (concatenated) and the cell norm.
    gamma = 1.0 + 0.1 * jax.random.normal(ks[6], (4 * Ch,), jnp.float32)
    beta = 0.1 * jax.random.normal(ks[7], (4 * Ch,), jnp.float32)
    gamma_c = 1.0 + 0.1 * jax.random.normal(ks[8], (Ch,), jnp.float32)
    beta_c = 0.1 * jax.random.normal(ks[9], (Ch,), jnp.float32)

    out, h_new, c_new = residual_convlstm(x, h, c, wx, wh, bias, gamma, beta, gamma_c, beta_c)
    jax.block_until_ready((out, h_new, c_new))

    ref_out, ref_h, ref_c = ref_forward(x, h, c, wx, wh, bias, gamma, beta, gamma_c, beta_c)
    # Tolerance covers bf16 MXU operands (f32 accumulation) vs. the f32 reference.
    assert jnp.allclose(out, ref_out, atol=3e-2, rtol=3e-2), "residual output mismatch"
    assert jnp.allclose(h_new, ref_h, atol=3e-2, rtol=3e-2), "hidden state mismatch"
    assert jnp.allclose(c_new, ref_c, atol=3e-2, rtol=3e-2), "cell state mismatch"

    print("KERNEL_OK")
</pallas_src>

<mosaic_0001>
module attributes {stable_mosaic.version = 11 : i64} {
  func.func @_residual_convlstm_kernel(%arg0: memref<512x576xbf16, #tpu.memory_space<vmem>>, %arg1: memref<576x128xbf16, #tpu.memory_space<vmem>>, %arg2: memref<512x32xf32, #tpu.memory_space<vmem>>, %arg3: memref<512x32xf32, #tpu.memory_space<vmem>>, %arg4: memref<1x128xf32, #tpu.memory_space<vmem>>, %arg5: memref<1x128xf32, #tpu.memory_space<vmem>>, %arg6: memref<1x32xf32, #tpu.memory_space<vmem>>, %arg7: memref<1x32xf32, #tpu.memory_space<vmem>>, %arg8: memref<512x32xf32, #tpu.memory_space<vmem>>, %arg9: memref<512x32xf32, #tpu.memory_space<vmem>>, %arg10: memref<512x32xf32, #tpu.memory_space<vmem>>) attributes {dimension_semantics = [], scalar_prefetch = 0 : i64, scratch_operands = 0 : i64, tpu.core_type = #tpu.core_type<tc>} {
    %c0 = arith.constant 0 : index
    %c0_0 = arith.constant 0 : index
    %0 = vector.load %arg0[%c0, %c0_0] : memref<512x576xbf16, #tpu.memory_space<vmem>>, vector<512x576xbf16>
    %c0_1 = arith.constant 0 : index
    %c0_2 = arith.constant 0 : index
    %1 = vector.load %arg1[%c0_1, %c0_2] : memref<576x128xbf16, #tpu.memory_space<vmem>>, vector<576x128xbf16>
    %cst = arith.constant dense<0.000000e+00> : vector<512x128xf32>
    %2 = tpu.matmul %0, %1, %cst {dimension_numbers = #tpu.dot_dimension_numbers<[1], [0], [0], [1], [0, 0, 1, 1], [], []>} : vector<512x576xbf16>, vector<576x128xbf16>, vector<512x128xf32> -> vector<512x128xf32>
    %cst_3 = arith.constant dense<0.000000e+00> : vector<128xf32>
    %3 = vector.multi_reduction <add>, %2, %cst_3 [0] : vector<512x128xf32> to vector<128xf32>
    %4 = vector.shape_cast %3 : vector<128xf32> to vector<1x128xf32>
    %cst_4 = arith.constant 0.001953125 : f32
    %5 = vector.broadcast %cst_4 : f32 to vector<1x128xf32>
    %6 = arith.mulf %4, %5 : vector<1x128xf32>
    %7 = arith.mulf %2, %2 : vector<512x128xf32>
    %cst_5 = arith.constant dense<0.000000e+00> : vector<128xf32>
    %8 = vector.multi_reduction <add>, %7, %cst_5 [0] : vector<512x128xf32> to vector<128xf32>
    %9 = vector.shape_cast %8 : vector<128xf32> to vector<1x128xf32>
    %cst_6 = arith.constant 0.001953125 : f32
    %10 = vector.broadcast %cst_6 : f32 to vector<1x128xf32>
    %11 = arith.mulf %9, %10 : vector<1x128xf32>
    %12 = arith.mulf %6, %6 : vector<1x128xf32>
    %13 = arith.subf %11, %12 : vector<1x128xf32>
    %cst_7 = arith.constant 0.000000e+00 : f32
    %14 = vector.broadcast %cst_7 : f32 to vector<1x128xf32>
    %15 = arith.maximumf %13, %14 : vector<1x128xf32>
    %c0_8 = arith.constant 0 : index
    %c0_9 = arith.constant 0 : index
    %16 = vector.load %arg4[%c0_8, %c0_9] : memref<1x128xf32, #tpu.memory_space<vmem>>, vector<1x128xf32>
    %cst_10 = arith.constant 9.99999974E-6 : f32
    %17 = vector.broadcast %cst_10 : f32 to vector<1x128xf32>
    %18 = arith.addf %15, %17 : vector<1x128xf32>
    %19 = math.rsqrt %18 : vector<1x128xf32>
    %20 = arith.mulf %16, %19 : vector<1x128xf32>
    %c0_11 = arith.constant 0 : index
    %c0_12 = arith.constant 0 : index
    %21 = vector.load %arg5[%c0_11, %c0_12] : memref<1x128xf32, #tpu.memory_space<vmem>>, vector<1x128xf32>
    %22 = arith.mulf %6, %20 : vector<1x128xf32>
    %23 = arith.subf %21, %22 : vector<1x128xf32>
    %24 = vector.broadcast %20 : vector<1x128xf32> to vector<512x128xf32>
    %25 = arith.mulf %2, %24 : vector<512x128xf32>
    %26 = vector.broadcast %23 : vector<1x128xf32> to vector<512x128xf32>
    %27 = arith.addf %25, %26 : vector<512x128xf32>
    %28 = arith.negf %27 : vector<512x128xf32>
    %29 = math.exp %28 : vector<512x128xf32>
    %cst_13 = arith.constant 1.000000e+00 : f32
    %30 = vector.broadcast %cst_13 : f32 to vector<512x128xf32>
    %31 = arith.addf %30, %29 : vector<512x128xf32>
    %32 = arith.divf %30, %31 : vector<512x128xf32>
    %33 = vector.extract_strided_slice %32 {offsets = [0, 0], sizes = [512, 32], strides = [1, 1]} : vector<512x128xf32> to vector<512x32xf32>
    %34 = vector.extract_strided_slice %32 {offsets = [0, 32], sizes = [512, 32], strides = [1, 1]} : vector<512x128xf32> to vector<512x32xf32>
    %35 = vector.extract_strided_slice %32 {offsets = [0, 96], sizes = [512, 32], strides = [1, 1]} : vector<512x128xf32> to vector<512x32xf32>
    %36 = vector.extract_strided_slice %27 {offsets = [0, 64], sizes = [512, 32], strides = [1, 1]} : vector<512x128xf32> to vector<512x32xf32>
    %37 = math.tanh %36 : vector<512x32xf32>
    %c0_14 = arith.constant 0 : index
    %c0_15 = arith.constant 0 : index
    %38 = vector.load %arg3[%c0_14, %c0_15] : memref<512x32xf32, #tpu.memory_space<vmem>>, vector<512x32xf32>
    %39 = arith.mulf %33, %38 : vector<512x32xf32>
    %40 = arith.mulf %34, %37 : vector<512x32xf32>
    %41 = arith.addf %39, %40 : vector<512x32xf32>
    %cst_16 = arith.constant dense<0.000000e+00> : vector<32xf32>
    %42 = vector.multi_reduction <add>, %41, %cst_16 [0] : vector<512x32xf32> to vector<32xf32>
    %43 = vector.shape_cast %42 : vector<32xf32> to vector<1x32xf32>
    %cst_17 = arith.constant 0.001953125 : f32
    %44 = vector.broadcast %cst_17 : f32 to vector<1x32xf32>
    %45 = arith.mulf %43, %44 : vector<1x32xf32>
    %46 = arith.mulf %41, %41 : vector<512x32xf32>
    %cst_18 = arith.constant dense<0.000000e+00> : vector<32xf32>
    %47 = vector.multi_reduction <add>, %46, %cst_18 [0] : vector<512x32xf32> to vector<32xf32>
    %48 = vector.shape_cast %47 : vector<32xf32> to vector<1x32xf32>
    %cst_19 = arith.constant 0.001953125 : f32
    %49 = vector.broadcast %cst_19 : f32 to vector<1x32xf32>
    %50 = arith.mulf %48, %49 : vector<1x32xf32>
    %51 = arith.mulf %45, %45 : vector<1x32xf32>
    %52 = arith.subf %50, %51 : vector<1x32xf32>
    %cst_20 = arith.constant 0.000000e+00 : f32
    %53 = vector.broadcast %cst_20 : f32 to vector<1x32xf32>
    %54 = arith.maximumf %52, %53 : vector<1x32xf32>
    %c0_21 = arith.constant 0 : index
    %c0_22 = arith.constant 0 : index
    %55 = vector.load %arg6[%c0_21, %c0_22] : memref<1x32xf32, #tpu.memory_space<vmem>>, vector<1x32xf32>
    %cst_23 = arith.constant 9.99999974E-6 : f32
    %56 = vector.broadcast %cst_23 : f32 to vector<1x32xf32>
    %57 = arith.addf %54, %56 : vector<1x32xf32>
    %58 = math.rsqrt %57 : vector<1x32xf32>
    %59 = arith.mulf %55, %58 : vector<1x32xf32>
    %c0_24 = arith.constant 0 : index
    %c0_25 = arith.constant 0 : index
    %60 = vector.load %arg7[%c0_24, %c0_25] : memref<1x32xf32, #tpu.memory_space<vmem>>, vector<1x32xf32>
    %61 = arith.mulf %45, %59 : vector<1x32xf32>
    %62 = arith.subf %60, %61 : vector<1x32xf32>
    %63 = vector.broadcast %59 : vector<1x32xf32> to vector<512x32xf32>
    %64 = arith.mulf %41, %63 : vector<512x32xf32>
    %65 = vector.broadcast %62 : vector<1x32xf32> to vector<512x32xf32>
    %66 = arith.addf %64, %65 : vector<512x32xf32>
    %67 = math.tanh %66 : vector<512x32xf32>
    %68 = arith.mulf %35, %67 : vector<512x32xf32>
    %c0_26 = arith.constant 0 : index
    %c0_27 = arith.constant 0 : index
    %69 = vector.load %arg2[%c0_26, %c0_27] : memref<512x32xf32, #tpu.memory_space<vmem>>, vector<512x32xf32>
    %70 = arith.addf %69, %68 : vector<512x32xf32>
    %c0_28 = arith.constant 0 : index
    %c0_29 = arith.constant 0 : index
    %71 = vector.load %arg8[%c0_28, %c0_29] : memref<512x32xf32, #tpu.memory_space<vmem>>, vector<512x32xf32>
    tpu.vector_store %arg8[%c0_28, %c0_29], %70 {strides = array<i32>} : memref<512x32xf32, #tpu.memory_space<vmem>>, vector<512x32xf32>,
    %c0_30 = arith.constant 0 : index
    %c0_31 = arith.constant 0 : index
    %72 = vector.load %arg9[%c0_30, %c0_31] : memref<512x32xf32, #tpu.memory_space<vmem>>, vector<512x32xf32>
    tpu.vector_store %arg9[%c0_30, %c0_31], %68 {strides = array<i32>} : memref<512x32xf32, #tpu.memory_space<vmem>>, vector<512x32xf32>,
    %c0_32 = arith.constant 0 : index
    %c0_33 = arith.constant 0 : index
    %73 = vector.load %arg10[%c0_32, %c0_33] : memref<512x32xf32, #tpu.memory_space<vmem>>, vector<512x32xf32>
    tpu.vector_store %arg10[%c0_32, %c0_33], %41 {strides = array<i32>} : memref<512x32xf32, #tpu.memory_space<vmem>>, vector<512x32xf32>,
    return
  }
}

</mosaic_0001>

<bundles_post_ra>
// kernel: residual_convlstm.1
= control target key start
LH: loop header
LB: loop body
LE: loop exit
PB: predicated region body
PF: predicated region fallthrough
CT: control target
= control target key end

     0   :  { %16 = vsyncpa [#allocation3], 0  ;;  %v6705_v1 = vmov 0   ;;  %s10720_s0 = inlined_call_operand.vmem [shape: bf16[512,576], index: 0, kind: input, shape index: {}]   ;;  %s10721_s1 = inlined_call_operand.vmem [shape: bf16[576,128], index: 1, kind: input, shape index: {}]   ;;  %s10722_s2 = inlined_call_operand.vmem [shape: f32[512,32], index: 2, kind: input, shape index: {}]   ;;  %s10723_s3 = inlined_call_operand.vmem [shape: f32[512,32], index: 3, kind: input, shape index: {}]   ;;  %s10724_s4 = inlined_call_operand.vmem [shape: f32[1,128], index: 4, kind: input, shape index: {}]   ;;  %s10725_s5 = inlined_call_operand.vmem [shape: f32[1,128], index: 5, kind: input, shape index: {}]   ;;  %s10726_s6 = inlined_call_operand.vmem [shape: f32[1,32], index: 6, kind: input, shape index: {}]   ;;  %s10727_s7 = inlined_call_operand.vmem [shape: f32[1,32], index: 7, kind: input, shape index: {}]   ;;  %s10728_s8 = inlined_call_operand.hbm [shape: f32[512,32], index: 8, kind: output, shape index: {0}]   ;;  %s10729_s9 = inlined_call_operand.hbm [shape: f32[512,32], index: 9, kind: output, shape index: {1}]   ;;  %s10730_s10 = inlined_call_operand.hbm [shape: f32[512,32], index: 10, kind: output, shape index: {2}]  }
   0x1   :  { %v5859_v0 = vld [vmem:[%s10721_s1] sm:$0xff]   ;;  %1412 = vmatprep.subr.bf16.mxu0 %v6705_v1  ;;  %5739 = vmatprep.subr.bf16.mxu1 %v6705_v1  ;;  %v5860_v2 = vld [vmem:[%s10721_s1 + $0x8] sm:$0xff]   ;;  %v5861_v3 = vld [vmem:[%s10721_s1 + $0x10] sm:$0xff]  }
   0x2   :  { %1413 = vmatpush1.bf16.msra.mxu0 %v5859_v0  ;;  %5755 = vmatpush1.bf16.msra.mxu1 %v5859_v0  ;;  %v5862_v4 = vld [vmem:[%s10721_s1 + $0x18] sm:$0xff]   ;;  %v5863_v5 = vld [vmem:[%s10721_s1 + $0x20] sm:$0xff]   ;;  %v5864_v7 = vld [vmem:[%s10721_s1 + $0x28] sm:$0xff]  }
   0x3   :  { %1414 = vmatprep.subr.bf16.mxu0 %v6705_v1  ;;  %5740 = vmatprep.subr.bf16.mxu1 %v6705_v1  ;;  %v5877_v6 = vld [vmem:[%s10720_s0 + $0x4] ss:$20 sps:$4 sm:$0xff]   ;;  %v5865_v9 = vld [vmem:[%s10721_s1 + $0x30] sm:$0xff]   ;;  %v5868_v12 = vld [vmem:[%s10721_s1 + $0x48] sm:$0xff]  }
   0x4   :  { %v5880_v8 = vld [vmem:[%s10720_s0 + $0x144] ss:$20 sps:$4 sm:$0xff]   ;;  %1444 = vmatprep.mubr.bf16.mxu0 %v5877_v6  ;;  %v5869_v13 = vld [vmem:[%s10721_s1 + $0x50] sm:$0xff]   ;;  %v5872_v16 = vld [vmem:[%s10721_s1 + $0x68] sm:$0xff]  }
   0x5   :  { %1508 = vmatprep.mubr.bf16.mxu1 %v5880_v8  ;;  %v5866_v10 = vld [vmem:[%s10721_s1 + $0x38] sm:$0xff]   ;;  %v5867_v11 = vld [vmem:[%s10721_s1 + $0x40] sm:$0xff]   ;;  %v5873_v17 = vld [vmem:[%s10721_s1 + $0x70] sm:$0xff]  }
   0x6   :  { %1415 = vmatpush1.bf16.msra.mxu0 %v5860_v2  ;;  %5756 = vmatpush1.bf16.msra.mxu1 %v5860_v2  ;;  %v5870_v14 = vld [vmem:[%s10721_s1 + $0x58] sm:$0xff]   ;;  %v5871_v15 = vld [vmem:[%s10721_s1 + $0x60] sm:$0xff]   ;;  %v5930_v25 = vld [vmem:[%s10721_s1 + $0x108] sm:$0xff]  }
   0x7   :  { %1416 = vmatprep.subr.bf16.mxu0 %v6705_v1  ;;  %5741 = vmatprep.subr.bf16.mxu1 %v6705_v1  ;;  %v5874_v18 = vld [vmem:[%s10721_s1 + $0x78] sm:$0xff]   ;;  %v5881_v19 = vld [vmem:[%s10721_s1 + $0x100] sm:$0xff]   ;;  %v5883_v26 = vld [vmem:[%s10721_s1 + $0x88] sm:$0xff]  }
   0x8   :  { %v5875_v20 = vld [vmem:[%s10720_s0] ss:$20 sps:$4 sm:$0xff]   ;;  %v5888_v27 = vld [vmem:[%s10720_s0 + $0x28] ss:$20 sps:$4 sm:$0xff]   ;;  %v5896_v34 = vld [vmem:[%s10720_s0 + $0x50] ss:$20 sps:$4 sm:$0xff]  }
   0x9   :  { %v5878_v21 = vld [vmem:[%s10720_s0 + $0x140] ss:$20 sps:$4 sm:$0xff]   ;;  %v5889_v28 = vld [vmem:[%s10720_s0 + $0x168] ss:$20 sps:$4 sm:$0xff]   ;;  %v5897_v35 = vld [vmem:[%s10720_s0 + $0x190] ss:$20 sps:$4 sm:$0xff]  }
   0xa   :  { %1417 = vmatpush1.bf16.msra.mxu0 %v5861_v3  ;;  %5757 = vmatpush1.bf16.msra.mxu1 %v5861_v3  ;;  %v5882_v22 = vld [vmem:[%s10721_s1 + $0x80] sm:$0xff]   ;;  %v5890_v29 = vld [vmem:[%s10721_s1 + $0x90] sm:$0xff]   ;;  %v5891_v33 = vld [vmem:[%s10721_s1 + $0x98] sm:$0xff]  }
   0xb   :  { %1418 = vmatprep.subr.bf16.mxu0 %v6705_v1  ;;  %5742 = vmatprep.subr.bf16.mxu1 %v6705_v1  ;;  %v5884_v23 = vld [vmem:[%s10720_s0 + $0x2c] ss:$20 sps:$4 sm:$0xff]   ;;  %v5971_v30 = vld [vmem:[%s10721_s1 + $0x110] sm:$0xff]   ;;  %v5908_v43 = vld [vmem:[%s10720_s0 + $0xa4] ss:$20 sps:$4 sm:$0xff]  }
   0xc   :  { %v5886_v24 = vld [vmem:[%s10720_s0 + $0x16c] ss:$20 sps:$4 sm:$0xff]   ;;  %v5892_v31 = vld [vmem:[%s10720_s0 + $0x54] ss:$20 sps:$4 sm:$0xff]   ;;  %v5900_v37 = vld [vmem:[%s10720_s0 + $0x7c] ss:$20 sps:$4 sm:$0xff]  }
   0xd   :  { %v5894_v32 = vld [vmem:[%s10720_s0 + $0x194] ss:$20 sps:$4 sm:$0xff]   ;;  %v5898_v36 = vld [vmem:[%s10721_s1 + $0xa0] sm:$0xff]   ;;  %v5902_v38 = vld [vmem:[%s10720_s0 + $0x1bc] ss:$20 sps:$4 sm:$0xff]  }
   0xe   :  { %1419 = vmatpush1.bf16.msra.mxu0 %v5862_v4  ;;  %5758 = vmatpush1.bf16.msra.mxu1 %v5862_v4  ;;  %v5899_v39 = vld [vmem:[%s10721_s1 + $0xa8] sm:$0xff]   ;;  %v5906_v42 = vld [vmem:[%s10721_s1 + $0xb0] sm:$0xff]   ;;  %v6008_v44 = vld [vmem:[%s10721_s1 + $0x118] sm:$0xff]  }
   0xf   :  { %1420 = vmatprep.subr.bf16.mxu0 %v6705_v1  ;;  %5743 = vmatprep.subr.bf16.mxu1 %v6705_v1  ;;  %v5904_v40 = vld [vmem:[%s10720_s0 + $0x78] ss:$20 sps:$4 sm:$0xff]   ;;  %v5912_v47 = vld [vmem:[%s10720_s0 + $0xa0] ss:$20 sps:$4 sm:$0xff]   ;;  %v5920_v53 = vld [vmem:[%s10720_s0 + $0xc8] ss:$20 sps:$4 sm:$0xff]  }
  0x10   :  { %v5905_v41 = vld [vmem:[%s10720_s0 + $0x1b8] ss:$20 sps:$4 sm:$0xff]   ;;  %v5913_v48 = vld [vmem:[%s10720_s0 + $0x1e0] ss:$20 sps:$4 sm:$0xff]   ;;  %v5921_v54 = vld [vmem:[%s10720_s0 + $0x208] ss:$20 sps:$4 sm:$0xff]  }
  0x11   :  { %v5910_v45 = vld [vmem:[%s10720_s0 + $0x1e4] ss:$20 sps:$4 sm:$0xff]   ;;  %v5916_v50 = vld [vmem:[%s10720_s0 + $0xcc] ss:$20 sps:$4 sm:$0xff]   ;;  %v5922_v55 = vld [vmem:[%s10721_s1 + $0xd0] sm:$0xff]  }
  0x12   :  { %1421 = vmatpush1.bf16.msra.mxu0 %v5863_v5  ;;  %5759 = vmatpush1.bf16.msra.mxu1 %v5863_v5  ;;  %v5907_v46 = vld [vmem:[%s10721_s1 + $0xb8] sm:$0xff]   ;;  %v5914_v49 = vld [vmem:[%s10721_s1 + $0xc0] sm:$0xff]   ;;  %v5915_v52 = vld [vmem:[%s10721_s1 + $0xc8] sm:$0xff]  }
  0x13   :  { %1422 = vmatprep.subr.bf16.mxu0 %v6705_v1  ;;  %5744 = vmatprep.subr.bf16.mxu1 %v6705_v1  ;;  %v5918_v51 = vld [vmem:[%s10720_s0 + $0x20c] ss:$20 sps:$4 sm:$0xff]   ;;  %v5924_v56 = vld [vmem:[%s10720_s0 + $0xf4] ss:$20 sps:$4 sm:$0xff]   ;;  %v5923_v58 = vld [vmem:[%s10721_s1 + $0xd8] sm:$0xff]  }
  0x14   :  { %v5926_v57 = vld [vmem:[%s10720_s0 + $0x234] ss:$20 sps:$4 sm:$0xff]   ;;  %v5928_v59 = vld [vmem:[%s10720_s0 + $0xf0] ss:$20 sps:$4 sm:$0xff]   ;;  %v5937_v2 = vld [vmem:[%s10720_s0 + $0x118] ss:$20 sps:$4 sm:$0xff]  }
  0x15   :  { %v5929_v60 = vld [vmem:[%s10720_s0 + $0x230] ss:$20 sps:$4 sm:$0xff]   ;;  %v5932_v0 = vld [vmem:[%s10721_s1 + $0xe8] sm:$0xff]  }
  0x16   :  { %1423 = vmatpush1.bf16.msra.mxu0 %v5864_v7  ;;  %5760 = vmatpush1.bf16.msra.mxu1 %v5864_v7  ;;  %v5931_v61 = vld [vmem:[%s10721_s1 + $0xe0] sm:$0xff]   ;;  %v5933_v62 = vld [vmem:[%s10720_s0 + $0x11c] ss:$20 sps:$4 sm:$0xff]   ;;  %v5938_v3 = vld [vmem:[%s10720_s0 + $0x258] ss:$20 sps:$4 sm:$0xff]  }
  0x17   :  { %1424 = vmatprep.subr.bf16.mxu0 %v6705_v1  ;;  %5745 = vmatprep.subr.bf16.mxu1 %v6705_v1  ;;  %v5935_v63 = vld [vmem:[%s10720_s0 + $0x25c] ss:$20 sps:$4 sm:$0xff]   ;;  %v5941_v5 = vld [vmem:[%s10720_s0 + $0x284] ss:$20 sps:$4 sm:$0xff]   ;;  %v5945_v6 = vld [vmem:[%s10720_s0 + $0xc] ss:$20 sps:$4 sm:$0xff]  }
  0x18   :  { %v5939_v4 = vld [vmem:[%s10721_s1 + $0xf0] sm:$0xff]   ;;  %v5940_v7 = vld [vmem:[%s10721_s1 + $0xf8] sm:$0xff]  }
  0x19   :  { %v5943_v8 = vld [vmem:[%s10720_s0 + $0x8] ss:$20 sps:$4 sm:$0xff]  }
  0x1a   :  { %1425 = vmatpush1.bf16.msra.mxu0 %v5865_v9  ;;  %5761 = vmatpush1.bf16.msra.mxu1 %v5865_v9  ;;  %v5946_v9 = vld [vmem:[%s10720_s0 + $0x280] ss:$20 sps:$4 sm:$0xff]  }
  0x1b   :  { %1426 = vmatprep.subr.bf16.mxu0 %v6705_v1  ;;  %5746 = vmatprep.subr.bf16.mxu1 %v6705_v1 }
  0x1e   :  { %1427 = vmatpush1.bf16.msra.mxu0 %v5866_v10  ;;  %5762 = vmatpush1.bf16.msra.mxu1 %v5866_v10  ;;  %v5947_v10 = vld [vmem:[%s10720_s0 + $0x2ac] ss:$20 sps:$4 sm:$0xff]  }
  0x1f   :  { %1428 = vmatprep.subr.bf16.mxu0 %v6705_v1  ;;  %5747 = vmatprep.subr.bf16.mxu1 %v6705_v1 }
  0x22   :  { %1429 = vmatpush1.bf16.msra.mxu0 %v5867_v11  ;;  %5763 = vmatpush1.bf16.msra.mxu1 %v5867_v11  ;;  %v5949_v11 = vld [vmem:[%s10720_s0 + $0x34] ss:$20 sps:$4 sm:$0xff]  }
  0x23   :  { %1430 = vmatprep.subr.bf16.mxu0 %v6705_v1  ;;  %5748 = vmatprep.subr.bf16.mxu1 %v6705_v1 }
  0x26   :  { %1431 = vmatpush1.bf16.msra.mxu0 %v5868_v12  ;;  %5764 = vmatpush1.bf16.msra.mxu1 %v5868_v12  ;;  %v5952_v12 = vld [vmem:[%s10720_s0 + $0x30] ss:$20 sps:$4 sm:$0xff]  }
  0x27   :  { %1432 = vmatprep.subr.bf16.mxu0 %v6705_v1  ;;  %5749 = vmatprep.subr.bf16.mxu1 %v6705_v1 }
  0x2a   :  { %1433 = vmatpush1.bf16.msra.mxu0 %v5869_v13  ;;  %5765 = vmatpush1.bf16.msra.mxu1 %v5869_v13  ;;  %v5953_v13 = vld [vmem:[%s10720_s0 + $0x2d4] ss:$20 sps:$4 sm:$0xff]  }
  0x2b   :  { %1434 = vmatprep.subr.bf16.mxu0 %v6705_v1  ;;  %5750 = vmatprep.subr.bf16.mxu1 %v6705_v1 }
  0x2e   :  { %1435 = vmatpush1.bf16.msra.mxu0 %v5870_v14  ;;  %5766 = vmatpush1.bf16.msra.mxu1 %v5870_v14  ;;  %v5955_v14 = vld [vmem:[%s10720_s0 + $0x5c] ss:$20 sps:$4 sm:$0xff]  }
  0x2f   :  { %1436 = vmatprep.subr.bf16.mxu0 %v6705_v1  ;;  %5751 = vmatprep.subr.bf16.mxu1 %v6705_v1 }
  0x32   :  { %1437 = vmatpush1.bf16.msra.mxu0 %v5871_v15  ;;  %5767 = vmatpush1.bf16.msra.mxu1 %v5871_v15 }
  0x33   :  { %1438 = vmatprep.subr.bf16.mxu0 %v6705_v1  ;;  %5752 = vmatprep.subr.bf16.mxu1 %v6705_v1 }
  0x36   :  { %1439 = vmatpush1.bf16.msra.mxu0 %v5872_v16  ;;  %5768 = vmatpush1.bf16.msra.mxu1 %v5872_v16 }
  0x37   :  { %1440 = vmatprep.subr.bf16.mxu0 %v6705_v1  ;;  %5753 = vmatprep.subr.bf16.mxu1 %v6705_v1 }
  0x3a   :  { %1441 = vmatpush1.bf16.msra.mxu0 %v5873_v17  ;;  %5769 = vmatpush1.bf16.msra.mxu1 %v5873_v17 }
  0x3b   :  { %1442 = vmatprep.subr.bf16.mxu0 %v6705_v1  ;;  %5754 = vmatprep.subr.bf16.mxu1 %v6705_v1 }
  0x3e   :  { %1443 = vmatpush1.bf16.msra.mxu0 %v5874_v18  ;;  %5770 = vmatpush1.bf16.msra.mxu1 %v5874_v18 }
  0x3f   :  { %1701 = vmatprep.subr.bf16.mxu0 %v6705_v1  ;;  %5667 = vmatprep.subr.bf16.mxu1 %v5881_v19 }
  0x41   :  { %1445 = vmatmul.mubr.bf16.vlgmr.msra.gmra.mrb[0].mxu0 %v5875_v20  ;;  %1509 = vmatmul.mubr.bf16.vlgmr.msra.gmra.mrb[0].mxu1 %v5878_v21 }
  0x42   :  { %1702 = vmatpush1.bf16.msra.mxu0 %v5882_v22  ;;  %5668 = vmatpush3.bf16.msra.mxu1 %v5881_v19 }
  0x43   :  { %1703 = vmatprep.subr.bf16.mxu0 %v6705_v1  ;;  %1452 = vmatprep.mubr.bf16.mxu0 %v5884_v23 }
  0x44   :  { %1516 = vmatprep.mubr.bf16.mxu1 %v5886_v24  ;;  %5669 = vmatprep.subr.bf16.mxu1 %v5930_v25 }
  0x46   :  { %1704 = vmatpush1.bf16.msra.mxu0 %v5883_v26  ;;  %5670 = vmatpush3.bf16.msra.mxu1 %v5930_v25 }
  0x47   :  { %1705 = vmatprep.subr.bf16.mxu0 %v6705_v1  ;;  %5671 = vmatprep.subr.bf16.mxu1 %v5971_v30 }
  0x49   :  { %1453 = vmatmul.mubr.bf16.gmra.mrb[4].mxu0 %v5888_v27  ;;  %1517 = vmatmul.mubr.bf16.gmra.mrb[4].mxu1 %v5889_v28 }
  0x4a   :  { %1706 = vmatpush1.bf16.msra.mxu0 %v5890_v29  ;;  %1460 = vmatprep.mubr.bf16.mxu0 %v5892_v31 }
  0x4b   :  { %1707 = vmatprep.subr.bf16.mxu0 %v6705_v1  ;;  %1524 = vmatprep.mubr.bf16.mxu1 %v5894_v32 }
  0x4c   :  { %5672 = vmatpush3.bf16.msra.mxu1 %v5971_v30 }
  0x4d   :  { %5673 = vmatprep.subr.bf16.mxu1 %v6008_v44 }
  0x4e   :  { %1708 = vmatpush1.bf16.msra.mxu0 %v5891_v33 }
  0x4f   :  { %1709 = vmatprep.subr.bf16.mxu0 %v6705_v1 }
  0x50   :  { %5674 = vmatpush3.bf16.msra.mxu1 %v6008_v44 }
  0x51   :  { %1461 = vmatmul.mubr.bf16.gmra.mrb[8].mxu0 %v5896_v34  ;;  %1525 = vmatmul.mubr.bf16.gmra.mrb[8].mxu1 %v5897_v35 }
  0x52   :  { %1710 = vmatpush1.bf16.msra.mxu0 %v5898_v36  ;;  %1468 = vmatprep.mubr.bf16.mxu0 %v5900_v37 }
  0x53   :  { %1711 = vmatprep.subr.bf16.mxu0 %v6705_v1  ;;  %1532 = vmatprep.mubr.bf16.mxu1 %v5902_v38 }
  0x56   :  { %1712 = vmatpush1.bf16.msra.mxu0 %v5899_v39 }
  0x57   :  { %1713 = vmatprep.subr.bf16.mxu0 %v6705_v1 }
  0x59   :  { %1469 = vmatmul.mubr.bf16.gmra.mrb[12].mxu0 %v5904_v40  ;;  %1533 = vmatmul.mubr.bf16.gmra.mrb[12].mxu1 %v5905_v41 }
  0x5a   :  { %1714 = vmatpush1.bf16.msra.mxu0 %v5906_v42  ;;  %1476 = vmatprep.mubr.bf16.mxu0 %v5908_v43 }
  0x5b   :  { %1715 = vmatprep.subr.bf16.mxu0 %v6705_v1  ;;  %1540 = vmatprep.mubr.bf16.mxu1 %v5910_v45 }
  0x5e   :  { %1716 = vmatpush1.bf16.msra.mxu0 %v5907_v46 }
  0x5f   :  { %1717 = vmatprep.subr.bf16.mxu0 %v6705_v1 }
  0x61   :  { %1477 = vmatmul.mubr.bf16.gmra.mrb[16].mxu0 %v5912_v47  ;;  %1541 = vmatmul.mubr.bf16.gmra.mrb[16].mxu1 %v5913_v48 }
  0x62   :  { %1718 = vmatpush1.bf16.msra.mxu0 %v5914_v49  ;;  %1484 = vmatprep.mubr.bf16.mxu0 %v5916_v50 }
  0x63   :  { %1719 = vmatprep.subr.bf16.mxu0 %v6705_v1  ;;  %1548 = vmatprep.mubr.bf16.mxu1 %v5918_v51 }
  0x66   :  { %1720 = vmatpush1.bf16.msra.mxu0 %v5915_v52 }
  0x67   :  { %1721 = vmatprep.subr.bf16.mxu0 %v6705_v1 }
  0x69   :  { %1485 = vmatmul.mubr.bf16.gmra.mrb[20].mxu0 %v5920_v53  ;;  %1549 = vmatmul.mubr.bf16.gmra.mrb[20].mxu1 %v5921_v54 }
  0x6a   :  { %1722 = vmatpush1.bf16.msra.mxu0 %v5922_v55  ;;  %1492 = vmatprep.mubr.bf16.mxu0 %v5924_v56 }
  0x6b   :  { %1723 = vmatprep.subr.bf16.mxu0 %v6705_v1  ;;  %1556 = vmatprep.mubr.bf16.mxu1 %v5926_v57 }
  0x6e   :  { %1724 = vmatpush1.bf16.msra.mxu0 %v5923_v58 }
  0x6f   :  { %1725 = vmatprep.subr.bf16.mxu0 %v6705_v1 }
  0x71   :  { %1493 = vmatmul.mubr.bf16.gmra.mrb[24].mxu0 %v5928_v59  ;;  %1557 = vmatmul.mubr.bf16.gmra.mrb[24].mxu1 %v5929_v60 }
  0x72   :  { %1726 = vmatpush1.bf16.msra.mxu0 %v5931_v61  ;;  %1500 = vmatprep.mubr.bf16.mxu0 %v5933_v62 }
  0x73   :  { %1727 = vmatprep.subr.bf16.mxu0 %v6705_v1  ;;  %1564 = vmatprep.mubr.bf16.mxu1 %v5935_v63 }
  0x76   :  { %1728 = vmatpush1.bf16.msra.mxu0 %v5932_v0 }
  0x77   :  { %1729 = vmatprep.subr.bf16.mxu0 %v6705_v1 }
  0x79   :  { %1501 = vmatmul.mubr.bf16.gmra.mrb[28].mxu0 %v5937_v2  ;;  %1565 = vmatmul.mubr.bf16.gmra.mrb[28].mxu1 %v5938_v3 }
  0x7a   :  { %1730 = vmatpush1.bf16.msra.mxu0 %v5939_v4  ;;  %1572 = vmatprep.mubr.bf16.mxu1 %v5941_v5 }
  0x7b   :  { %1731 = vmatprep.subr.bf16.mxu0 %v6705_v1  ;;  %1733 = vmatprep.mubr.bf16.mxu0 %v5945_v6  ;;  %v5951_v1 = vld [vmem:[%s10720_s0 + $0x2a8] ss:$20 sps:$4 sm:$0xff]  }
  0x7e   :  { %1732 = vmatpush1.bf16.msra.mxu0 %v5940_v7 }
  0x81   :  { %1573 = vmatmul.mubr.bf16.gmra.mrb[32].mxu1 %v5946_v9  ;;  %1734 = vmatmul.mubr.bf16.vlgmr.msra.gmra.mrb[0].mxu0 %v5943_v8 }
  0x82   :  { %1580 = vmatprep.mubr.bf16.mxu1 %v5947_v10  ;;  %1741 = vmatprep.mubr.bf16.mxu0 %v5949_v11 }
  0x83   :  { %17 = vsyncpa [#allocation5], 0  ;;  %v5957_v15 = vld [vmem:[%s10720_s0 + $0x2d0] ss:$20 sps:$4 sm:$0xff]   ;;  %v5958_v16 = vld [vmem:[%s10720_s0 + $0x58] ss:$20 sps:$4 sm:$0xff]  }
  0x84   :  { %v5959_v17 = vld [vmem:[%s10720_s0 + $0x2fc] ss:$20 sps:$4 sm:$0xff]   ;;  %v5961_v18 = vld [vmem:[%s10720_s0 + $0x84] ss:$20 sps:$4 sm:$0xff]   ;;  %v5964_v20 = vld [vmem:[%s10720_s0 + $0x80] ss:$20 sps:$4 sm:$0xff]  }
  0x85   :  { %v5963_v19 = vld [vmem:[%s10720_s0 + $0x2f8] ss:$20 sps:$4 sm:$0xff]   ;;  %v5969_v23 = vld [vmem:[%s10720_s0 + $0x320] ss:$20 sps:$4 sm:$0xff]   ;;  %v5970_v24 = vld [vmem:[%s10720_s0 + $0xa8] ss:$20 sps:$4 sm:$0xff]  }
  0x86   :  { %v5965_v21 = vld [vmem:[%s10720_s0 + $0x324] ss:$20 sps:$4 sm:$0xff]   ;;  %v5967_v22 = vld [vmem:[%s10720_s0 + $0xac] ss:$20 sps:$4 sm:$0xff]   ;;  %v5974_v26 = vld [vmem:[%s10720_s0 + $0xd4] ss:$20 sps:$4 sm:$0xff]  }
  0x87   :  { %v5972_v25 = vld [vmem:[%s10720_s0 + $0x34c] ss:$20 sps:$4 sm:$0xff]   ;;  %v5976_v27 = vld [vmem:[%s10720_s0 + $0x348] ss:$20 sps:$4 sm:$0xff]   ;;  %v5977_v28 = vld [vmem:[%s10720_s0 + $0xd0] ss:$20 sps:$4 sm:$0xff]  }
  0x88   :  { %v5978_v29 = vld [vmem:[%s10720_s0 + $0x374] ss:$20 sps:$4 sm:$0xff]   ;;  %v5980_v30 = vld [vmem:[%s10720_s0 + $0xfc] ss:$20 sps:$4 sm:$0xff]   ;;  %v5983_v32 = vld [vmem:[%s10720_s0 + $0xf8] ss:$20 sps:$4 sm:$0xff]  }
  0x89   :  { %1581 = vmatmul.mubr.bf16.gmra.mrb[36].mxu1 %v5951_v1  ;;  %1742 = vmatmul.mubr.bf16.gmra.mrb[4].mxu0 %v5952_v12  ;;  %v5982_v31 = vld [vmem:[%s10720_s0 + $0x370] ss:$20 sps:$4 sm:$0xff]   ;;  %v5988_v35 = vld [vmem:[%s10720_s0 + $0x398] ss:$20 sps:$4 sm:$0xff]   ;;  %v5989_v36 = vld [vmem:[%s10720_s0 + $0x120] ss:$20 sps:$4 sm:$0xff]  }
  0x8a   :  { %1588 = vmatprep.mubr.bf16.mxu1 %v5953_v13  ;;  %1749 = vmatprep.mubr.bf16.mxu0 %v5955_v14  ;;  %v5984_v33 = vld [vmem:[%s10720_s0 + $0x39c] ss:$20 sps:$4 sm:$0xff]   ;;  %v5986_v34 = vld [vmem:[%s10720_s0 + $0x124] ss:$20 sps:$4 sm:$0xff]   ;;  %v5992_v38 = vld [vmem:[%s10720_s0 + $0x14c] ss:$20 sps:$4 sm:$0xff]  }
  0x8b   :  { %v5990_v37 = vld [vmem:[%s10720_s0 + $0x3c4] ss:$20 sps:$4 sm:$0xff]   ;;  %v5994_v39 = vld [vmem:[%s10720_s0 + $0x3c0] ss:$20 sps:$4 sm:$0xff]   ;;  %v5995_v40 = vld [vmem:[%s10720_s0 + $0x148] ss:$20 sps:$4 sm:$0xff]  }
  0x8c   :  { %v5996_v41 = vld [vmem:[%s10720_s0 + $0x3ec] ss:$20 sps:$4 sm:$0xff]   ;;  %v5998_v42 = vld [vmem:[%s10720_s0 + $0x174] ss:$20 sps:$4 sm:$0xff]   ;;  %v6001_v44 = vld [vmem:[%s10720_s0 + $0x170] ss:$20 sps:$4 sm:$0xff]  }
  0x8d   :  { %v6000_v43 = vld [vmem:[%s10720_s0 + $0x3e8] ss:$20 sps:$4 sm:$0xff]   ;;  %v6006_v47 = vld [vmem:[%s10720_s0 + $0x410] ss:$20 sps:$4 sm:$0xff]   ;;  %v6007_v48 = vld [vmem:[%s10720_s0 + $0x198] ss:$20 sps:$4 sm:$0xff]  }
  0x8e   :  { %v6002_v45 = vld [vmem:[%s10720_s0 + $0x414] ss:$20 sps:$4 sm:$0xff]   ;;  %v6004_v46 = vld [vmem:[%s10720_s0 + $0x19c] ss:$20 sps:$4 sm:$0xff]   ;;  %v6011_v50 = vld [vmem:[%s10720_s0 + $0x1c4] ss:$20 sps:$4 sm:$0xff]  }
  0x8f   :  { %v6009_v49 = vld [vmem:[%s10720_s0 + $0x43c] ss:$20 sps:$4 sm:$0xff]   ;;  %v6013_v51 = vld [vmem:[%s10720_s0 + $0x438] ss:$20 sps:$4 sm:$0xff]   ;;  %v6014_v52 = vld [vmem:[%s10720_s0 + $0x1c0] ss:$20 sps:$4 sm:$0xff]  }
  0x90   :  { %v6015_v53 = vld [vmem:[%s10720_s0 + $0x464] ss:$20 sps:$4 sm:$0xff]   ;;  %v6017_v54 = vld [vmem:[%s10720_s0 + $0x1ec] ss:$20 sps:$4 sm:$0xff]   ;;  %v6020_v56 = vld [vmem:[%s10720_s0 + $0x1e8] ss:$20 sps:$4 sm:$0xff]  }
  0x91   :  { %1589 = vmatmul.mubr.bf16.gmra.mrb[40].mxu1 %v5957_v15  ;;  %1750 = vmatmul.mubr.bf16.gmra.mrb[8].mxu0 %v5958_v16  ;;  %v6019_v55 = vld [vmem:[%s10720_s0 + $0x460] ss:$20 sps:$4 sm:$0xff]   ;;  %v6025_v59 = vld [vmem:[%s10720_s0 + $0x488] ss:$20 sps:$4 sm:$0xff]   ;;  %v6026_v60 = vld [vmem:[%s10720_s0 + $0x210] ss:$20 sps:$4 sm:$0xff]  }
  0x92   :  { %1596 = vmatprep.mubr.bf16.mxu1 %v5959_v17  ;;  %1757 = vmatprep.mubr.bf16.mxu0 %v5961_v18  ;;  %v6021_v57 = vld [vmem:[%s10720_s0 + $0x48c] ss:$20 sps:$4 sm:$0xff]   ;;  %v6023_v58 = vld [vmem:[%s10720_s0 + $0x214] ss:$20 sps:$4 sm:$0xff]   ;;  %v6029_v62 = vld [vmem:[%s10720_s0 + $0x23c] ss:$20 sps:$4 sm:$0xff]  }
  0x93   :  { %v6027_v61 = vld [vmem:[%s10720_s0 + $0x4b4] ss:$20 sps:$4 sm:$0xff]   ;;  %v6031_v63 = vld [vmem:[%s10720_s0 + $0x4b0] ss:$20 sps:$4 sm:$0xff]   ;;  %v6032_v0 = vld [vmem:[%s10720_s0 + $0x238] ss:$20 sps:$4 sm:$0xff]  }
  0x94   :  { %v6033_v2 = vld [vmem:[%s10720_s0 + $0x4dc] ss:$20 sps:$4 sm:$0xff]   ;;  %v6035_v3 = vld [vmem:[%s10720_s0 + $0x264] ss:$20 sps:$4 sm:$0xff]   ;;  %v6038_v5 = vld [vmem:[%s10720_s0 + $0x260] ss:$20 sps:$4 sm:$0xff]  }
  0x95   :  { %v6037_v4 = vld [vmem:[%s10720_s0 + $0x4d8] ss:$20 sps:$4 sm:$0xff]   ;;  %v6041_v7 = vld [vmem:[%s10720_s0 + $0x10] ss:$20 sps:$4 sm:$0xff]   ;;  %vm1315_vm0 = vcmask 523264   ;;  %vm3849_vm1 = vcmask 261120  }
  0x96   :  { %v6039_v6 = vld [vmem:[%s10720_s0 + $0x28c] ss:$20 sps:$4 sm:$0xff]   ;;  %v6042_v8 = vld [vmem:[%s10720_s0 + $0x288] ss:$20 sps:$4 sm:$0xff]   ;;  %v6047_v1 = vld [vmem:[%s10720_s0 + $0x2b0] ss:$20 sps:$4 sm:$0xff]  }
  0x97   :  { %v6043_v9 = vld [vmem:[%s10720_s0 + $0x38] ss:$20 sps:$4 sm:$0xff]   ;;  %v6044_v10 = vld [vmem:[%s10720_s0 + $0x2b4] ss:$20 sps:$4 sm:$0xff]   ;;  %v6049_v13 = vld [vmem:[%s10720_s0 + $0x2dc] ss:$20 sps:$4 sm:$0xff]  }
  0x98   :  { %v6046_v11 = vld [vmem:[%s10720_s0 + $0x60] ss:$20 sps:$4 sm:$0xff]   ;;  %v6048_v12 = vld [vmem:[%s10720_s0 + $0x88] ss:$20 sps:$4 sm:$0xff]   ;;  %v6051_v14 = vld [vmem:[%s10720_s0 + $0xb0] ss:$20 sps:$4 sm:$0xff]  }
  0x99   :  { %1597 = vmatmul.mubr.bf16.gmra.mrb[44].mxu1 %v5963_v19  ;;  %1758 = vmatmul.mubr.bf16.gmra.mrb[12].mxu0 %v5964_v20  ;;  %v6052_v15 = vld [vmem:[%s10720_s0 + $0x2d8] ss:$20 sps:$4 sm:$0xff]   ;;  %v6056_v18 = vld [vmem:[%s10720_s0 + $0x100] ss:$20 sps:$4 sm:$0xff]   ;;  %s6708_s23 = smov [#allocation4]   ;;  %s6709_s25 = smov [#allocation6]  }
  0x9a   :  { %1604 = vmatprep.mubr.bf16.mxu1 %v5965_v21  ;;  %1765 = vmatprep.mubr.bf16.mxu0 %v5967_v22  ;;  %v6053_v16 = vld [vmem:[%s10720_s0 + $0xd8] ss:$20 sps:$4 sm:$0xff]   ;;  %v6057_v21 = vld [vmem:[%s10720_s0 + $0x300] ss:$20 sps:$4 sm:$0xff]   ;;  %v6058_v22 = vld [vmem:[%s10720_s0 + $0x128] ss:$20 sps:$4 sm:$0xff]  }
  0x9b   :  { %v6054_v17 = vld [vmem:[%s10720_s0 + $0x304] ss:$20 sps:$4 sm:$0xff]   ;;  %s5309_s24 = sshll.u32 %s6708_s23, 4  ;;  %s5321_s26 = sshll.u32 %s6709_s25, 4  ;;  %s5310_s24 = int_to_ptr.vmem [resolvable:$true] %s5309_s24  ;;  %s10658_s26 = int_to_ptr.vmem [resolvable:$true] %s5321_s26 }
  0x9c   :  { %s6710_s28 = smov [#allocation2]   ;;  %p6640_p1 = scmp.lt.s32.totalorder %s5310_s24, %s5310_s24 }
  0x9d   :  { %s5297_s29 = sshll.u32 %s6710_s28, 4  ;;  %s10662_s29 = int_to_ptr.vmem [resolvable:$true] %s5297_s29 }
  0xa1   :  { %1605 = vmatmul.mubr.bf16.gmra.mrb[48].mxu1 %v5969_v23  ;;  %1766 = vmatmul.mubr.bf16.gmra.mrb[16].mxu0 %v5970_v24  ;;  %v6059_v24 = vld [vmem:[%s10720_s0 + $0x32c] ss:$20 sps:$4 sm:$0xff]  }
  0xa2   :  { %1612 = vmatprep.mubr.bf16.mxu1 %v5972_v25  ;;  %1773 = vmatprep.mubr.bf16.mxu0 %v5974_v26  ;;  %v6061_v25 = vld [vmem:[%s10720_s0 + $0x150] ss:$20 sps:$4 sm:$0xff]  }
  0xa9   :  { %1613 = vmatmul.mubr.bf16.gmra.mrb[52].mxu1 %v5976_v27  ;;  %1774 = vmatmul.mubr.bf16.gmra.mrb[20].mxu0 %v5977_v28 }
  0xaa   :  { %1620 = vmatprep.mubr.bf16.mxu1 %v5978_v29  ;;  %1781 = vmatprep.mubr.bf16.mxu0 %v5980_v30  ;;  %v6062_v29 = vld [vmem:[%s10720_s0 + $0x328] ss:$20 sps:$4 sm:$0xff]   ;;  %v6063_v30 = vld [vmem:[%s10720_s0 + $0x178] ss:$20 sps:$4 sm:$0xff]  }
  0xb1   :  { %1621 = vmatmul.mubr.bf16.gmra.mrb[56].mxu1 %v5982_v31  ;;  %1782 = vmatmul.mubr.bf16.gmra.mrb[24].mxu0 %v5983_v32  ;;  %v6064_v32 = vld [vmem:[%s10720_s0 + $0x354] ss:$20 sps:$4 sm:$0xff]  }
  0xb2   :  { %1628 = vmatprep.mubr.bf16.mxu1 %v5984_v33  ;;  %1789 = vmatprep.mubr.bf16.mxu0 %v5986_v34  ;;  %v6066_v33 = vld [vmem:[%s10720_s0 + $0x1a0] ss:$20 sps:$4 sm:$0xff]  }
  0xb9   :  { %1629 = vmatmul.mubr.bf16.gmra.mrb[60].mxu1 %v5988_v35  ;;  %1790 = vmatmul.mubr.bf16.gmra.mrb[28].mxu0 %v5989_v36 }
  0xba   :  { %1636 = vmatprep.mubr.bf16.mxu1 %v5990_v37  ;;  %1797 = vmatprep.mubr.bf16.mxu0 %v5992_v38  ;;  %v6067_v37 = vld [vmem:[%s10720_s0 + $0x350] ss:$20 sps:$4 sm:$0xff]   ;;  %v6068_v38 = vld [vmem:[%s10720_s0 + $0x1c8] ss:$20 sps:$4 sm:$0xff]  }
  0xc1   :  { %1637 = vmatmul.mubr.bf16.gmra.mrb[64].mxu1 %v5994_v39  ;;  %1798 = vmatmul.mubr.bf16.gmra.mrb[32].mxu0 %v5995_v40  ;;  %v6069_v40 = vld [vmem:[%s10720_s0 + $0x37c] ss:$20 sps:$4 sm:$0xff]  }
  0xc2   :  { %1644 = vmatprep.mubr.bf16.mxu1 %v5996_v41  ;;  %1805 = vmatprep.mubr.bf16.mxu0 %v5998_v42  ;;  %v6071_v41 = vld [vmem:[%s10720_s0 + $0x1f0] ss:$20 sps:$4 sm:$0xff]  }
  0xc9   :  { %1645 = vmatmul.mubr.bf16.gmra.mrb[68].mxu1 %v6000_v43  ;;  %1806 = vmatmul.mubr.bf16.gmra.mrb[36].mxu0 %v6001_v44 }
  0xca   :  { %1652 = vmatprep.mubr.bf16.mxu1 %v6002_v45  ;;  %1813 = vmatprep.mubr.bf16.mxu0 %v6004_v46  ;;  %v6072_v45 = vld [vmem:[%s10720_s0 + $0x378] ss:$20 sps:$4 sm:$0xff]  }
  0xcb   :  { %v6073_v46 = vld [vmem:[%s10720_s0 + $0x218] ss:$20 sps:$4 sm:$0xff]  }
  0xd1   :  { %1653 = vmatmul.mubr.bf16.gmra.mrb[72].mxu1 %v6006_v47  ;;  %1814 = vmatmul.mubr.bf16.gmra.mrb[40].mxu0 %v6007_v48  ;;  %v6074_v48 = vld [vmem:[%s10720_s0 + $0x3a4] ss:$20 sps:$4 sm:$0xff]  }
  0xd2   :  { %1660 = vmatprep.mubr.bf16.mxu1 %v6009_v49  ;;  %1821 = vmatprep.mubr.bf16.mxu0 %v6011_v50  ;;  %v6076_v49 = vld [vmem:[%s10720_s0 + $0x240] ss:$20 sps:$4 sm:$0xff]  }
  0xd9   :  { %1661 = vmatmul.mubr.bf16.gmra.mrb[76].mxu1 %v6013_v51  ;;  %1822 = vmatmul.mubr.bf16.gmra.mrb[44].mxu0 %v6014_v52 }
  0xda   :  { %1668 = vmatprep.mubr.bf16.mxu1 %v6015_v53  ;;  %1829 = vmatprep.mubr.bf16.mxu0 %v6017_v54  ;;  %v6077_v53 = vld [vmem:[%s10720_s0 + $0x3a0] ss:$20 sps:$4 sm:$0xff]   ;;  %v6078_v54 = vld [vmem:[%s10720_s0 + $0x268] ss:$20 sps:$4 sm:$0xff]  }
  0xe1   :  { %1669 = vmatmul.mubr.bf16.gmra.mrb[80].mxu1 %v6019_v55  ;;  %1830 = vmatmul.mubr.bf16.gmra.mrb[48].mxu0 %v6020_v56  ;;  %v6079_v56 = vld [vmem:[%s10720_s0 + $0x3cc] ss:$20 sps:$4 sm:$0xff]  }
  0xe2   :  { %1676 = vmatprep.mubr.bf16.mxu1 %v6021_v57  ;;  %1837 = vmatprep.mubr.bf16.mxu0 %v6023_v58  ;;  %v6081_v57 = vld [vmem:[%s10720_s0 + $0x290] ss:$20 sps:$4 sm:$0xff]  }
  0xe9   :  { %1677 = vmatmul.mubr.bf16.gmra.mrb[84].mxu1 %v6025_v59  ;;  %1838 = vmatmul.mubr.bf16.gmra.mrb[52].mxu0 %v6026_v60 }
  0xea   :  { %1684 = vmatprep.mubr.bf16.mxu1 %v6027_v61  ;;  %1845 = vmatprep.mubr.bf16.mxu0 %v6029_v62  ;;  %v6082_v61 = vld [vmem:[%s10720_s0 + $0x3c8] ss:$20 sps:$4 sm:$0xff]   ;;  %v6083_v62 = vld [vmem:[%s10720_s0 + $0x2b8] ss:$20 sps:$4 sm:$0xff]  }
  0xf1   :  { %1685 = vmatmul.mubr.bf16.gmra.mrb[88].mxu1 %v6031_v63  ;;  %1846 = vmatmul.mubr.bf16.gmra.mrb[56].mxu0 %v6032_v0  ;;  %v6084_v0 = vld [vmem:[%s10720_s0 + $0x3f4] ss:$20 sps:$4 sm:$0xff]  }
  0xf2   :  { %1692 = vmatprep.mubr.bf16.mxu1 %v6033_v2  ;;  %1853 = vmatprep.mubr.bf16.mxu0 %v6035_v3  ;;  %v6086_v2 = vld [vmem:[%s10720_s0 + $0x2e0] ss:$20 sps:$4 sm:$0xff]  }
  0xf9   :  { %1693 = vmatmul.mubr.bf16.gmra.mrb[92].mxu1 %v6037_v4  ;;  %1854 = vmatmul.mubr.bf16.gmra.mrb[60].mxu0 %v6038_v5 }
  0xfa   :  { %1861 = vmatprep.mubr.bf16.mxu0 %v6039_v6  ;;  %5675 = vmatprep.mubr.msk.bf16.mxu1 %vm1315_vm0, %v6041_v7  ;;  %v6087_v6 = vld [vmem:[%s10720_s0 + $0x3f0] ss:$20 sps:$4 sm:$0xff]   ;;  %v6088_v7 = vld [vmem:[%s10720_s0 + $0x308] ss:$20 sps:$4 sm:$0xff]  }
 0x101   :  { %1862 = vmatmul.mubr.bf16.gmra.mrb[64].mxu0 %v6042_v8  ;;  %5676 = vmatmul.mubr.msk.bf16.vlgmr.msra.gmra.mrb[96].mxu1 %vm1315_vm0, %v6043_v9  ;;  %v6089_v9 = vld [vmem:[%s10720_s0 + $0x41c] ss:$20 sps:$4 sm:$0xff]  }
 0x102   :  { %1869 = vmatprep.mubr.bf16.mxu0 %v6044_v10  ;;  %5679 = vmatprep.mubr.msk.bf16.mxu1 %vm1315_vm0, %v6046_v11  ;;  %v6091_v10 = vld [vmem:[%s10720_s0 + $0x330] ss:$20 sps:$4 sm:$0xff]  }
 0x109   :  { %1870 = vmatmul.mubr.bf16.gmra.mrb[68].mxu0 %v6047_v1  ;;  %5680 = vmatmul.mubr.msk.bf16.gmra.mrb[100].mxu1 %vm1315_vm0, %v6048_v12 }
 0x10a   :  { %1877 = vmatprep.mubr.bf16.mxu0 %v6049_v13  ;;  %5683 = vmatprep.mubr.msk.bf16.mxu1 %vm1315_vm0, %v6051_v14  ;;  %v6092_v13 = vld [vmem:[%s10720_s0 + $0x418] ss:$20 sps:$4 sm:$0xff]  }
 0x10b   :  { %v6093_v14 = vld [vmem:[%s10720_s0 + $0x358] ss:$20 sps:$4 sm:$0xff]  }
 0x111   :  { %1878 = vmatmul.mubr.bf16.gmra.mrb[72].mxu0 %v6052_v15  ;;  %5684 = vmatmul.mubr.msk.bf16.gmra.mrb[104].mxu1 %vm1315_vm0, %v6053_v16  ;;  %v6094_v16 = vld [vmem:[%s10720_s0 + $0x444] ss:$20 sps:$4 sm:$0xff]  }
 0x112   :  { %1885 = vmatprep.mubr.bf16.mxu0 %v6054_v17  ;;  %5687 = vmatprep.mubr.msk.bf16.mxu1 %vm1315_vm0, %v6056_v18  ;;  %v6096_v17 = vld [vmem:[%s10720_s0 + $0x380] ss:$20 sps:$4 sm:$0xff]  }
 0x114   :  { %v7261_v19 = vpop.f32.mrb[0].mxu1 }
 0x115   :  { %v1512_v20 = vpop.f32.mrb[1].mxu1 }
 0x116   :  { %v7269_v23 = vpop.f32.mrb[2].mxu1 }
 0x117   :  { %v1515_v26 = vpop.f32.mrb[3].mxu1 }
 0x118   :  { %v6098_v26 = vld [vmem:[%s10720_s0 + $0x3a8] ss:$20 sps:$4 sm:$0xff]  }
 0x119   :  { %1886 = vmatmul.mubr.bf16.gmra.mrb[76].mxu0 %v6057_v21  ;;  %5688 = vmatmul.mubr.msk.bf16.gmra.mrb[108].mxu1 %vm1315_vm0, %v6058_v22 }
 0x11a   :  { %1893 = vmatprep.mubr.bf16.mxu0 %v6059_v24  ;;  %5691 = vmatprep.mubr.msk.bf16.mxu1 %vm1315_vm0, %v6061_v25  ;;  %v6097_v25 = vld [vmem:[%s10720_s0 + $0x440] ss:$20 sps:$4 sm:$0xff]  }
 0x11c   :  { %v7279_v27 = vpop.f32.mrb[4].mxu1 }
 0x11d   :  { %v1520_v28 = vpop.f32.mrb[5].mxu1 }
 0x11e   :  { %v7287_v31 = vpop.f32.mrb[6].mxu1 }
 0x11f   :  { %v1523_v34 = vpop.f32.mrb[7].mxu1 }
 0x121   :  { %1894 = vmatmul.mubr.bf16.gmra.mrb[80].mxu0 %v6062_v29  ;;  %5692 = vmatmul.mubr.msk.bf16.gmra.mrb[112].mxu1 %vm1315_vm0, %v6063_v30  ;;  %v6099_v30 = vld [vmem:[%s10720_s0 + $0x46c] ss:$20 sps:$4 sm:$0xff]  }
 0x122   :  { %1901 = vmatprep.mubr.bf16.mxu0 %v6064_v32  ;;  %5695 = vmatprep.mubr.msk.bf16.mxu1 %vm1315_vm0, %v6066_v33  ;;  %v6101_v32 = vld [vmem:[%s10720_s0 + $0x3d0] ss:$20 sps:$4 sm:$0xff]  }
 0x124   :  { %v7297_v35 = vpop.f32.mrb[8].mxu1 }
 0x125   :  { %v1528_v36 = vpop.f32.mrb[9].mxu1 }
 0x126   :  { %v7305_v39 = vpop.f32.mrb[10].mxu1 }
 0x127   :  { %v1531_v42 = vpop.f32.mrb[11].mxu1 }
 0x128   :  { %v6103_v42 = vld [vmem:[%s10720_s0 + $0x3f8] ss:$20 sps:$4 sm:$0xff]  }
 0x129   :  { %1902 = vmatmul.mubr.bf16.gmra.mrb[84].mxu0 %v6067_v37  ;;  %5696 = vmatmul.mubr.msk.bf16.gmra.mrb[116].mxu1 %vm1315_vm0, %v6068_v38 }
 0x12a   :  { %1909 = vmatprep.mubr.bf16.mxu0 %v6069_v40  ;;  %5699 = vmatprep.mubr.msk.bf16.mxu1 %vm1315_vm0, %v6071_v41  ;;  %v6102_v41 = vld [vmem:[%s10720_s0 + $0x468] ss:$20 sps:$4 sm:$0xff]  }
 0x12c   :  { %v7315_v43 = vpop.f32.mrb[12].mxu1 }
 0x12d   :  { %v1536_v44 = vpop.f32.mrb[13].mxu1 }
 0x12e   :  { %v7323_v47 = vpop.f32.mrb[14].mxu1 }
 0x12f   :  { %v1539_v50 = vpop.f32.mrb[15].mxu1 }
 0x131   :  { %1910 = vmatmul.mubr.bf16.gmra.mrb[88].mxu0 %v6072_v45  ;;  %5700 = vmatmul.mubr.msk.bf16.gmra.mrb[120].mxu1 %vm1315_vm0, %v6073_v46  ;;  %v6104_v46 = vld [vmem:[%s10720_s0 + $0x494] ss:$20 sps:$4 sm:$0xff]  }
 0x132   :  { %1917 = vmatprep.mubr.bf16.mxu0 %v6074_v48  ;;  %5703 = vmatprep.mubr.msk.bf16.mxu1 %vm1315_vm0, %v6076_v49  ;;  %v6106_v48 = vld [vmem:[%s10720_s0 + $0x420] ss:$20 sps:$4 sm:$0xff]  }
 0x134   :  { %v7333_v51 = vpop.f32.mrb[16].mxu1 }
 0x135   :  { %v1544_v52 = vpop.f32.mrb[17].mxu1 }
 0x136   :  { %v7341_v55 = vpop.f32.mrb[18].mxu1 }
 0x137   :  { %v1547_v58 = vpop.f32.mrb[19].mxu1 }
 0x138   :  { %v6108_v58 = vld [vmem:[%s10720_s0 + $0x448] ss:$20 sps:$4 sm:$0xff]  }
 0x139   :  { %1918 = vmatmul.mubr.bf16.gmra.mrb[92].mxu0 %v6077_v53  ;;  %5704 = vmatmul.mubr.msk.bf16.gmra.mrb[124].mxu1 %vm1315_vm0, %v6078_v54 }
 0x13a   :  { %1925 = vmatprep.mubr.bf16.mxu0 %v6079_v56  ;;  %5707 = vmatprep.mubr.msk.bf16.mxu1 %vm1315_vm0, %v6081_v57  ;;  %v6107_v57 = vld [vmem:[%s10720_s0 + $0x490] ss:$20 sps:$4 sm:$0xff]  }
 0x13c   :  { %v7351_v59 = vpop.f32.mrb[20].mxu1 }
 0x13d   :  { %v1552_v60 = vpop.f32.mrb[21].mxu1 }
 0x13e   :  { %v7359_v63 = vpop.f32.mrb[22].mxu1 }
 0x13f   :  { %v1555_v3 = vpop.f32.mrb[23].mxu1 }
 0x141   :  { %1926 = vmatmul.mubr.bf16.gmra.mrb[96].mxu0 %v6082_v61  ;;  %5708 = vmatmul.mubr.msk.bf16.gmra.mrb[128].mxu1 %vm1315_vm0, %v6083_v62  ;;  %v6109_v62 = vld [vmem:[%s10720_s0 + $0x4bc] ss:$20 sps:$4 sm:$0xff]  }
 0x142   :  { %1933 = vmatprep.mubr.bf16.mxu0 %v6084_v0  ;;  %5711 = vmatprep.mubr.msk.bf16.mxu1 %vm1315_vm0, %v6086_v2  ;;  %v6111_v0 = vld [vmem:[%s10720_s0 + $0x470] ss:$20 sps:$4 sm:$0xff]  }
 0x144   :  { %v7369_v4 = vpop.f32.mrb[24].mxu1 }
 0x145   :  { %v1560_v5 = vpop.f32.mrb[25].mxu1 }
 0x146   :  { %v7377_v8 = vpop.f32.mrb[26].mxu1 }
 0x147   :  { %v1563_v11 = vpop.f32.mrb[27].mxu1 }
 0x148   :  { %v6113_v11 = vld [vmem:[%s10720_s0 + $0x498] ss:$20 sps:$4 sm:$0xff]  }
 0x149   :  { %1934 = vmatmul.mubr.bf16.gmra.mrb[100].mxu0 %v6087_v6  ;;  %5712 = vmatmul.mubr.msk.bf16.gmra.mrb[132].mxu1 %vm1315_vm0, %v6088_v7 }
 0x14a   :  { %1941 = vmatprep.mubr.bf16.mxu0 %v6089_v9  ;;  %5715 = vmatprep.mubr.msk.bf16.mxu1 %vm1315_vm0, %v6091_v10  ;;  %v6112_v10 = vld [vmem:[%s10720_s0 + $0x4b8] ss:$20 sps:$4 sm:$0xff]  }
 0x14c   :  { %v7387_v1 = vpop.f32.mrb[28].mxu1 }
 0x14d   :  { %v1568_v12 = vpop.f32.mrb[29].mxu1 }
 0x14e   :  { %v7395_v15 = vpop.f32.mrb[30].mxu1 }
 0x14f   :  { %v1571_v18 = vpop.f32.mrb[31].mxu1 }
 0x151   :  { %1942 = vmatmul.mubr.bf16.gmra.mrb[104].mxu0 %v6092_v13  ;;  %5716 = vmatmul.mubr.msk.bf16.gmra.mrb[136].mxu1 %vm1315_vm0, %v6093_v14  ;;  %v6114_v14 = vld [vmem:[%s10720_s0 + $0x4e4] ss:$20 sps:$4 sm:$0xff]  }
 0x152   :  { %1949 = vmatprep.mubr.bf16.mxu0 %v6094_v16  ;;  %5719 = vmatprep.mubr.msk.bf16.mxu1 %vm1315_vm0, %v6096_v17  ;;  %v6116_v16 = vld [vmem:[%s10720_s0 + $0x4c0] ss:$20 sps:$4 sm:$0xff]  }
 0x154   :  { %v7405_v20 = vpop.f32.mrb[32].mxu1  ;;  %v7407_v21 = vpop.f32.mrb[0].mxu0 }
 0x155   :  { %v1576_v22 = vpop.f32.mrb[33].mxu1  ;;  %v1737_v24 = vpop.f32.mrb[1].mxu0 }
 0x156   :  { %v7415_v28 = vpop.f32.mrb[34].mxu1  ;;  %v7417_v29 = vpop.f32.mrb[2].mxu0 }
 0x157   :  { %v1579_v33 = vpop.f32.mrb[35].mxu1  ;;  %v1740_v34 = vpop.f32.mrb[3].mxu0 }
 0x159   :  { %1950 = vmatmul.mubr.bf16.gmra.mrb[108].mxu0 %v6097_v25  ;;  %5720 = vmatmul.mubr.msk.bf16.gmra.mrb[140].mxu1 %vm1315_vm0, %v6098_v26 }
 0x15a   :  { %1957 = vmatprep.mubr.bf16.mxu0 %v6099_v30  ;;  %5723 = vmatprep.mubr.msk.bf16.mxu1 %vm1315_vm0, %v6101_v32  ;;  %v6117_v30 = vld [vmem:[%s10720_s0 + $0x4e0] ss:$20 sps:$4 sm:$0xff]   ;;  %v6118_v32 = vld [vmem:[%s10720_s0 + $0x4e8] ss:$20 sps:$4 sm:$0xff]  }
 0x15c   :  { %v7427_v36 = vpop.f32.mrb[36].mxu1  ;;  %v7429_v37 = vpop.f32.mrb[4].mxu0 }
 0x15d   :  { %v1584_v38 = vpop.f32.mrb[37].mxu1  ;;  %v1745_v40 = vpop.f32.mrb[5].mxu0 }
 0x15e   :  { %v7437_v44 = vpop.f32.mrb[38].mxu1  ;;  %v7439_v45 = vpop.f32.mrb[6].mxu0 }
 0x15f   :  { %v1587_v49 = vpop.f32.mrb[39].mxu1  ;;  %v1748_v50 = vpop.f32.mrb[7].mxu0 }
 0x161   :  { %1958 = vmatmul.mubr.bf16.gmra.mrb[112].mxu0 %v6102_v41  ;;  %5724 = vmatmul.mubr.msk.bf16.gmra.mrb[144].mxu1 %vm1315_vm0, %v6103_v42 }
 0x162   :  { %1965 = vmatprep.mubr.bf16.mxu0 %v6104_v46  ;;  %5727 = vmatprep.mubr.msk.bf16.mxu1 %vm1315_vm0, %v6106_v48 }
 0x164   :  { %v7449_v52 = vpop.f32.mrb[40].mxu1  ;;  %v7451_v53 = vpop.f32.mrb[8].mxu0 }
 0x165   :  { %v1592_v54 = vpop.f32.mrb[41].mxu1  ;;  %v1753_v56 = vpop.f32.mrb[9].mxu0 }
 0x166   :  { %v7459_v60 = vpop.f32.mrb[42].mxu1  ;;  %v7461_v61 = vpop.f32.mrb[10].mxu0 }
 0x167   :  { %v1595_v2 = vpop.f32.mrb[43].mxu1  ;;  %v1756_v3 = vpop.f32.mrb[11].mxu0 }
 0x169   :  { %1966 = vmatmul.mubr.bf16.gmra.mrb[116].mxu0 %v6107_v57  ;;  %5728 = vmatmul.mubr.msk.bf16.gmra.mrb[148].mxu1 %vm1315_vm0, %v6108_v58 }
 0x16a   :  { %1973 = vmatprep.mubr.bf16.mxu0 %v6109_v62  ;;  %5731 = vmatprep.mubr.msk.bf16.mxu1 %vm1315_vm0, %v6111_v0 }
 0x16c   :  { %v7471_v5 = vpop.f32.mrb[44].mxu1  ;;  %v7473_v6 = vpop.f32.mrb[12].mxu0 }
 0x16d   :  { %v1600_v7 = vpop.f32.mrb[45].mxu1  ;;  %v1761_v9 = vpop.f32.mrb[13].mxu0 }
 0x16e   :  { %v7481_v12 = vpop.f32.mrb[46].mxu1  ;;  %v7483_v13 = vpop.f32.mrb[14].mxu0 }
 0x16f   :  { %v1603_v17 = vpop.f32.mrb[47].mxu1  ;;  %v1764_v18 = vpop.f32.mrb[15].mxu0 }
 0x171   :  { %1974 = vmatmul.mubr.bf16.gmra.mrb[120].mxu0 %v6112_v10  ;;  %5732 = vmatmul.mubr.msk.bf16.gmra.mrb[152].mxu1 %vm1315_vm0, %v6113_v11 }
 0x172   :  { %1981 = vmatprep.mubr.bf16.mxu0 %v6114_v14  ;;  %5735 = vmatprep.mubr.msk.bf16.mxu1 %vm1315_vm0, %v6116_v16 }
 0x174   :  { %v7493_v22 = vpop.f32.mrb[48].mxu1  ;;  %v7495_v24 = vpop.f32.mrb[16].mxu0 }
 0x175   :  { %v1608_v25 = vpop.f32.mrb[49].mxu1  ;;  %v1769_v26 = vpop.f32.mrb[17].mxu0 }
 0x176   :  { %v7503_v33 = vpop.f32.mrb[50].mxu1  ;;  %v7505_v34 = vpop.f32.mrb[18].mxu0 }
 0x177   :  { %v1611_v38 = vpop.f32.mrb[51].mxu1  ;;  %v1772_v40 = vpop.f32.mrb[19].mxu0 }
 0x179   :  { %1982 = vmatmul.mubr.bf16.gmra.mrb[124].mxu0 %v6117_v30  ;;  %5736 = vmatmul.mubr.msk.bf16.gmra.mrb[156].mxu1 %vm1315_vm0, %v6118_v32 }
 0x17c   :  { %v7508_v41 = vpop.f32.mrb[52].mxu1  ;;  %v7510_v42 = vpop.f32.mrb[20].mxu0 }
 0x17d   :  { %v1616_v46 = vpop.f32.mrb[53].mxu1  ;;  %v1777_v48 = vpop.f32.mrb[21].mxu0 }
 0x17e   :  { %v7512_v49 = vpop.f32.mrb[54].mxu1  ;;  %v7514_v50 = vpop.f32.mrb[22].mxu0 }
 0x17f   :  { %v1619_v54 = vpop.f32.mrb[55].mxu1  ;;  %v1780_v56 = vpop.f32.mrb[23].mxu0 }
 0x184   :  { %v7516_v57 = vpop.f32.mrb[56].mxu1  ;;  %v7518_v58 = vpop.f32.mrb[24].mxu0 }
 0x185   :  { %v1624_v62 = vpop.f32.mrb[57].mxu1  ;;  %v1785_v0 = vpop.f32.mrb[25].mxu0 }
 0x186   :  { %v7520_v2 = vpop.f32.mrb[58].mxu1  ;;  %v7522_v3 = vpop.f32.mrb[26].mxu0 }
 0x187   :  { %v1627_v7 = vpop.f32.mrb[59].mxu1  ;;  %v1788_v9 = vpop.f32.mrb[27].mxu0 }
 0x18c   :  { %v7524_v10 = vpop.f32.mrb[60].mxu1  ;;  %v7526_v11 = vpop.f32.mrb[28].mxu0 }
 0x18d   :  { %v1632_v14 = vpop.f32.mrb[61].mxu1  ;;  %v1793_v16 = vpop.f32.mrb[29].mxu0 }
 0x18e   :  { %v7528_v17 = vpop.f32.mrb[62].mxu1  ;;  %v7530_v18 = vpop.f32.mrb[30].mxu0 }
 0x18f   :  { %v1635_v25 = vpop.f32.mrb[63].mxu1  ;;  %v1796_v26 = vpop.f32.mrb[31].mxu0 }
 0x194   :  { %v7532_v30 = vpop.f32.mrb[64].mxu1  ;;  %v1799_v32 = vpop.f32.mrb[32].mxu0 }
 0x195   :  { %v7535_v38 = vadd.f32 %v1799_v32, %v7261_v19  ;;  %v1640_v40 = vpop.f32.mrb[65].mxu1  ;;  %v1801_v46 = vpop.f32.mrb[33].mxu0 }
 0x196   :  { %v7537_v48 = vpop.f32.mrb[66].mxu1  ;;  %v1802_v54 = vpop.f32.mrb[34].mxu0 }
 0x197   :  { %v7540_v56 = vadd.f32 %v1802_v54, %v7269_v23  ;;  %v1643_v62 = vpop.f32.mrb[67].mxu1  ;;  %v1804_v0 = vpop.f32.mrb[35].mxu0 }
 0x19c   :  { %v7542_v7 = vpop.f32.mrb[68].mxu1  ;;  %v1807_v9 = vpop.f32.mrb[36].mxu0 }
 0x19d   :  { %10879 = vst [vmem:[#allocation9_spill] sm:$0xff] %v7542_v7  ;;  %v7545_v14 = vadd.f32 %v1807_v9, %v7279_v27  ;;  %v1648_v16 = vpop.f32.mrb[69].mxu1  ;;  %v1809_v25 = vpop.f32.mrb[37].mxu0 }
 0x19e   :  { %v7547_v19 = vpop.f32.mrb[70].mxu1  ;;  %v1810_v26 = vpop.f32.mrb[38].mxu0 }
 0x19f   :  { %10880 = vst [vmem:[#allocation10_spill] sm:$0xff] %v7547_v19  ;;  %v7550_v32 = vadd.f32 %v1810_v26, %v7287_v31  ;;  %v1651_v40 = vpop.f32.mrb[71].mxu1  ;;  %v1812_v46 = vpop.f32.mrb[39].mxu0 }
 0x1a4   :  { %v7552_v23 = vpop.f32.mrb[72].mxu1  ;;  %v1815_v54 = vpop.f32.mrb[40].mxu0 }
 0x1a5   :  { %10881 = vst [vmem:[#allocation11_spill] sm:$0xff] %v7552_v23  ;;  %v7555_v62 = vadd.f32 %v1815_v54, %v7297_v35  ;;  %v1656_v0 = vpop.f32.mrb[73].mxu1  ;;  %v1817_v7 = vpop.f32.mrb[41].mxu0 }
 0x1a6   :  { %v7557_v27 = vpop.f32.mrb[74].mxu1  ;;  %v1818_v9 = vpop.f32.mrb[42].mxu0 }
 0x1a7   :  { %10882 = vst [vmem:[#allocation12_spill] sm:$0xff] %v7557_v27  ;;  %v7560_v16 = vadd.f32 %v1818_v9, %v7305_v39  ;;  %v1659_v25 = vpop.f32.mrb[75].mxu1  ;;  %v1820_v19 = vpop.f32.mrb[43].mxu0 }
 0x1ac   :  { %v7562_v31 = vpop.f32.mrb[76].mxu1  ;;  %v1823_v26 = vpop.f32.mrb[44].mxu0 }
 0x1ad   :  { %10883 = vst [vmem:[#allocation13_spill] sm:$0xff] %v7562_v31  ;;  %v7565_v40 = vadd.f32 %v1823_v26, %v7315_v43  ;;  %v1664_v46 = vpop.f32.mrb[77].mxu1  ;;  %v1825_v23 = vpop.f32.mrb[45].mxu0 }
 0x1ae   :  { %v7567_v35 = vpop.f32.mrb[78].mxu1  ;;  %v1826_v54 = vpop.f32.mrb[46].mxu0 }
 0x1af   :  { %10884 = vst [vmem:[#allocation14_spill] sm:$0xff] %v7567_v35  ;;  %v7570_v7 = vadd.f32 %v1826_v54, %v7323_v47  ;;  %v1667_v0 = vpop.f32.mrb[79].mxu1  ;;  %v1828_v27 = vpop.f32.mrb[47].mxu0 }
 0x1b4   :  { %v7572_v39 = vpop.f32.mrb[80].mxu1  ;;  %v1831_v9 = vpop.f32.mrb[48].mxu0 }
 0x1b5   :  { %10885 = vst [vmem:[#allocation15_spill] sm:$0xff] %v7572_v39  ;;  %v7575_v19 = vadd.f32 %v1831_v9, %v7333_v51  ;;  %v1672_v25 = vpop.f32.mrb[81].mxu1  ;;  %v1833_v31 = vpop.f32.mrb[49].mxu0 }
 0x1b6   :  { %v7577_v43 = vpop.f32.mrb[82].mxu1  ;;  %v1834_v26 = vpop.f32.mrb[50].mxu0 }
 0x1b7   :  { %10886 = vst [vmem:[#allocation16_spill] sm:$0xff] %v7577_v43  ;;  %v7580_v23 = vadd.f32 %v1834_v26, %v7341_v55  ;;  %v1675_v46 = vpop.f32.mrb[83].mxu1  ;;  %v1836_v35 = vpop.f32.mrb[51].mxu0 }
 0x1bc   :  { %v7582_v47 = vpop.f32.mrb[84].mxu1  ;;  %v1839_v54 = vpop.f32.mrb[52].mxu0 }
 0x1bd   :  { %10887 = vst [vmem:[#allocation17_spill] sm:$0xff] %v7582_v47  ;;  %v7585_v27 = vadd.f32 %v1839_v54, %v7351_v59  ;;  %v1680_v0 = vpop.f32.mrb[85].mxu1  ;;  %v1841_v39 = vpop.f32.mrb[53].mxu0 }
 0x1be   :  { %v7587_v51 = vpop.f32.mrb[86].mxu1  ;;  %v1842_v9 = vpop.f32.mrb[54].mxu0 }
 0x1bf   :  { %10888 = vst [vmem:[#allocation18_spill] sm:$0xff] %v7587_v51  ;;  %v7590_v31 = vadd.f32 %v1842_v9, %v7359_v63  ;;  %v1683_v25 = vpop.f32.mrb[87].mxu1  ;;  %v1844_v43 = vpop.f32.mrb[55].mxu0 }
 0x1c4   :  { %v7592_v55 = vpop.f32.mrb[88].mxu1  ;;  %v1847_v26 = vpop.f32.mrb[56].mxu0 }
 0x1c5   :  { %10889 = vst [vmem:[#allocation19_spill] sm:$0xff] %v7592_v55  ;;  %v7595_v35 = vadd.f32 %v1847_v26, %v7369_v4  ;;  %v1688_v46 = vpop.f32.mrb[89].mxu1  ;;  %v1849_v47 = vpop.f32.mrb[57].mxu0 }
 0x1c6   :  { %v7597_v59 = vpop.f32.mrb[90].mxu1  ;;  %v1850_v54 = vpop.f32.mrb[58].mxu0 }
 0x1c7   :  { %10890 = vst [vmem:[#allocation20_spill] sm:$0xff] %v7597_v59  ;;  %v7600_v39 = vadd.f32 %v1850_v54, %v7377_v8  ;;  %v1691_v0 = vpop.f32.mrb[91].mxu1  ;;  %v1852_v51 = vpop.f32.mrb[59].mxu0 }
 0x1cc   :  { %v7602_v63 = vpop.f32.mrb[92].mxu1  ;;  %v1855_v9 = vpop.f32.mrb[60].mxu0 }
 0x1cd   :  { %v7605_v43 = vadd.f32 %v1855_v9, %v7387_v1  ;;  %v1696_v25 = vpop.f32.mrb[93].mxu1  ;;  %v1857_v55 = vpop.f32.mrb[61].mxu0 }
 0x1ce   :  { %v7607_v4 = vpop.f32.mrb[94].mxu1  ;;  %v1858_v26 = vpop.f32.mrb[62].mxu0 }
 0x1cf   :  { %10891 = vst [vmem:[#allocation21_spill] sm:$0xff] %v7607_v4  ;;  %v7610_v47 = vadd.f32 %v1858_v26, %v7395_v15  ;;  %v1699_v46 = vpop.f32.mrb[95].mxu1  ;;  %v1860_v59 = vpop.f32.mrb[63].mxu0 }
 0x1d4   :  { %v1863_v8 = vpop.f32.mrb[64].mxu0  ;;  %v5677_v54 = vpop.f32.mrb[96].mxu1 }
 0x1d5   :  { %v7613_v51 = vadd.f32 %v1863_v8, %v7405_v20  ;;  %v7616_v0 = vadd.f32 %v5677_v54, %v7429_v37  ;;  %v1865_v1 = vpop.f32.mrb[65].mxu0  ;;  %v2024_v9 = vpop.f32.mrb[97].mxu1 }
 0x1d6   :  { %v7619_v55 = vadd.f32 %v2024_v9, %v7407_v21  ;;  %v1866_v25 = vpop.f32.mrb[66].mxu0  ;;  %v5678_v4 = vpop.f32.mrb[98].mxu1 }
 0x1d7   :  { %10892 = vst [vmem:[#allocation22_spill] sm:$0xff] %v7616_v0  ;;  %v7622_v15 = vadd.f32 %v1866_v25, %v7415_v28  ;;  %v7625_v59 = vadd.f32 %v5678_v4, %v7439_v45  ;;  %v2027_v26 = vpop.f32.mrb[99].mxu1  ;;  %v1868_v46 = vpop.f32.mrb[67].mxu0  ;;  %v2351_v28 = vmul.f32 %v7616_v0, %v7616_v0 }
 0x1d8   :  { %10893 = vst [vmem:[#allocation23_spill] sm:$0xff] %v7619_v55  ;;  %v7628_v20 = vadd.f32 %v2027_v26, %v7417_v29  ;;  %v2349_v37 = vmul.f32 %v7619_v55, %v7619_v55 }
 0x1d9   :  { %v2352_v46 = vmul.f32 %v7625_v59, %v7625_v59 }
 0x1da   :  { %10894 = vst [vmem:[#allocation24_spill] sm:$0xff] %v7628_v20  ;;  %v2279_v21 = vadd.f32 %v7628_v20, %v7619_v55  ;;  %v2350_v8 = vmul.f32 %v7628_v20, %v7628_v20 }
 0x1dc   :  { %v2280_v45 = vadd.f32 %v2279_v21, %v7616_v0  ;;  %v2413_v4 = vadd.f32 %v2350_v8, %v2349_v37  ;;  %v1871_v54 = vpop.f32.mrb[68].mxu0  ;;  %v5681_v1 = vpop.f32.mrb[100].mxu1 }
 0x1dd   :  { %v7640_v29 = vadd.f32 %v1871_v54, %v7427_v36  ;;  %v7643_v9 = vadd.f32 %v5681_v1, %v7473_v6  ;;  %v1873_v25 = vpop.f32.mrb[69].mxu0  ;;  %v2040_v26 = vpop.f32.mrb[101].mxu1 }
 0x1de   :  { %v2414_v20 = vadd.f32 %v2413_v4, %v2351_v28  ;;  %v7648_v55 = vadd.f32 %v2040_v26, %v7451_v53  ;;  %v2281_v21 = vadd.f32 %v2280_v45, %v7625_v59  ;;  %v1874_v37 = vpop.f32.mrb[70].mxu0  ;;  %v5682_v8 = vpop.f32.mrb[102].mxu1 }
 0x1df   :  { %v7652_v0 = vadd.f32 %v1874_v37, %v7437_v44  ;;  %v7655_v36 = vadd.f32 %v5682_v8, %v7483_v13  ;;  %v2043_v6 = vpop.f32.mrb[103].mxu1  ;;  %v1876_v54 = vpop.f32.mrb[71].mxu0  ;;  %v2355_v13 = vmul.f32 %v7643_v9, %v7643_v9 }
 0x1e0   :  { %v2282_v1 = vadd.f32 %v2281_v21, %v7648_v55  ;;  %v2353_v28 = vmul.f32 %v7648_v55, %v7648_v55  ;;  %v2415_v4 = vadd.f32 %v2414_v20, %v2352_v46  ;;  %v7661_v53 = vadd.f32 %v2043_v6, %v7461_v61 }
 0x1e1   :  { %v2356_v6 = vmul.f32 %v7655_v36, %v7655_v36 }
 0x1e2   :  { %v2416_v45 = vadd.f32 %v2415_v4, %v2353_v28  ;;  %v2283_v25 = vadd.f32 %v2282_v1, %v7661_v53  ;;  %v2354_v44 = vmul.f32 %v7661_v53, %v7661_v53 }
 0x1e4   :  { %v2284_v26 = vadd.f32 %v2283_v25, %v7643_v9  ;;  %v2417_v37 = vadd.f32 %v2416_v45, %v2354_v44  ;;  %v1879_v21 = vpop.f32.mrb[72].mxu0  ;;  %v5685_v8 = vpop.f32.mrb[104].mxu1 }
 0x1e5   :  { %v7670_v54 = vadd.f32 %v1879_v21, %v7449_v52  ;;  %v7673_v61 = vadd.f32 %v5685_v8, %v7510_v42  ;;  %v1881_v20 = vpop.f32.mrb[73].mxu0  ;;  %v2056_v46 = vpop.f32.mrb[105].mxu1 }
 0x1e6   :  { %v2418_v1 = vadd.f32 %v2417_v37, %v2355_v13  ;;  %v7678_v28 = vadd.f32 %v2056_v46, %v7495_v24  ;;  %v2285_v4 = vadd.f32 %v2284_v26, %v7655_v36  ;;  %v1882_v45 = vpop.f32.mrb[74].mxu0  ;;  %v5686_v25 = vpop.f32.mrb[106].mxu1 }
 0x1e7   :  { %v7682_v44 = vadd.f32 %v1882_v45, %v7459_v60  ;;  %v7685_v52 = vadd.f32 %v5686_v25, %v7514_v50  ;;  %v2059_v42 = vpop.f32.mrb[107].mxu1  ;;  %v1884_v21 = vpop.f32.mrb[75].mxu0  ;;  %v2359_v50 = vmul.f32 %v7673_v61, %v7673_v61 }
 0x1e8   :  { %v2286_v8 = vadd.f32 %v2285_v4, %v7678_v28  ;;  %v2357_v13 = vmul.f32 %v7678_v28, %v7678_v28  ;;  %v2419_v37 = vadd.f32 %v2418_v1, %v2356_v6  ;;  %v7691_v24 = vadd.f32 %v2059_v42, %v7505_v34 }
 0x1e9   :  { %v2360_v42 = vmul.f32 %v7685_v52, %v7685_v52 }
 0x1ea   :  { %v2420_v26 = vadd.f32 %v2419_v37, %v2357_v13  ;;  %v2287_v20 = vadd.f32 %v2286_v8, %v7691_v24  ;;  %v2358_v60 = vmul.f32 %v7691_v24, %v7691_v24 }
 0x1ec   :  { %v2288_v46 = vadd.f32 %v2287_v20, %v7673_v61  ;;  %v2421_v45 = vadd.f32 %v2420_v26, %v2358_v60  ;;  %v1887_v4 = vpop.f32.mrb[76].mxu0  ;;  %v5689_v25 = vpop.f32.mrb[108].mxu1 }
 0x1ed   :  { %v7700_v21 = vadd.f32 %v1887_v4, %v7471_v5  ;;  %v7703_v34 = vadd.f32 %v5689_v25, %v7526_v11  ;;  %v1889_v6 = vpop.f32.mrb[77].mxu0  ;;  %v2072_v1 = vpop.f32.mrb[109].mxu1 }
 0x1ee   :  { %v2422_v8 = vadd.f32 %v2421_v45, %v2359_v50  ;;  %v7708_v13 = vadd.f32 %v2072_v1, %v7518_v58  ;;  %v2289_v37 = vadd.f32 %v2288_v46, %v7685_v52  ;;  %v1890_v26 = vpop.f32.mrb[78].mxu0  ;;  %v5690_v20 = vpop.f32.mrb[110].mxu1 }
 0x1ef   :  { %v7712_v60 = vadd.f32 %v1890_v26, %v7481_v12  ;;  %v7715_v5 = vadd.f32 %v5690_v20, %v7530_v18  ;;  %v2075_v11 = vpop.f32.mrb[111].mxu1  ;;  %v1892_v4 = vpop.f32.mrb[79].mxu0  ;;  %v2363_v18 = vmul.f32 %v7703_v34, %v7703_v34 }
 0x1f0   :  { %v2290_v25 = vadd.f32 %v2289_v37, %v7708_v13  ;;  %v2361_v50 = vmul.f32 %v7708_v13, %v7708_v13  ;;  %v2423_v45 = vadd.f32 %v2422_v8, %v2360_v42  ;;  %v7721_v58 = vadd.f32 %v2075_v11, %v7522_v3 }
 0x1f1   :  { %v2364_v11 = vmul.f32 %v7715_v5, %v7715_v5 }
 0x1f2   :  { %v2424_v46 = vadd.f32 %v2423_v45, %v2361_v50  ;;  %v2291_v6 = vadd.f32 %v2290_v25, %v7721_v58  ;;  %v2362_v12 = vmul.f32 %v7721_v58, %v7721_v58 }
 0x1f4   :  { %v2292_v1 = vadd.f32 %v2291_v6, %v7703_v34  ;;  %v2425_v26 = vadd.f32 %v2424_v46, %v2362_v12  ;;  %v1895_v37 = vpop.f32.mrb[80].mxu0  ;;  %v5693_v20 = vpop.f32.mrb[112].mxu1 }
 0x1f5   :  { %v7730_v4 = vadd.f32 %v1895_v37, %v7493_v22  ;;  %v7733_v3 = vadd.f32 %v5693_v20, %v7545_v14  ;;  %v1897_v42 = vpop.f32.mrb[81].mxu0  ;;  %v2088_v8 = vpop.f32.mrb[113].mxu1 }
 0x1f6   :  { %v2426_v25 = vadd.f32 %v2425_v26, %v2363_v18  ;;  %v7738_v50 = vadd.f32 %v2088_v8, %v7535_v38  ;;  %v2293_v45 = vadd.f32 %v2292_v1, %v7715_v5  ;;  %v1898_v46 = vpop.f32.mrb[82].mxu0  ;;  %v5694_v6 = vpop.f32.mrb[114].mxu1 }
 0x1f7   :  { %v7742_v12 = vadd.f32 %v1898_v46, %v7503_v33  ;;  %v7745_v22 = vadd.f32 %v5694_v6, %v7550_v32  ;;  %v2091_v14 = vpop.f32.mrb[115].mxu1  ;;  %v1900_v37 = vpop.f32.mrb[83].mxu0  ;;  %v2367_v32 = vmul.f32 %v7733_v3, %v7733_v3 }
 0x1f8   :  { %v2294_v20 = vadd.f32 %v2293_v45, %v7738_v50  ;;  %v2365_v18 = vmul.f32 %v7738_v50, %v7738_v50  ;;  %v2427_v26 = vadd.f32 %v2426_v25, %v2364_v11  ;;  %v7751_v38 = vadd.f32 %v2091_v14, %v7540_v56 }
 0x1f9   :  { %v2368_v14 = vmul.f32 %v7745_v22, %v7745_v22 }
 0x1fa   :  { %v2428_v1 = vadd.f32 %v2427_v26, %v2365_v18  ;;  %v2295_v42 = vadd.f32 %v2294_v20, %v7751_v38  ;;  %v2366_v33 = vmul.f32 %v7751_v38, %v7751_v38 }
 0x1fc   :  { %v2296_v8 = vadd.f32 %v2295_v42, %v7733_v3  ;;  %v2429_v46 = vadd.f32 %v2428_v1, %v2366_v33  ;;  %v1903_v45 = vpop.f32.mrb[84].mxu0  ;;  %v5697_v6 = vpop.f32.mrb[116].mxu1 }
 0x1fd   :  { %v7760_v37 = vadd.f32 %v1903_v45, %v7508_v41  ;;  %v7763_v56 = vadd.f32 %v5697_v6, %v7565_v40  ;;  %v1905_v11 = vpop.f32.mrb[85].mxu0  ;;  %v2104_v25 = vpop.f32.mrb[117].mxu1 }
 0x1fe   :  { %v2430_v20 = vadd.f32 %v2429_v46, %v2367_v32  ;;  %v7768_v18 = vadd.f32 %v2104_v25, %v7555_v62  ;;  %v2297_v26 = vadd.f32 %v2296_v8, %v7745_v22  ;;  %v1906_v1 = vpop.f32.mrb[86].mxu0  ;;  %v5698_v42 = vpop.f32.mrb[118].mxu1 }
 0x1ff   :  { %v7772_v33 = vadd.f32 %v1906_v1, %v7512_v49  ;;  %v7775_v41 = vadd.f32 %v5698_v42, %v7570_v7  ;;  %v2107_v40 = vpop.f32.mrb[119].mxu1  ;;  %v1908_v45 = vpop.f32.mrb[87].mxu0  ;;  %v2371_v7 = vmul.f32 %v7763_v56, %v7763_v56 }
 0x200   :  { %v2298_v6 = vadd.f32 %v2297_v26, %v7768_v18  ;;  %v2369_v32 = vmul.f32 %v7768_v18, %v7768_v18  ;;  %v2431_v46 = vadd.f32 %v2430_v20, %v2368_v14  ;;  %v7781_v62 = vadd.f32 %v2107_v40, %v7560_v16 }
 0x201   :  { %v2372_v40 = vmul.f32 %v7775_v41, %v7775_v41 }
 0x202   :  { %v2432_v8 = vadd.f32 %v2431_v46, %v2369_v32  ;;  %v2299_v11 = vadd.f32 %v2298_v6, %v7781_v62  ;;  %v2370_v49 = vmul.f32 %v7781_v62, %v7781_v62 }
 0x204   :  { %v2300_v25 = vadd.f32 %v2299_v11, %v7763_v56  ;;  %v2433_v1 = vadd.f32 %v2432_v8, %v2370_v49  ;;  %v1911_v26 = vpop.f32.mrb[88].mxu0  ;;  %v5701_v42 = vpop.f32.mrb[120].mxu1 }
 0x205   :  { %v7790_v45 = vadd.f32 %v1911_v26, %v7516_v57  ;;  %v7793_v16 = vadd.f32 %v5701_v42, %v7585_v27  ;;  %v1913_v14 = vpop.f32.mrb[89].mxu0  ;;  %v2120_v20 = vpop.f32.mrb[121].mxu1 }
 0x206   :  { %v2434_v6 = vadd.f32 %v2433_v1, %v2371_v7  ;;  %v7798_v32 = vadd.f32 %v2120_v20, %v7575_v19  ;;  %v2301_v46 = vadd.f32 %v2300_v25, %v7775_v41  ;;  %v1914_v8 = vpop.f32.mrb[90].mxu0  ;;  %v5702_v11 = vpop.f32.mrb[122].mxu1 }
 0x207   :  { %v7802_v49 = vadd.f32 %v1914_v8, %v7520_v2  ;;  %v7805_v57 = vadd.f32 %v5702_v11, %v7590_v31  ;;  %v2123_v27 = vpop.f32.mrb[123].mxu1  ;;  %v1916_v26 = vpop.f32.mrb[91].mxu0  ;;  %v2375_v31 = vmul.f32 %v7793_v16, %v7793_v16 }
 0x208   :  { %v2302_v42 = vadd.f32 %v2301_v46, %v7798_v32  ;;  %v2373_v7 = vmul.f32 %v7798_v32, %v7798_v32  ;;  %v2435_v1 = vadd.f32 %v2434_v6, %v2372_v40  ;;  %v7811_v19 = vadd.f32 %v2123_v27, %v7580_v23 }
 0x209   :  { %v2376_v27 = vmul.f32 %v7805_v57, %v7805_v57 }
 0x20a   :  { %v2436_v25 = vadd.f32 %v2435_v1, %v2373_v7  ;;  %v2303_v14 = vadd.f32 %v2302_v42, %v7811_v19  ;;  %v2374_v2 = vmul.f32 %v7811_v19, %v7811_v19 }
 0x20c   :  { %v2304_v20 = vadd.f32 %v2303_v14, %v7793_v16  ;;  %v2437_v8 = vadd.f32 %v2436_v25, %v2374_v2  ;;  %v1919_v46 = vpop.f32.mrb[92].mxu0  ;;  %v5705_v11 = vpop.f32.mrb[124].mxu1 }
 0x20d   :  { %v7820_v26 = vadd.f32 %v1919_v46, %v7524_v10  ;;  %v7823_v23 = vadd.f32 %v5705_v11, %v7605_v43  ;;  %v1921_v40 = vpop.f32.mrb[93].mxu0  ;;  %v2136_v6 = vpop.f32.mrb[125].mxu1 }
 0x20e   :  { %v2438_v42 = vadd.f32 %v2437_v8, %v2375_v31  ;;  %v7828_v7 = vadd.f32 %v2136_v6, %v7595_v35  ;;  %v2305_v1 = vadd.f32 %v2304_v20, %v7805_v57  ;;  %v1922_v25 = vpop.f32.mrb[94].mxu0  ;;  %v5706_v14 = vpop.f32.mrb[126].mxu1 }
 0x20f   :  { %v7832_v2 = vadd.f32 %v1922_v25, %v7528_v17  ;;  %v7835_v10 = vadd.f32 %v5706_v14, %v7610_v47  ;;  %v2139_v43 = vpop.f32.mrb[127].mxu1  ;;  %v1924_v46 = vpop.f32.mrb[95].mxu0  ;;  %v2379_v47 = vmul.f32 %v7823_v23, %v7823_v23 }
 0x210   :  { %v2306_v11 = vadd.f32 %v2305_v1, %v7828_v7  ;;  %v2377_v31 = vmul.f32 %v7828_v7, %v7828_v7  ;;  %v2439_v8 = vadd.f32 %v2438_v42, %v2376_v27  ;;  %v7841_v35 = vadd.f32 %v2139_v43, %v7600_v39 }
 0x211   :  { %v2380_v43 = vmul.f32 %v7835_v10, %v7835_v10 }
 0x212   :  { %v2440_v20 = vadd.f32 %v2439_v8, %v2377_v31  ;;  %v2307_v40 = vadd.f32 %v2306_v11, %v7841_v35  ;;  %v2378_v17 = vmul.f32 %v7841_v35, %v7841_v35 }
 0x214   :  { %v2308_v6 = vadd.f32 %v2307_v40, %v7823_v23  ;;  %v2441_v25 = vadd.f32 %v2440_v20, %v2378_v17  ;;  %v1927_v1 = vpop.f32.mrb[96].mxu0  ;;  %v5709_v14 = vpop.f32.mrb[128].mxu1 }
 0x215   :  { %v7850_v46 = vadd.f32 %v1927_v1, %v7532_v30  ;;  %v7853_v39 = vadd.f32 %v5709_v14, %v7640_v29  ;;  %v1929_v27 = vpop.f32.mrb[97].mxu0  ;;  %v2152_v42 = vpop.f32.mrb[129].mxu1 }
 0x216   :  { %v2442_v11 = vadd.f32 %v2441_v25, %v2379_v47  ;;  %v7858_v31 = vadd.f32 %v2152_v42, %v7613_v51  ;;  %v2309_v8 = vadd.f32 %v2308_v6, %v7835_v10  ;;  %v1930_v20 = vpop.f32.mrb[98].mxu0  ;;  %v5710_v40 = vpop.f32.mrb[130].mxu1 }
 0x217   :  { %10895 = vst [vmem:[#allocation25_spill] sm:$0xff] %v7853_v39  ;;  %v7862_v17 = vadd.f32 %v1930_v20, %v7537_v48  ;;  %v7865_v30 = vadd.f32 %v5710_v40, %v7652_v0  ;;  %v2155_v29 = vpop.f32.mrb[131].mxu1  ;;  %v1932_v1 = vpop.f32.mrb[99].mxu0  ;;  %v2383_v0 = vmul.f32 %v7853_v39, %v7853_v39 }
 0x218   :  { %10896 = vst [vmem:[#allocation26_spill] sm:$0xff] %v7858_v31  ;;  %v2310_v14 = vadd.f32 %v2309_v8, %v7858_v31  ;;  %v2381_v47 = vmul.f32 %v7858_v31, %v7858_v31  ;;  %v2443_v25 = vadd.f32 %v2442_v11, %v2380_v43  ;;  %v7871_v51 = vadd.f32 %v2155_v29, %v7622_v15  ;;  %v10897_v1 = vld [vmem:[#allocation9_spill] sm:$0xff] }
 0x219   :  { %v2384_v29 = vmul.f32 %v7865_v30, %v7865_v30 }
 0x21a   :  { %v2444_v6 = vadd.f32 %v2443_v25, %v2381_v47  ;;  %v2311_v27 = vadd.f32 %v2310_v14, %v7871_v51  ;;  %v2382_v48 = vmul.f32 %v7871_v51, %v7871_v51 }
 0x21c   :  { %v2312_v42 = vadd.f32 %v2311_v27, %v7853_v39  ;;  %v2445_v20 = vadd.f32 %v2444_v6, %v2382_v48  ;;  %v1935_v8 = vpop.f32.mrb[100].mxu0  ;;  %v5713_v40 = vpop.f32.mrb[132].mxu1  ;;  %v10900_v48 = vld [vmem:[#allocation10_spill] sm:$0xff] }
 0x21d   :  { %v7880_v31 = vadd.f32 %v1935_v8, %v10897_v1  ;;  %v7883_v15 = vadd.f32 %v5713_v40, %v7700_v21  ;;  %v1937_v43 = vpop.f32.mrb[101].mxu0  ;;  %v2168_v11 = vpop.f32.mrb[133].mxu1 }
 0x21e   :  { %v2446_v14 = vadd.f32 %v2445_v20, %v2383_v0  ;;  %v7888_v47 = vadd.f32 %v2168_v11, %v7670_v54  ;;  %v2313_v25 = vadd.f32 %v2312_v42, %v7865_v30  ;;  %v1938_v6 = vpop.f32.mrb[102].mxu0  ;;  %v5714_v27 = vpop.f32.mrb[134].mxu1 }
 0x21f   :  { %10898 = vst [vmem:[#allocation9_spill] sm:$0xff] %v7883_v15  ;;  %v7892_v39 = vadd.f32 %v1938_v6, %v10900_v48  ;;  %v7895_v8 = vadd.f32 %v5714_v27, %v7712_v60  ;;  %v2171_v21 = vpop.f32.mrb[135].mxu1  ;;  %v1940_v40 = vpop.f32.mrb[103].mxu0  ;;  %v2387_v60 = vmul.f32 %v7883_v15, %v7883_v15 }
 0x220   :  { %10899 = vst [vmem:[#allocation27_spill] sm:$0xff] %v7888_v47  ;;  %v2314_v1 = vadd.f32 %v2313_v25, %v7888_v47  ;;  %v2385_v0 = vmul.f32 %v7888_v47, %v7888_v47  ;;  %v2447_v20 = vadd.f32 %v2446_v14, %v2384_v29  ;;  %v7901_v54 = vadd.f32 %v2171_v21, %v7682_v44  ;;  %v10901_v40 = vld [vmem:[#allocation11_spill] sm:$0xff] }
 0x221   :  { %v2388_v21 = vmul.f32 %v7895_v8, %v7895_v8 }
 0x222   :  { %v2448_v42 = vadd.f32 %v2447_v20, %v2385_v0  ;;  %v2315_v43 = vadd.f32 %v2314_v1, %v7901_v54  ;;  %v2386_v11 = vmul.f32 %v7901_v54, %v7901_v54 }
 0x224   :  { %v2316_v6 = vadd.f32 %v2315_v43, %v7883_v15  ;;  %v2449_v27 = vadd.f32 %v2448_v42, %v2386_v11  ;;  %v1943_v25 = vpop.f32.mrb[104].mxu0  ;;  %v5717_v48 = vpop.f32.mrb[136].mxu1  ;;  %v10904_v11 = vld [vmem:[#allocation12_spill] sm:$0xff] }
 0x225   :  { %v7910_v47 = vadd.f32 %v1943_v25, %v10901_v40  ;;  %v7913_v44 = vadd.f32 %v5717_v48, %v7760_v37  ;;  %v1945_v29 = vpop.f32.mrb[105].mxu0  ;;  %v2184_v14 = vpop.f32.mrb[137].mxu1 }
 0x226   :  { %v2450_v1 = vadd.f32 %v2449_v27, %v2387_v60  ;;  %v7918_v0 = vadd.f32 %v2184_v14, %v7730_v4  ;;  %v2317_v20 = vadd.f32 %v2316_v6, %v7895_v8  ;;  %v1946_v42 = vpop.f32.mrb[106].mxu0  ;;  %v5718_v43 = vpop.f32.mrb[138].mxu1 }
 0x227   :  { %10902 = vst [vmem:[#allocation10_spill] sm:$0xff] %v7913_v44  ;;  %v7922_v15 = vadd.f32 %v1946_v42, %v10904_v11  ;;  %v7925_v25 = vadd.f32 %v5718_v43, %v7772_v33  ;;  %v2187_v37 = vpop.f32.mrb[139].mxu1  ;;  %v1948_v48 = vpop.f32.mrb[107].mxu0  ;;  %v2391_v33 = vmul.f32 %v7913_v44, %v7913_v44 }
 0x228   :  { %10903 = vst [vmem:[#allocation11_spill] sm:$0xff] %v7918_v0  ;;  %v2318_v40 = vadd.f32 %v2317_v20, %v7918_v0  ;;  %v2389_v60 = vmul.f32 %v7918_v0, %v7918_v0  ;;  %v2451_v27 = vadd.f32 %v2450_v1, %v2388_v21  ;;  %v7931_v4 = vadd.f32 %v2187_v37, %v7742_v12  ;;  %v10905_v48 = vld [vmem:[#allocation13_spill] sm:$0xff] }
 0x229   :  { %v2392_v37 = vmul.f32 %v7925_v25, %v7925_v25 }
 0x22a   :  { %v2452_v6 = vadd.f32 %v2451_v27, %v2389_v60  ;;  %v2319_v29 = vadd.f32 %v2318_v40, %v7931_v4  ;;  %v2390_v14 = vmul.f32 %v7931_v4, %v7931_v4 }
 0x22c   :  { %v2320_v42 = vadd.f32 %v2319_v29, %v7913_v44  ;;  %v2453_v43 = vadd.f32 %v2452_v6, %v2390_v14  ;;  %v1951_v20 = vpop.f32.mrb[108].mxu0  ;;  %v5721_v11 = vpop.f32.mrb[140].mxu1  ;;  %v10908_v14 = vld [vmem:[#allocation14_spill] sm:$0xff] }
 0x22d   :  { %v1952_v0 = vadd.f32 %v1951_v20, %v10905_v48  ;;  %v7941_v21 = vadd.f32 %v5721_v11, %v7820_v26  ;;  %v1953_v12 = vpop.f32.mrb[109].mxu0  ;;  %v2200_v1 = vpop.f32.mrb[141].mxu1 }
 0x22e   :  { %v2454_v40 = vadd.f32 %v2453_v43, %v2391_v33  ;;  %v7946_v60 = vadd.f32 %v2200_v1, %v7790_v45  ;;  %v2321_v27 = vadd.f32 %v2320_v42, %v7925_v25  ;;  %v1954_v29 = vpop.f32.mrb[110].mxu0  ;;  %v5722_v6 = vpop.f32.mrb[142].mxu1 }
 0x22f   :  { %10906 = vst [vmem:[#allocation12_spill] sm:$0xff] %v7941_v21  ;;  %v1955_v44 = vadd.f32 %v1954_v29, %v10908_v14  ;;  %v7951_v20 = vadd.f32 %v5722_v6, %v7832_v2  ;;  %v2203_v26 = vpop.f32.mrb[143].mxu1  ;;  %v1956_v11 = vpop.f32.mrb[111].mxu0  ;;  %v2395_v2 = vmul.f32 %v7941_v21, %v7941_v21 }
 0x230   :  { %10907 = vst [vmem:[#allocation13_spill] sm:$0xff] %v7946_v60  ;;  %v2322_v48 = vadd.f32 %v2321_v27, %v7946_v60  ;;  %v2393_v12 = vmul.f32 %v7946_v60, %v7946_v60  ;;  %v2455_v33 = vadd.f32 %v2454_v40, %v2392_v37  ;;  %v7957_v45 = vadd.f32 %v2203_v26, %v7802_v49  ;;  %v10909_v11 = vld [vmem:[#allocation15_spill] sm:$0xff] }
 0x231   :  { %v2396_v26 = vmul.f32 %v7951_v20, %v7951_v20 }
 0x232   :  { %v2456_v43 = vadd.f32 %v2455_v33, %v2393_v12  ;;  %v2323_v42 = vadd.f32 %v2322_v48, %v7957_v45  ;;  %v2394_v1 = vmul.f32 %v7957_v45, %v7957_v45 }
 0x234   :  { %v2324_v29 = vadd.f32 %v2323_v42, %v7941_v21  ;;  %v2457_v6 = vadd.f32 %v2456_v43, %v2394_v1  ;;  %v1959_v27 = vpop.f32.mrb[112].mxu0  ;;  %v5725_v14 = vpop.f32.mrb[144].mxu1  ;;  %v10912_v1 = vld [vmem:[#allocation16_spill] sm:$0xff] }
 0x235   :  { %v1960_v60 = vadd.f32 %v1959_v27, %v10909_v11  ;;  %v7967_v37 = vadd.f32 %v5725_v14, %v7880_v31  ;;  %v1961_v49 = vpop.f32.mrb[113].mxu0  ;;  %v2216_v40 = vpop.f32.mrb[145].mxu1 }
 0x236   :  { %v2458_v48 = vadd.f32 %v2457_v6, %v2395_v2  ;;  %v7972_v12 = vadd.f32 %v2216_v40, %v7850_v46  ;;  %v2325_v33 = vadd.f32 %v2324_v29, %v7951_v20  ;;  %v1962_v42 = vpop.f32.mrb[114].mxu0  ;;  %v5726_v43 = vpop.f32.mrb[146].mxu1 }
 0x237   :  { %10910 = vst [vmem:[#allocation14_spill] sm:$0xff] %v7967_v37  ;;  %v1963_v21 = vadd.f32 %v1962_v42, %v10912_v1  ;;  %v7977_v27 = vadd.f32 %v5726_v43, %v7892_v39  ;;  %v2219_v31 = vpop.f32.mrb[147].mxu1  ;;  %v1964_v14 = vpop.f32.mrb[115].mxu0  ;;  %v2399_v39 = vmul.f32 %v7967_v37, %v7967_v37 }
 0x238   :  { %10911 = vst [vmem:[#allocation15_spill] sm:$0xff] %v7972_v12  ;;  %v2326_v11 = vadd.f32 %v2325_v33, %v7972_v12  ;;  %v2397_v49 = vmul.f32 %v7972_v12, %v7972_v12  ;;  %v2459_v2 = vadd.f32 %v2458_v48, %v2396_v26  ;;  %v7983_v46 = vadd.f32 %v2219_v31, %v7862_v17  ;;  %v10914_v14 = vld [vmem:[#allocation17_spill] sm:$0xff] }
 0x239   :  { %v2400_v31 = vmul.f32 %v7977_v27, %v7977_v27 }
 0x23a   :  { %10913 = vst [vmem:[#allocation16_spill] sm:$0xff] %v7983_v46  ;;  %v2460_v6 = vadd.f32 %v2459_v2, %v2397_v49  ;;  %v2327_v29 = vadd.f32 %v2326_v11, %v7983_v46  ;;  %v2398_v40 = vmul.f32 %v7983_v46, %v7983_v46 }
 0x23c   :  { %v2328_v42 = vadd.f32 %v2327_v29, %v7967_v37  ;;  %v2461_v43 = vadd.f32 %v2460_v6, %v2398_v40  ;;  %v1967_v33 = vpop.f32.mrb[116].mxu0  ;;  %v5729_v1 = vpop.f32.mrb[148].mxu1  ;;  %v10917_v6 = vld [vmem:[#allocation18_spill] sm:$0xff] }
 0x23d   :  { %v1968_v12 = vadd.f32 %v1967_v33, %v10914_v14  ;;  %v7992_v26 = vadd.f32 %v5729_v1, %v1952_v0  ;;  %v1969_v17 = vpop.f32.mrb[117].mxu0  ;;  %v2232_v48 = vpop.f32.mrb[149].mxu1 }
 0x23e   :  { %v2462_v11 = vadd.f32 %v2461_v43, %v2399_v39  ;;  %v7997_v49 = vadd.f32 %v2232_v48, %v7910_v47  ;;  %v2329_v2 = vadd.f32 %v2328_v42, %v7977_v27  ;;  %v1970_v46 = vpop.f32.mrb[118].mxu0  ;;  %v5730_v29 = vpop.f32.mrb[150].mxu1 }
 0x23f   :  { %10915 = vst [vmem:[#allocation17_spill] sm:$0xff] %v7992_v26  ;;  %v1971_v40 = vadd.f32 %v1970_v46, %v10917_v6  ;;  %v8001_v37 = vadd.f32 %v5730_v29, %v1955_v44  ;;  %v2235_v33 = vpop.f32.mrb[151].mxu1  ;;  %v1972_v0 = vpop.f32.mrb[119].mxu0  ;;  %v2403_v44 = vmul.f32 %v7992_v26, %v7992_v26  ;;  %v10920_v6 = vld [vmem:[#allocation19_spill] sm:$0xff] }
 0x240   :  { %10916 = vst [vmem:[#allocation28_spill] sm:$0xff] %v7997_v49  ;;  %v2330_v1 = vadd.f32 %v2329_v2, %v7997_v49  ;;  %v2401_v14 = vmul.f32 %v7997_v49, %v7997_v49  ;;  %v2463_v17 = vadd.f32 %v2462_v11, %v2400_v31  ;;  %v8007_v39 = vadd.f32 %v2235_v33, %v7922_v15 }
 0x241   :  { %10918 = vst [vmem:[#allocation18_spill] sm:$0xff] %v8001_v37  ;;  %v2404_v33 = vmul.f32 %v8001_v37, %v8001_v37 }
 0x242   :  { %10919 = vst [vmem:[#allocation29_spill] sm:$0xff] %v8007_v39  ;;  %v2464_v47 = vadd.f32 %v2463_v17, %v2401_v14  ;;  %v2331_v42 = vadd.f32 %v2330_v1, %v8007_v39  ;;  %v2402_v43 = vmul.f32 %v8007_v39, %v8007_v39 }
 0x244   :  { %v2332_v46 = vadd.f32 %v2331_v42, %v7992_v26  ;;  %v2465_v48 = vadd.f32 %v2464_v47, %v2402_v43  ;;  %v1975_v2 = vpop.f32.mrb[120].mxu0  ;;  %v5733_v29 = vpop.f32.mrb[152].mxu1  ;;  %v10923_v42 = vld [vmem:[#allocation20_spill] sm:$0xff] }
 0x245   :  { %v1976_v0 = vadd.f32 %v1975_v2, %v10920_v6  ;;  %v8016_v31 = vadd.f32 %v5733_v29, %v1968_v12  ;;  %v1977_v15 = vpop.f32.mrb[121].mxu0  ;;  %v2248_v11 = vpop.f32.mrb[153].mxu1 }
 0x246   :  { %v2466_v1 = vadd.f32 %v2465_v48, %v2403_v44  ;;  %v8020_v14 = vadd.f32 %v2248_v11, %v1960_v60  ;;  %v2333_v17 = vadd.f32 %v2332_v46, %v8001_v37  ;;  %v1978_v39 = vpop.f32.mrb[122].mxu0  ;;  %v5734_v49 = vpop.f32.mrb[154].mxu1 }
 0x247   :  { %10921 = vst [vmem:[#allocation19_spill] sm:$0xff] %v8016_v31  ;;  %v1979_v47 = vadd.f32 %v1978_v39, %v10923_v42  ;;  %v8024_v43 = vadd.f32 %v5734_v49, %v1971_v40  ;;  %v2251_v26 = vpop.f32.mrb[155].mxu1  ;;  %v1980_v2 = vpop.f32.mrb[123].mxu0  ;;  %v2407_v49 = vmul.f32 %v8016_v31, %v8016_v31 }
 0x248   :  { %10922 = vst [vmem:[#allocation30_spill] sm:$0xff] %v8020_v14  ;;  %v2334_v12 = vadd.f32 %v2333_v17, %v8020_v14  ;;  %v2405_v29 = vmul.f32 %v8020_v14, %v8020_v14  ;;  %v2467_v6 = vadd.f32 %v2466_v1, %v2404_v33  ;;  %v8029_v15 = vadd.f32 %v2251_v26, %v1963_v21 }
 0x249   :  { %10924 = vst [vmem:[#allocation20_spill] sm:$0xff] %v8024_v43  ;;  %v2408_v21 = vmul.f32 %v8024_v43, %v8024_v43 }
 0x24a   :  { %10925 = vst [vmem:[#allocation31_spill] sm:$0xff] %v8029_v15  ;;  %v2468_v60 = vadd.f32 %v2467_v6, %v2405_v29  ;;  %v2335_v44 = vadd.f32 %v2334_v12, %v8029_v15  ;;  %v2406_v46 = vmul.f32 %v8029_v15, %v8029_v15 }
 0x24c   :  { %v2336_v40 = vadd.f32 %v2335_v44, %v8016_v31  ;;  %v2469_v39 = vadd.f32 %v2468_v60, %v2406_v46  ;;  %v1983_v48 = vpop.f32.mrb[124].mxu0  ;;  %v5737_v11 = vpop.f32.mrb[156].mxu1  ;;  %v10928_v44 = vld [vmem:[#allocation21_spill] sm:$0xff] }
 0x24d   :  { %v1984_v17 = vadd.f32 %v1983_v48, %v7602_v63  ;;  %v1985_v42 = vpop.f32.mrb[125].mxu0  ;;  %v2264_v33 = vpop.f32.mrb[157].mxu1 }
 0x24e   :  { %v2470_v26 = vadd.f32 %v2469_v39, %v2407_v49  ;;  %v8040_v1 = vadd.f32 %v2264_v33, %v1976_v0  ;;  %v2337_v2 = vadd.f32 %v2336_v40, %v8024_v43  ;;  %v1986_v12 = vpop.f32.mrb[126].mxu0  ;;  %v5738_v29 = vpop.f32.mrb[158].mxu1 }
 0x24f   :  { %v8043_v6 = vadd.f32 %v5737_v11, %v1984_v17  ;;  %v1987_v60 = vadd.f32 %v1986_v12, %v10928_v44  ;;  %v2267_v46 = vpop.f32.mrb[159].mxu1  ;;  %v1988_v31 = vpop.f32.mrb[127].mxu0 }
 0x250   :  { %10926 = vst [vmem:[#allocation32_spill] sm:$0xff] %v8040_v1  ;;  %v2338_v63 = vadd.f32 %v2337_v2, %v8040_v1  ;;  %v2409_v48 = vmul.f32 %v8040_v1, %v8040_v1  ;;  %v2471_v42 = vadd.f32 %v2470_v26, %v2408_v21  ;;  %v2268_v15 = vadd.f32 %v2267_v46, %v1979_v47 }
 0x251   :  { %10927 = vst [vmem:[#allocation33_spill] sm:$0xff] %v8043_v6  ;;  %v8049_v49 = vadd.f32 %v5738_v29, %v1987_v60  ;;  %v2411_v11 = vmul.f32 %v8043_v6, %v8043_v6 }
 0x252   :  { %v2472_v0 = vadd.f32 %v2471_v42, %v2409_v48  ;;  %v2339_v39 = vadd.f32 %v2338_v63, %v2268_v15  ;;  %v2410_v40 = vmul.f32 %v2268_v15, %v2268_v15 }
 0x253   :  { %v2412_v31 = vmul.f32 %v8049_v49, %v8049_v49 }
 0x254   :  { %v2340_v17 = vadd.f32 %v2339_v39, %v8043_v6  ;;  %v2473_v33 = vadd.f32 %v2472_v0, %v2410_v40 }
 0x256   :  { %v2341_v2 = vadd.f32 %v2340_v17, %v8049_v49  ;;  %v2474_v12 = vadd.f32 %v2473_v33, %v2411_v11  ;;  %v2494_v11 = vlaneseq }
 0x258   :  { %v2342_v44 = vrot.slane %v2341_v2, 4  ;;  %v2475_v21 = vadd.f32 %v2474_v12, %v2412_v31  ;;  %v2495_v33 = vshrl.u32 %v2494_v11, 7  ;;  %v2486_v31 = vld [vmem:[%s10724_s4] sm:$0x1]  ;;  %s6706_s4 = smov 96  }
 0x25a   :  { %v2343_v47 = vadd.f32 %v2342_v44, %v2341_v2  ;;  %v2476_v26 = vrot.slane %v2475_v21, 4  ;;  %v8060_v2 = vsub.s32 0, %v2495_v33  ;;  %v10936_v33 = vld [vmem:[#allocation27_spill] sm:$0xff] }
 0x25c   :  { %v2344_v29 = vrot.slane %v2343_v47, 2  ;;  %v2477_v60 = vadd.f32 %v2476_v26, %v2475_v21  ;;  %10929 = vst [vmem:[#allocation21_spill] sm:$0xff] %v8060_v2  ;;  %v10930_v21 = vld [vmem:[#allocation23_spill] sm:$0xff] }
 0x25e   :  { %v2345_v46 = vadd.f32 %v2344_v29, %v2343_v47  ;;  %v2478_v63 = vrot.slane %v2477_v60, 2  ;;  %v10931_v29 = vld [vmem:[#allocation24_spill] sm:$0xff] }
 0x260   :  { %v2346_v48 = vrot.slane %v2345_v46, 1  ;;  %v2479_v42 = vadd.f32 %v2478_v63, %v2477_v60 }
 0x262   :  { %v2347_v43 = vadd.f32 %v2346_v48, %v2345_v46  ;;  %v2480_v1 = vrot.slane %v2479_v42, 1  ;;  %v10932_v46 = vld [vmem:[#allocation22_spill] sm:$0xff] }
 0x264   :  { %v2348_v39 = vmul.f32 0.001953125, %v2347_v43  ;;  %v2481_v0 = vadd.f32 %v2480_v1, %v2479_v42  ;;  %v2490_v43 = vld [vmem:[%s10725_s5] sm:$0x1] }
 0x266   :  { %v2482_v40 = vmul.f32 0.001953125, %v2481_v0  ;;  %v2483_v6 = vmul.f32 %v2348_v39, %v2348_v39 }
 0x268   :  { %v2484_v14 = vsub.f32 %v2482_v40, %v2483_v6 }
 0x26a   :  { %v2485_v37 = vmax.f32 %v2484_v14, 0.0 }
 0x26c   :  { %v2487_v17 = vadd.f32 1e-05, %v2485_v37 }
 0x26e   :  { %6119 = vrsqrt.f32 %v2487_v17 }
 0x278   :  { %v6120_v12 = vpop.eup %6119 }
 0x279   :  { %v2489_v44 = vmul.f32 %v6120_v12, %v2486_v31  ;;  %v10937_v12 = vld [vmem:[#allocation9_spill] sm:$0xff] }
 0x27b   :  { %v2491_v1 = vmul.f32 %v2489_v44, %v2348_v39  ;;  %v8066_v6 = vrot.slane %v2489_v44, %v8060_v2 }
 0x27d   :  { %v2492_v37 = vsub.f32 %v2490_v43, %v2491_v1  ;;  %v2560_v14 = vmul.f32 %v8066_v6, %v2268_v15  ;;  %v8071_v47 = vmul.f32 %v8066_v6, %v10930_v21  ;;  %v2500_v60 = vmul.f32 %v8066_v6, %v10931_v29  ;;  %v10938_v43 = vld [vmem:[#allocation11_spill] sm:$0xff]  ;;  %v10940_v21 = vld [vmem:[#allocation13_spill] sm:$0xff] }
 0x27e   :  { %v2501_v63 = vmul.f32 %v8066_v6, %v10932_v46  ;;  %v2502_v48 = vmul.f32 %v8066_v6, %v7625_v59  ;;  %v2503_v42 = vmul.f32 %v8066_v6, %v7648_v55  ;;  %v2504_v15 = vmul.f32 %v8066_v6, %v7661_v53  ;;  %v10941_v46 = vld [vmem:[#allocation12_spill] sm:$0xff] }
 0x27f   :  { %v8074_v26 = vrot.slane %v2492_v37, %v8060_v2  ;;  %v8088_v39 = vmul.f32 %v8066_v6, %v7643_v9  ;;  %v8092_v0 = vmul.f32 %v8066_v6, %v7655_v36  ;;  %v2507_v59 = vmul.f32 %v8066_v6, %v7678_v28  ;;  %v10939_v37 = vld [vmem:[#allocation10_spill] sm:$0xff]  ;;  %v10951_v2 = vld [vmem:[#allocation17_spill] sm:$0xff] }
 0x280   :  { %v2508_v55 = vmul.f32 %v8066_v6, %v7691_v24  ;;  %v2509_v53 = vmul.f32 %v8066_v6, %v7673_v61  ;;  %v2510_v9 = vmul.f32 %v8066_v6, %v7685_v52  ;;  %v2511_v17 = vmul.f32 %v8066_v6, %v7708_v13 }
 0x281   :  { %v8095_v40 = vadd.f32 %v8074_v26, %v2560_v14  ;;  %v8109_v36 = vmul.f32 %v8066_v6, %v7721_v58  ;;  %v8113_v11 = vmul.f32 %v8066_v6, %v7703_v34  ;;  %v8117_v28 = vmul.f32 %v8066_v6, %v7715_v5 }
 0x282   :  { %v8121_v61 = vmul.f32 %v8066_v6, %v7738_v50  ;;  %v8125_v52 = vmul.f32 %v8066_v6, %v7751_v38  ;;  %v8129_v24 = vmul.f32 %v8066_v6, %v7733_v3  ;;  %v8133_v34 = vmul.f32 %v8066_v6, %v7745_v22 }
 0x283   :  { %10933 = vst [vmem:[#allocation23_spill] sm:$0xff] %v8095_v40  ;;  %v8137_v13 = vmul.f32 %v8066_v6, %v7768_v18  ;;  %v8141_v5 = vmul.f32 %v8066_v6, %v7781_v62  ;;  %v8145_v58 = vmul.f32 %v8066_v6, %v7763_v56  ;;  %v8149_v3 = vmul.f32 %v8066_v6, %v7775_v41  ;;  %v10952_v40 = vld [vmem:[#allocation18_spill] sm:$0xff] }
 0x284   :  { %v8153_v50 = vmul.f32 %v8066_v6, %v7798_v32  ;;  %v8157_v22 = vmul.f32 %v8066_v6, %v7811_v19  ;;  %v8161_v38 = vmul.f32 %v8066_v6, %v7793_v16  ;;  %v8165_v56 = vmul.f32 %v8066_v6, %v7805_v57  ;;  %v10934_v32 = vld [vmem:[#allocation26_spill] sm:$0xff] }
 0x285   :  { %v8169_v18 = vmul.f32 %v8066_v6, %v7828_v7  ;;  %v8173_v41 = vmul.f32 %v8066_v6, %v7841_v35  ;;  %v8177_v62 = vmul.f32 %v8066_v6, %v7823_v23  ;;  %v8181_v16 = vmul.f32 %v8066_v6, %v7835_v10  ;;  %v10935_v7 = vld [vmem:[#allocation25_spill] sm:$0xff] }
 0x286   :  { %v8185_v57 = vmul.f32 %v8066_v6, %v10934_v32  ;;  %v8189_v19 = vmul.f32 %v8066_v6, %v7871_v51  ;;  %v8193_v35 = vmul.f32 %v8066_v6, %v10935_v7  ;;  %v8197_v23 = vmul.f32 %v8066_v6, %v7865_v30  ;;  %v10942_v7 = vld [vmem:[#allocation15_spill] sm:$0xff] }
 0x287   :  { %v8201_v10 = vmul.f32 %v8066_v6, %v10936_v33  ;;  %v8205_v31 = vmul.f32 %v8066_v6, %v7901_v54  ;;  %v8209_v51 = vmul.f32 %v8066_v6, %v10937_v12  ;;  %v8213_v44 = vmul.f32 %v8066_v6, %v7895_v8  ;;  %v10943_v33 = vld [vmem:[#allocation16_spill] sm:$0xff] }
 0x288   :  { %v8217_v30 = vmul.f32 %v8066_v6, %v10938_v43  ;;  %v8221_v1 = vmul.f32 %v8066_v6, %v7931_v4  ;;  %v8225_v54 = vmul.f32 %v8066_v6, %v10939_v37  ;;  %v8229_v14 = vmul.f32 %v8066_v6, %v7925_v25  ;;  %v10944_v43 = vld [vmem:[#allocation14_spill] sm:$0xff] }
 0x289   :  { %v8233_v8 = vmul.f32 %v8066_v6, %v10940_v21  ;;  %v8237_v29 = vmul.f32 %v8066_v6, %v7957_v45  ;;  %v8241_v4 = vmul.f32 %v8066_v6, %v10941_v46  ;;  %v8245_v32 = vmul.f32 %v8066_v6, %v7951_v20  ;;  %v10947_v21 = vld [vmem:[#allocation28_spill] sm:$0xff]  ;;  %v10949_v46 = vld [vmem:[#allocation29_spill] sm:$0xff] }
 0x28a   :  { %v8249_v25 = vmul.f32 %v8066_v6, %v10942_v7  ;;  %v8253_v12 = vmul.f32 %v8066_v6, %v10943_v33  ;;  %v8257_v45 = vmul.f32 %v8066_v6, %v10944_v43  ;;  %v8261_v37 = vmul.f32 %v8066_v6, %v7977_v27 }
 0x28b   :  { %v8265_v20 = vmul.f32 %v8066_v6, %v10947_v21  ;;  %v8269_v7 = vmul.f32 %v8066_v6, %v10949_v46  ;;  %v8273_v33 = vmul.f32 %v8066_v6, %v10951_v2  ;;  %v8277_v43 = vmul.f32 %v8066_v6, %v10952_v40 }
 0x28c   :  { %10945 = vst [vmem:[#allocation24_spill] sm:$0xff] %v8257_v45  ;;  %10946 = vst [vmem:[#allocation22_spill] sm:$0xff] %v8261_v37  ;;  %v10953_v45 = vld [vmem:[#allocation30_spill] sm:$0xff]  ;;  %v10955_v37 = vld [vmem:[#allocation31_spill] sm:$0xff]  ;;  %v8297_v40 = vmul.f32 %v8066_v6, %v8049_v49 }
 0x28d   :  { %10948 = vst [vmem:[#allocation26_spill] sm:$0xff] %v8265_v20  ;;  %10950 = vst [vmem:[#allocation25_spill] sm:$0xff] %v8269_v7  ;;  %v8281_v27 = vmul.f32 %v8066_v6, %v10953_v45  ;;  %v8285_v21 = vmul.f32 %v8066_v6, %v10955_v37  ;;  %v10956_v20 = vld [vmem:[#allocation32_spill] sm:$0xff]  ;;  %v10957_v7 = vld [vmem:[#allocation33_spill] sm:$0xff]  ;;  %v8301_v45 = vadd.f32 %v8074_v26, %v8071_v47 }
 0x28e   :  { %v8289_v46 = vmul.f32 %v8066_v6, %v10956_v20  ;;  %v8293_v2 = vmul.f32 %v8066_v6, %v10957_v7  ;;  %10959 = vst [vmem:[#allocation11_spill] sm:$0xff] %v8297_v40  ;;  %v8307_v37 = vadd.f32 %v8074_v26, %v2501_v63  ;;  %v8310_v20 = vadd.f32 %v8074_v26, %v2502_v48  ;;  %v10960_v49 = vld [vmem:[#allocation19_spill] sm:$0xff] }
 0x28f   :  { %10954 = vst [vmem:[#allocation27_spill] sm:$0xff] %v8281_v27  ;;  %v8304_v27 = vadd.f32 %v8074_v26, %v2500_v60  ;;  %v8313_v7 = vadd.f32 %v8074_v26, %v2503_v42  ;;  %v2557_v40 = vmul.f32 %v8066_v6, %v10960_v49  ;;  %v8322_v47 = vadd.f32 %v8074_v26, %v8088_v39  ;;  %v10962_v39 = vld [vmem:[#allocation20_spill] sm:$0xff] }
 0x290   :  { %10958 = vst [vmem:[#allocation9_spill] sm:$0xff] %v8293_v2  ;;  %v8316_v2 = vadd.f32 %v8074_v26, %v2504_v15  ;;  %v8326_v60 = vadd.f32 %v8074_v26, %v8092_v0  ;;  %v8329_v63 = vadd.f32 %v8074_v26, %v2507_v59  ;;  %v8332_v48 = vadd.f32 %v8074_v26, %v2508_v55 }
 0x291   :  { %10961 = vst [vmem:[#allocation10_spill] sm:$0xff] %v8322_v47  ;;  %v8335_v42 = vadd.f32 %v8074_v26, %v2509_v53  ;;  %v8338_v15 = vadd.f32 %v8074_v26, %v2510_v9  ;;  %v8341_v49 = vadd.f32 %v8074_v26, %v2511_v17  ;;  %v2558_v47 = vmul.f32 %v8066_v6, %v10962_v39 }
 0x292   :  { %v8347_v0 = vadd.f32 %v8074_v26, %v8109_v36  ;;  %v8351_v59 = vadd.f32 %v8074_v26, %v8113_v11  ;;  %v8355_v55 = vadd.f32 %v8074_v26, %v8117_v28  ;;  %v8359_v53 = vadd.f32 %v8074_v26, %v8121_v61 }
 0x293   :  { %v8363_v9 = vadd.f32 %v8074_v26, %v8125_v52  ;;  %v8367_v6 = vadd.f32 %v8074_v26, %v8129_v24  ;;  %v8371_v17 = vadd.f32 %v8074_v26, %v8133_v34  ;;  %v8375_v36 = vadd.f32 %v8074_v26, %v8137_v13 }
 0x294   :  { %v8379_v11 = vadd.f32 %v8074_v26, %v8141_v5  ;;  %v8383_v28 = vadd.f32 %v8074_v26, %v8145_v58  ;;  %v8387_v61 = vadd.f32 %v8074_v26, %v8149_v3  ;;  %v8391_v52 = vadd.f32 %v8074_v26, %v8153_v50  ;;  %v10971_v39 = vld [vmem:[#allocation26_spill] sm:$0xff] }
 0x295   :  { %v8395_v24 = vadd.f32 %v8074_v26, %v8157_v22  ;;  %v8399_v34 = vadd.f32 %v8074_v26, %v8161_v38  ;;  %v8403_v13 = vadd.f32 %v8074_v26, %v8165_v56  ;;  %v8407_v5 = vadd.f32 %v8074_v26, %v8169_v18 }
 0x296   :  { %v8411_v58 = vadd.f32 %v8074_v26, %v8173_v41  ;;  %v8415_v3 = vadd.f32 %v8074_v26, %v8177_v62  ;;  %v8419_v50 = vadd.f32 %v8074_v26, %v8181_v16  ;;  %v8423_v22 = vadd.f32 %v8074_v26, %v8185_v57 }
 0x297   :  { %v8427_v38 = vadd.f32 %v8074_v26, %v8189_v19  ;;  %v8431_v56 = vadd.f32 %v8074_v26, %v8193_v35  ;;  %v8435_v18 = vadd.f32 %v8074_v26, %v8197_v23  ;;  %v8439_v41 = vadd.f32 %v8074_v26, %v8201_v10 }
 0x298   :  { %v8443_v62 = vadd.f32 %v8074_v26, %v8205_v31  ;;  %v8447_v16 = vadd.f32 %v8074_v26, %v8209_v51  ;;  %v8451_v57 = vadd.f32 %v8074_v26, %v8213_v44  ;;  %v8455_v19 = vadd.f32 %v8074_v26, %v8217_v30 }
 0x299   :  { %v8459_v35 = vadd.f32 %v8074_v26, %v8221_v1  ;;  %v8463_v23 = vadd.f32 %v8074_v26, %v8225_v54  ;;  %v8467_v10 = vadd.f32 %v8074_v26, %v8229_v14  ;;  %v8471_v31 = vadd.f32 %v8074_v26, %v8233_v8  ;;  %v10967_v14 = vld [vmem:[#allocation24_spill] sm:$0xff] }
 0x29a   :  { %v8475_v51 = vadd.f32 %v8074_v26, %v8237_v29  ;;  %v8479_v44 = vadd.f32 %v8074_v26, %v8241_v4  ;;  %v8483_v30 = vadd.f32 %v8074_v26, %v8245_v32  ;;  %v8487_v1 = vadd.f32 %v8074_v26, %v8249_v25  ;;  %v10969_v29 = vld [vmem:[#allocation22_spill] sm:$0xff] }
 0x29b   :  { %10963 = vst [vmem:[#allocation13_spill] sm:$0xff] %v8467_v10  ;;  %v8491_v54 = vadd.f32 %v8074_v26, %v8253_v12  ;;  %v8495_v8 = vadd.f32 %v8074_v26, %v10967_v14  ;;  %v8499_v4 = vadd.f32 %v8074_v26, %v10969_v29  ;;  %v8503_v32 = vadd.f32 %v8074_v26, %v10971_v39 }
 0x29c   :  { %10964 = vst [vmem:[#allocation12_spill] sm:$0xff] %v8479_v44  ;;  %10965 = vst [vmem:[#allocation15_spill] sm:$0xff] %v8483_v30  ;;  %v10973_v44 = vld [vmem:[#allocation25_spill] sm:$0xff]  ;;  %v8511_v12 = vadd.f32 %v8074_v26, %v8273_v33  ;;  %v8515_v14 = vadd.f32 %v8074_v26, %v8277_v43  ;;  %v8523_v39 = vadd.f32 %v8074_v26, %v8285_v21  ;;  %6121 = vtanh.f32 %v8307_v37 }
 0x29d   :  { %10966 = vst [vmem:[#allocation16_spill] sm:$0xff] %v8491_v54  ;;  %10968 = vst [vmem:[#allocation14_spill] sm:$0xff] %v8495_v8  ;;  %v8507_v25 = vadd.f32 %v8074_v26, %v10973_v44  ;;  %v10976_v8 = vld [vmem:[#allocation27_spill] sm:$0xff]  ;;  %v8529_v44 = vadd.f32 %v8074_v26, %v2558_v47  ;;  %v8533_v33 = vadd.f32 %v8074_v26, %v8289_v46  ;;  %v10978_v43 = vld [vmem:[#allocation9_spill] sm:$0xff]  ;;  %6123 = vtanh.f32 %v8301_v45 }
 0x29e   :  { %10970 = vst [vmem:[#allocation28_spill] sm:$0xff] %v8499_v4  ;;  %10972 = vst [vmem:[#allocation29_spill] sm:$0xff] %v8503_v32  ;;  %v8519_v29 = vadd.f32 %v8074_v26, %v10976_v8  ;;  %v8526_v32 = vadd.f32 %v8074_v26, %v2557_v40  ;;  %v10980_v8 = vld [vmem:[#allocation11_spill] sm:$0xff]  ;;  %6125 = vtanh.f32 %v8310_v20 }
 0x29f   :  { %10974 = vst [vmem:[#allocation17_spill] sm:$0xff] %v8507_v25  ;;  %10975 = vst [vmem:[#allocation18_spill] sm:$0xff] %v8515_v14  ;;  %v8537_v14 = vadd.f32 %v8074_v26, %v10978_v43  ;;  %6127 = vtanh.f32 %v8304_v27 }
 0x2a0   :  { %10977 = vst [vmem:[#allocation30_spill] sm:$0xff] %v8519_v29  ;;  %v8541_v29 = vadd.f32 %v8074_v26, %v10980_v8  ;;  %6129 = vtanh.f32 %v8316_v2  ;;  %v10982_v26 = vld [vmem:[#allocation10_spill] sm:$0xff] }
 0x2a1   :  { %10979 = vst [vmem:[#allocation31_spill] sm:$0xff] %v8537_v14  ;;  %6131 = vtanh.f32 %v8313_v7 }
 0x2a2   :  { %10981 = vst [vmem:[#allocation32_spill] sm:$0xff] %v8541_v29  ;;  %6133 = vtanh.f32 %v8326_v60 }
 0x2a3   :  { %6135 = vtanh.f32 %v10982_v26 }
 0x2a4   :  { %6137 = vtanh.f32 %v8332_v48 }
 0x2a5   :  { %6139 = vtanh.f32 %v8329_v63 }
 0x2a6   :  { %v6122_v21 = vpop.eup %6121  ;;  %6141 = vtanh.f32 %v8338_v15 }
 0x2a7   :  { %v6124_v46 = vpop.eup %6123  ;;  %3277 = vrot.lane.b32.xlu1 %v6122_v21, %s6706_s4  ;;  %6143 = vtanh.f32 %v8335_v42 }
 0x2a8   :  { %3273 = vrot.lane.b32.xlu0 %v6124_v46, %s6706_s4  ;;  %v6126_v40 = vpop.eup %6125  ;;  %6145 = vtanh.f32 %v8347_v0 }
 0x2a9   :  { %v6128_v47 = vpop.eup %6127  ;;  %6147 = vtanh.f32 %v8341_v49 }
 0x2aa   :  { %v6130_v43 = vpop.eup %6129  ;;  %6149 = vtanh.f32 %v8355_v55 }
 0x2ab   :  { %3279 = vrot.lane.b32.xlu1 %v6126_v40, %s6706_s4  ;;  %v6132_v8 = vpop.eup %6131  ;;  %6151 = vtanh.f32 %v8351_v59 }
 0x2ac   :  { %3275 = vrot.lane.b32.xlu0 %v6128_v47, %s6706_s4  ;;  %v6134_v21 = vpop.eup %6133  ;;  %6153 = vtanh.f32 %v8363_v9 }
 0x2ad   :  { %v6136_v46 = vpop.eup %6135  ;;  %6155 = vtanh.f32 %v8359_v53 }
 0x2ae   :  { %v6138_v40 = vpop.eup %6137  ;;  %6157 = vtanh.f32 %v8371_v17 }
 0x2af   :  { %3283 = vrot.lane.b32.xlu1 %v6130_v43, %s6706_s4  ;;  %v6140_v47 = vpop.eup %6139  ;;  %6159 = vtanh.f32 %v8367_v6 }
 0x2b0   :  { %3281 = vrot.lane.b32.xlu0 %v6132_v8, %s6706_s4  ;;  %v6142_v43 = vpop.eup %6141  ;;  %6161 = vtanh.f32 %v8379_v11 }
 0x2b1   :  { %v6144_v8 = vpop.eup %6143  ;;  %6163 = vtanh.f32 %v8375_v36 }
 0x2b2   :  { %6165 = vtanh.f32 %v8387_v61 }
 0x2b3   :  { %3287 = vrot.lane.b32.xlu1 %v6134_v21, %s6706_s4  ;;  %v6146_v21 = vpop.eup %6145  ;;  %6167 = vtanh.f32 %v8383_v28 }
 0x2b4   :  { %3285 = vrot.lane.b32.xlu0 %v6136_v46, %s6706_s4  ;;  %v6148_v46 = vpop.eup %6147  ;;  %6169 = vtanh.f32 %v8395_v24 }
 0x2b5   :  { %6171 = vtanh.f32 %v8391_v52 }
 0x2b6   :  { %6173 = vtanh.f32 %v8403_v13 }
 0x2b7   :  { %3291 = vrot.lane.b32.xlu1 %v6138_v40, %s6706_s4  ;;  %v6150_v40 = vpop.eup %6149  ;;  %6175 = vtanh.f32 %v8399_v34 }
 0x2b8   :  { %3289 = vrot.lane.b32.xlu0 %v6140_v47, %s6706_s4  ;;  %v6152_v47 = vpop.eup %6151  ;;  %6177 = vtanh.f32 %v8411_v58 }
 0x2b9   :  { %6179 = vtanh.f32 %v8407_v5 }
 0x2ba   :  { %6181 = vtanh.f32 %v8419_v50 }
 0x2bb   :  { %3295 = vrot.lane.b32.xlu1 %v6142_v43, %s6706_s4  ;;  %v6154_v43 = vpop.eup %6153  ;;  %6183 = vtanh.f32 %v8415_v3 }
 0x2bc   :  { %3293 = vrot.lane.b32.xlu0 %v6144_v8, %s6706_s4  ;;  %v6156_v8 = vpop.eup %6155  ;;  %6185 = vtanh.f32 %v8427_v38 }
 0x2bd   :  { %6187 = vtanh.f32 %v8423_v22 }
 0x2bf   :  { %3299 = vrot.lane.b32.xlu1 %v6146_v21, %s6706_s4  ;;  %v6158_v21 = vpop.eup %6157  ;;  %6189 = vtanh.f32 %v8435_v18 }
 0x2c0   :  { %3297 = vrot.lane.b32.xlu0 %v6148_v46, %s6706_s4  ;;  %v6160_v46 = vpop.eup %6159  ;;  %6191 = vtanh.f32 %v8431_v56 }
 0x2c3   :  { %3303 = vrot.lane.b32.xlu1 %v6150_v40, %s6706_s4  ;;  %v6162_v40 = vpop.eup %6161  ;;  %6193 = vtanh.f32 %v8443_v62 }
 0x2c4   :  { %3301 = vrot.lane.b32.xlu0 %v6152_v47, %s6706_s4  ;;  %v6164_v47 = vpop.eup %6163  ;;  %6195 = vtanh.f32 %v8439_v41 }
 0x2c7   :  { %3307 = vrot.lane.b32.xlu1 %v6154_v43, %s6706_s4  ;;  %v6166_v43 = vpop.eup %6165  ;;  %6197 = vtanh.f32 %v8451_v57 }
 0x2c8   :  { %3305 = vrot.lane.b32.xlu0 %v6156_v8, %s6706_s4  ;;  %v6168_v8 = vpop.eup %6167  ;;  %6199 = vtanh.f32 %v8447_v16 }
 0x2cb   :  { %3311 = vrot.lane.b32.xlu1 %v6158_v21, %s6706_s4  ;;  %v6170_v21 = vpop.eup %6169  ;;  %6201 = vtanh.f32 %v8459_v35 }
 0x2cc   :  { %3309 = vrot.lane.b32.xlu0 %v6160_v46, %s6706_s4  ;;  %v6172_v46 = vpop.eup %6171  ;;  %6203 = vtanh.f32 %v8455_v19 }
 0x2cf   :  { %3315 = vrot.lane.b32.xlu1 %v6162_v40, %s6706_s4  ;;  %v6174_v40 = vpop.eup %6173  ;;  %6205 = vtanh.f32 %v8467_v10 }
 0x2d0   :  { %3313 = vrot.lane.b32.xlu0 %v6164_v47, %s6706_s4  ;;  %v6176_v47 = vpop.eup %6175  ;;  %6207 = vtanh.f32 %v8463_v23 }
 0x2d3   :  { %3319 = vrot.lane.b32.xlu1 %v6166_v43, %s6706_s4  ;;  %v6178_v43 = vpop.eup %6177  ;;  %6209 = vtanh.f32 %v8475_v51 }
 0x2d4   :  { %3317 = vrot.lane.b32.xlu0 %v6168_v8, %s6706_s4  ;;  %v6180_v8 = vpop.eup %6179  ;;  %6211 = vtanh.f32 %v8471_v31 }
 0x2d7   :  { %3323 = vrot.lane.b32.xlu1 %v6170_v21, %s6706_s4  ;;  %v6182_v21 = vpop.eup %6181  ;;  %6213 = vtanh.f32 %v8483_v30 }
 0x2d8   :  { %3321 = vrot.lane.b32.xlu0 %v6172_v46, %s6706_s4  ;;  %v6184_v46 = vpop.eup %6183 }
 0x2db   :  { %3327 = vrot.lane.b32.xlu1 %v6174_v40, %s6706_s4  ;;  %v6186_v40 = vpop.eup %6185 }
 0x2dc   :  { %3325 = vrot.lane.b32.xlu0 %v6176_v47, %s6706_s4  ;;  %v6188_v47 = vpop.eup %6187 }
 0x2df   :  { %3331 = vrot.lane.b32.xlu1 %v6178_v43, %s6706_s4  ;;  %v6190_v43 = vpop.eup %6189 }
 0x2e0   :  { %3329 = vrot.lane.b32.xlu0 %v6180_v8, %s6706_s4  ;;  %v6192_v8 = vpop.eup %6191 }
 0x2e3   :  { %3335 = vrot.lane.b32.xlu1 %v6182_v21, %s6706_s4  ;;  %v6194_v21 = vpop.eup %6193 }
 0x2e4   :  { %3333 = vrot.lane.b32.xlu0 %v6184_v46, %s6706_s4  ;;  %v6196_v46 = vpop.eup %6195 }
 0x2e7   :  { %3339 = vrot.lane.b32.xlu1 %v6186_v40, %s6706_s4  ;;  %v6198_v40 = vpop.eup %6197 }
 0x2e8   :  { %3337 = vrot.lane.b32.xlu0 %v6188_v47, %s6706_s4  ;;  %v6200_v47 = vpop.eup %6199 }
 0x2eb   :  { %3343 = vrot.lane.b32.xlu1 %v6190_v43, %s6706_s4  ;;  %v6202_v43 = vpop.eup %6201 }
 0x2ec   :  { %3341 = vrot.lane.b32.xlu0 %v6192_v8, %s6706_s4  ;;  %v6204_v8 = vpop.eup %6203 }
 0x2ef   :  { %3347 = vrot.lane.b32.xlu1 %v6194_v21, %s6706_s4  ;;  %v10983_v21 = vld [vmem:[#allocation12_spill] sm:$0xff] }
 0x2f0   :  { %3345 = vrot.lane.b32.xlu0 %v6196_v46, %s6706_s4  ;;  %6215 = vtanh.f32 %v10983_v21  ;;  %v6206_v46 = vpop.eup %6205 }
 0x2f1   :  { %v6208_v10 = vpop.eup %6207  ;;  %6217 = vtanh.f32 %v8491_v54 }
 0x2f2   :  { %6219 = vtanh.f32 %v8487_v1 }
 0x2f3   :  { %3351 = vrot.lane.b32.xlu1 %v6198_v40, %s6706_s4  ;;  %v6210_v40 = vpop.eup %6209  ;;  %6221 = vtanh.f32 %v8499_v4  ;;  %v5568_v4 = vmul.f32 -1.442695, %v8304_v27  ;;  %v5571_v27 = vmul.f32 -1.442695, %v8313_v7 }
 0x2f4   :  { %3349 = vrot.lane.b32.xlu0 %v6200_v47, %s6706_s4  ;;  %v6212_v47 = vpop.eup %6211 }
 0x2f7   :  { %3355 = vrot.lane.b32.xlu1 %v6202_v43, %s6706_s4  ;;  %v10984_v43 = vld [vmem:[#allocation14_spill] sm:$0xff] }
 0x2f8   :  { %3353 = vrot.lane.b32.xlu0 %v6204_v8, %s6706_s4  ;;  %6223 = vtanh.f32 %v10984_v43  ;;  %v6214_v8 = vpop.eup %6213  ;;  %v10987_v43 = vld [vmem:[#allocation18_spill] sm:$0xff] }
 0x2f9   :  { %6225 = vtanh.f32 %v8507_v25 }
 0x2fa   :  { %v6216_v30 = vpop.eup %6215 }
 0x2fb   :  { %3359 = vrot.lane.b32.xlu1 %v6206_v46, %s6706_s4  ;;  %v10985_v46 = vld [vmem:[#allocation29_spill] sm:$0xff]  ;;  %v6218_v54 = vpop.eup %6217 }
 0x2fc   :  { %3357 = vrot.lane.b32.xlu0 %v6208_v10, %s6706_s4  ;;  %v5567_v10 = vmul.f32 -1.442695, %v8301_v45  ;;  %6227 = vtanh.f32 %v10985_v46 }
 0x2ff   :  { %3363 = vrot.lane.b32.xlu1 %v6210_v40, %s6706_s4  ;;  %v10986_v40 = vld [vmem:[#allocation23_spill] sm:$0xff] }
 0x300   :  { %3361 = vrot.lane.b32.xlu0 %v6212_v47, %s6706_s4  ;;  %6229 = vtanh.f32 %v10986_v40  ;;  %v6220_v47 = vpop.eup %6219  ;;  %v10988_v40 = vld [vmem:[#allocation30_spill] sm:$0xff] }
 0x301   :  { %6231 = vtanh.f32 %v8511_v12  ;;  %v6222_v45 = vpop.eup %6221 }
 0x302   :  { %6233 = vtanh.f32 %v10987_v43  ;;  %v6224_v25 = vpop.eup %6223 }
 0x303   :  { %3367 = vrot.lane.b32.xlu1 %v6214_v8, %s6706_s4  ;;  %6235 = vpow2.f32 %v5567_v10  ;;  %v5570_v8 = vmul.f32 -1.442695, %v8310_v20 }
 0x304   :  { %3365 = vrot.lane.b32.xlu0 %v6216_v30, %s6706_s4  ;;  %v5569_v30 = vmul.f32 -1.442695, %v8307_v37  ;;  %6237 = vpow2.f32 %v5568_v4  ;;  %v5572_v37 = vmul.f32 -1.442695, %v8316_v2 }
 0x305   :  { %6239 = vtanh.f32 %v10988_v40 }
 0x306   :  { %6241 = vtanh.f32 %v8523_v39 }
 0x307   :  { %3371 = vrot.lane.b32.xlu1 %v6218_v54, %s6706_s4  ;;  %6243 = vpow2.f32 %v5569_v30  ;;  %v6226_v54 = vpop.eup %6225 }
 0x308   :  { %3369 = vrot.lane.b32.xlu0 %v6220_v47, %s6706_s4  ;;  %6245 = vpow2.f32 %v5570_v8  ;;  %v6228_v10 = vpop.eup %6227  ;;  %v5574_v47 = vmul.f32 -1.442695, %v8326_v60 }
 0x309   :  { %6247 = vtanh.f32 %v8526_v32 }
 0x30a   :  { %v6230_v20 = vpop.eup %6229  ;;  %6249 = vtanh.f32 %v8529_v44 }
 0x30b   :  { %3375 = vrot.lane.b32.xlu1 %v6222_v45, %s6706_s4  ;;  %v6232_v4 = vpop.eup %6231  ;;  %6251 = vpow2.f32 %v5571_v27  ;;  %v5575_v45 = vmul.f32 -1.442695, %v8329_v63  ;;  %v5577_v63 = vmul.f32 -1.442695, %v8335_v42  ;;  %v5579_v42 = vmul.f32 -1.442695, %v8341_v49 }
 0x30c   :  { %3373 = vrot.lane.b32.xlu0 %v6224_v25, %s6706_s4  ;;  %v5573_v25 = vmul.f32 -1.442695, %v10982_v26  ;;  %v6234_v7 = vpop.eup %6233  ;;  %6253 = vpow2.f32 %v5572_v37  ;;  %v5576_v26 = vmul.f32 -1.442695, %v8332_v48  ;;  %v5581_v49 = vmul.f32 -1.442695, %v8351_v59 }
 0x30d   :  { %v6236_v2 = vpop.eup %6235  ;;  %6255 = vtanh.f32 %v8533_v33  ;;  %v5583_v59 = vmul.f32 -1.442695, %v8359_v53 }
 0x30e   :  { %v6238_v30 = vpop.eup %6237  ;;  %6257 = vtanh.f32 %v8537_v14  ;;  %v2825_v60 = vadd.f32 1.0, %v6236_v2 }
 0x30f   :  { %3379 = vrot.lane.b32.xlu1 %v6226_v54, %s6706_s4  ;;  %v6240_v8 = vpop.eup %6239  ;;  %6259 = vpow2.f32 %v5573_v25  ;;  %v2826_v37 = vadd.f32 1.0, %v6238_v30 }
 0x310   :  { %3377 = vrot.lane.b32.xlu0 %v6228_v10, %s6706_s4  ;;  %v6242_v27 = vpop.eup %6241  ;;  %6261 = vpow2.f32 %v5574_v47 }
 0x311   :  { %v6244_v54 = vpop.eup %6243  ;;  %6263 = vtanh.f32 %v8541_v29 }
 0x312   :  { %v6246_v10 = vpop.eup %6245  ;;  %6265 = vpow2.f32 %v5575_v45  ;;  %v2827_v47 = vadd.f32 1.0, %v6244_v54 }
 0x313   :  { %3383 = vrot.lane.b32.xlu1 %v6234_v7, %s6706_s4  ;;  %v5578_v7 = vmul.f32 -1.442695, %v8338_v15  ;;  %6267 = vpow2.f32 %v5576_v26  ;;  %v2828_v30 = vadd.f32 1.0, %v6246_v10  ;;  %v5580_v15 = vmul.f32 -1.442695, %v8347_v0 }
 0x314   :  { %3381 = vrot.lane.b32.xlu0 %v6232_v4, %s6706_s4  ;;  %v6248_v4 = vpop.eup %6247  ;;  %6269 = vrcp.f32 %v2825_v60  ;;  %v5582_v0 = vmul.f32 -1.442695, %v8355_v55  ;;  %v5584_v55 = vmul.f32 -1.442695, %v8363_v9 }
 0x315   :  { %v6250_v25 = vpop.eup %6249  ;;  %6271 = vrcp.f32 %v2826_v37 }
 0x316   :  { %v6252_v29 = vpop.eup %6251  ;;  %6273 = vpow2.f32 %v5577_v63 }
 0x317   :  { %3387 = vrot.lane.b32.xlu1 %v6242_v27, %s6706_s4  ;;  %v6254_v27 = vpop.eup %6253  ;;  %6275 = vpow2.f32 %v5578_v7  ;;  %v2829_v54 = vadd.f32 1.0, %v6252_v29 }
 0x318   :  { %3385 = vrot.lane.b32.xlu0 %v6240_v8, %s6706_s4  ;;  %v6256_v45 = vpop.eup %6255  ;;  %6277 = vrcp.f32 %v2827_v47  ;;  %v2830_v10 = vadd.f32 1.0, %v6254_v27 }
 0x319   :  { %v8677_v48 = vpop.permute.xlu1 %3277  ;;  %v6258_v26 = vpop.eup %6257  ;;  %6279 = vrcp.f32 %v2828_v30 }
 0x31a   :  { %v3274_v2 = vpop.permute.xlu0 %3273  ;;  %v6260_v14 = vpop.eup %6259  ;;  %6281 = vpow2.f32 %v5579_v42 }
 0x31b   :  { %3391 = vrot.lane.b32.xlu1 %v6250_v25, %s6706_s4  ;;  %v6262_v37 = vpop.eup %6261  ;;  %6283 = vpow2.f32 %v5580_v15  ;;  %v2831_v29 = vadd.f32 1.0, %v6260_v14 }
 0x31c   :  { %3389 = vrot.lane.b32.xlu0 %v6248_v4, %s6706_s4  ;;  %v6264_v63 = vpop.eup %6263  ;;  %6285 = vrcp.f32 %v2829_v54  ;;  %v2832_v27 = vadd.f32 1.0, %v6262_v37 }
 0x31d   :  { %v3280_v8 = vpop.permute.xlu1 %3279  ;;  %v6266_v7 = vpop.eup %6265  ;;  %6287 = vrcp.f32 %v2830_v10 }
 0x31e   :  { %v3276_v60 = vpop.permute.xlu0 %3275  ;;  %v6268_v47 = vpop.eup %6267  ;;  %6289 = vpow2.f32 %v5581_v49  ;;  %v5586_v49 = vmul.f32 -1.442695, %v8371_v17 }
 0x31f   :  { %3395 = vrot.lane.b32.xlu1 %v6230_v20, %s6706_s4  ;;  %v8688_v20 = vpop.eup %6269  ;;  %6291 = vpow2.f32 %v5582_v0 }
 0x320   :  { %3393 = vrot.lane.b32.xlu0 %v6256_v45, %s6706_s4  ;;  %10989 = vst [vmem:[#allocation33_spill] sm:$0xff] %v8688_v20  ;;  %v8692_v30 = vpop.eup %6271  ;;  %v2833_v45 = vadd.f32 1.0, %v6266_v7  ;;  %6293 = vrcp.f32 %v2831_v29  ;;  %v3465_v15 = vmul.f32 %v8688_v20, %v3274_v2 }
 0x321   :  { %v3284_v4 = vpop.permute.xlu1 %3283  ;;  %10990 = vst [vmem:[#allocation19_spill] sm:$0xff] %v8692_v30  ;;  %v6274_v42 = vpop.eup %6273  ;;  %v3466_v54 = vmul.f32 %v8692_v30, %v3276_v60  ;;  %6295 = vrcp.f32 %v2832_v27 }
 0x322   :  { %v3282_v25 = vpop.permute.xlu0 %3281  ;;  %v6276_v37 = vpop.eup %6275  ;;  %6297 = vpow2.f32 %v5583_v59  ;;  %v2835_v0 = vadd.f32 1.0, %v6274_v42 }
 0x323   :  { %3399 = vrot.lane.b32.xlu1 %v6264_v63, %s6706_s4  ;;  %v2834_v63 = vadd.f32 1.0, %v6268_v47  ;;  %v8697_v53 = vpop.eup %6277  ;;  %6299 = vpow2.f32 %v5584_v55  ;;  %v2836_v27 = vadd.f32 1.0, %v6276_v37  ;;  %v5588_v55 = vmul.f32 -1.442695, %v8379_v11 }
 0x324   :  { %3397 = vrot.lane.b32.xlu0 %v6258_v26, %s6706_s4  ;;  %10991 = vst [vmem:[#allocation20_spill] sm:$0xff] %v8697_v53  ;;  %v5585_v26 = vmul.f32 -1.442695, %v8367_v6  ;;  %v8702_v9 = vpop.eup %6279  ;;  %6301 = vrcp.f32 %v2833_v45  ;;  %v3467_v7 = vmul.f32 %v8697_v53, %v8677_v48 }
 0x325   :  { %v3288_v14 = vpop.permute.xlu1 %3287  ;;  %10992 = vst [vmem:[#allocation24_spill] sm:$0xff] %v8702_v9  ;;  %v6282_v60 = vpop.eup %6281  ;;  %v3468_v29 = vmul.f32 %v8702_v9, %v3280_v8  ;;  %6303 = vrcp.f32 %v2834_v63 }
 0x326   :  { %v3286_v10 = vpop.permute.xlu0 %3285  ;;  %v6284_v47 = vpop.eup %6283  ;;  %6305 = vpow2.f32 %v5585_v26  ;;  %v2837_v42 = vadd.f32 1.0, %v6282_v60 }
 0x327   :  { %3595 = vrot.lane.b32.xlu1 %v3466_v54, %s6706_s4  ;;  %v8708_v59 = vpop.eup %6285  ;;  %6307 = vpow2.f32 %v5586_v49  ;;  %v2838_v63 = vadd.f32 1.0, %v6284_v47  ;;  %v5590_v49 = vmul.f32 -1.442695, %v8387_v61 }
 0x328   :  { %3593 = vrot.lane.b32.xlu0 %v3465_v15, %s6706_s4  ;;  %10993 = vst [vmem:[#allocation22_spill] sm:$0xff] %v8708_v59  ;;  %v5587_v15 = vmul.f32 -1.442695, %v8375_v36  ;;  %v8713_v17 = vpop.eup %6287  ;;  %6309 = vrcp.f32 %v2835_v0  ;;  %v3469_v54 = vmul.f32 %v8708_v59, %v3282_v25 }
 0x329   :  { %v3292_v2 = vpop.permute.xlu1 %3291  ;;  %10994 = vst [vmem:[#allocation26_spill] sm:$0xff] %v8713_v17  ;;  %v6290_v8 = vpop.eup %6289  ;;  %v3470_v45 = vmul.f32 %v8713_v17, %v3284_v4  ;;  %6311 = vrcp.f32 %v2836_v27 }
 0x32a   :  { %v3290_v6 = vpop.permute.xlu0 %3289  ;;  %v6292_v36 = vpop.eup %6291  ;;  %6313 = vpow2.f32 %v5587_v15  ;;  %v2839_v60 = vadd.f32 1.0, %v6290_v8 }
 0x32b   :  { %3599 = vrot.lane.b32.xlu1 %v3468_v29, %s6706_s4  ;;  %v8718_v26 = vpop.eup %6293  ;;  %6315 = vpow2.f32 %v5588_v55  ;;  %v2840_v27 = vadd.f32 1.0, %v6292_v36  ;;  %v5592_v55 = vmul.f32 -1.442695, %v8395_v24 }
 0x32c   :  { %3597 = vrot.lane.b32.xlu0 %v3467_v7, %s6706_s4  ;;  %10995 = vst [vmem:[#allocation25_spill] sm:$0xff] %v8718_v26  ;;  %v5589_v7 = vmul.f32 -1.442695, %v8383_v28  ;;  %v8723_v11 = vpop.eup %6295  ;;  %6317 = vrcp.f32 %v2837_v42  ;;  %v3471_v29 = vmul.f32 %v8718_v26, %v3286_v10 }
 0x32d   :  { %v3296_v48 = vpop.permute.xlu1 %3295  ;;  %10996 = vst [vmem:[#allocation27_spill] sm:$0xff] %v8723_v11  ;;  %v6298_v25 = vpop.eup %6297  ;;  %v3472_v0 = vmul.f32 %v8723_v11, %v3288_v14  ;;  %6319 = vrcp.f32 %v2838_v63 }
 0x32e   :  { %v3294_v37 = vpop.permute.xlu0 %3293  ;;  %v6300_v28 = vpop.eup %6299  ;;  %6321 = vpow2.f32 %v5589_v7  ;;  %v2841_v8 = vadd.f32 1.0, %v6298_v25 }
 0x32f   :  { %3603 = vrot.lane.b32.xlu1 %v3470_v45, %s6706_s4  ;;  %v8728_v15 = vpop.eup %6301  ;;  %v5591_v45 = vmul.f32 -1.442695, %v8391_v52  ;;  %6323 = vpow2.f32 %v5590_v49  ;;  %v2842_v63 = vadd.f32 1.0, %v6300_v28  ;;  %v5594_v49 = vmul.f32 -1.442695, %v8403_v13 }
 0x330   :  { %3601 = vrot.lane.b32.xlu0 %v3469_v54, %s6706_s4  ;;  %10997 = vst [vmem:[#allocation9_spill] sm:$0xff] %v8728_v15  ;;  %v8733_v61 = vpop.eup %6303  ;;  %6325 = vrcp.f32 %v2839_v60  ;;  %v3473_v54 = vmul.f32 %v8728_v15, %v3290_v6 }
 0x331   :  { %v3300_v4 = vpop.permute.xlu1 %3299  ;;  %10998 = vst [vmem:[#allocation11_spill] sm:$0xff] %v8733_v61  ;;  %v6306_v10 = vpop.eup %6305  ;;  %v3474_v42 = vmul.f32 %v8733_v61, %v3292_v2  ;;  %6327 = vrcp.f32 %v2840_v27 }
 0x332   :  { %v3298_v47 = vpop.permute.xlu0 %3297  ;;  %v6308_v52 = vpop.eup %6307  ;;  %6329 = vpow2.f32 %v5591_v45  ;;  %v2843_v25 = vadd.f32 1.0, %v6306_v10 }
 0x333   :  { %3607 = vrot.lane.b32.xlu1 %v3472_v0, %s6706_s4  ;;  %v8738_v7 = vpop.eup %6309  ;;  %v5593_v0 = vmul.f32 -1.442695, %v8399_v34  ;;  %6331 = vpow2.f32 %v5592_v55  ;;  %v2844_v27 = vadd.f32 1.0, %v6308_v52  ;;  %v5596_v55 = vmul.f32 -1.442695, %v8411_v58 }
 0x334   :  { %3605 = vrot.lane.b32.xlu0 %v3471_v29, %s6706_s4  ;;  %10999 = vst [vmem:[#allocation10_spill] sm:$0xff] %v8738_v7  ;;  %v8743_v24 = vpop.eup %6311  ;;  %6333 = vrcp.f32 %v2841_v8  ;;  %v3475_v29 = vmul.f32 %v8738_v7, %v3294_v37 }
 0x335   :  { %v3304_v14 = vpop.permute.xlu1 %3303  ;;  %11000 = vst [vmem:[#allocation12_spill] sm:$0xff] %v8743_v24  ;;  %v6314_v6 = vpop.eup %6313  ;;  %v3476_v60 = vmul.f32 %v8743_v24, %v3296_v48  ;;  %6335 = vrcp.f32 %v2842_v63 }
 0x336   :  { %v3302_v36 = vpop.permute.xlu0 %3301  ;;  %v6316_v34 = vpop.eup %6315  ;;  %6337 = vpow2.f32 %v5593_v0  ;;  %v2845_v10 = vadd.f32 1.0, %v6314_v6 }
 0x337   :  { %3611 = vrot.lane.b32.xlu1 %v3474_v42, %s6706_s4  ;;  %v8748_v45 = vpop.eup %6317  ;;  %v5595_v42 = vmul.f32 -1.442695, %v8407_v5  ;;  %6339 = vpow2.f32 %v5594_v49  ;;  %v2846_v63 = vadd.f32 1.0, %v6316_v34  ;;  %v5598_v49 = vmul.f32 -1.442695, %v8419_v50 }
 0x338   :  { %3609 = vrot.lane.b32.xlu0 %v3473_v54, %s6706_s4  ;;  %11001 = vst [vmem:[#allocation29_spill] sm:$0xff] %v8748_v45  ;;  %v8753_v13 = vpop.eup %6319  ;;  %6341 = vrcp.f32 %v2843_v25  ;;  %v3477_v54 = vmul.f32 %v8748_v45, %v3298_v47 }
 0x339   :  { %v3308_v2 = vpop.permute.xlu1 %3307  ;;  %11002 = vst [vmem:[#allocation18_spill] sm:$0xff] %v8753_v13  ;;  %v6322_v37 = vpop.eup %6321  ;;  %v3478_v8 = vmul.f32 %v8753_v13, %v3300_v4  ;;  %6343 = vrcp.f32 %v2844_v27 }
 0x33a   :  { %v3306_v28 = vpop.permute.xlu0 %3305  ;;  %v6324_v5 = vpop.eup %6323  ;;  %6345 = vpow2.f32 %v5595_v42  ;;  %v2847_v6 = vadd.f32 1.0, %v6322_v37 }
 0x33b   :  { %3615 = vrot.lane.b32.xlu1 %v3476_v60, %s6706_s4  ;;  %v8758_v0 = vpop.eup %6325  ;;  %v5597_v60 = vmul.f32 -1.442695, %v8415_v3  ;;  %6347 = vpow2.f32 %v5596_v55  ;;  %v2848_v27 = vadd.f32 1.0, %v6324_v5  ;;  %v5600_v55 = vmul.f32 -1.442695, %v8427_v38 }
 0x33c   :  { %3613 = vrot.lane.b32.xlu0 %v3475_v29, %s6706_s4  ;;  %11003 = vst [vmem:[#allocation30_spill] sm:$0xff] %v8758_v0  ;;  %v8763_v58 = vpop.eup %6327  ;;  %6349 = vrcp.f32 %v2845_v10  ;;  %v3479_v29 = vmul.f32 %v8758_v0, %v3302_v36 }
 0x33d   :  { %v3312_v48 = vpop.permute.xlu1 %3311  ;;  %11004 = vst [vmem:[#allocation34_spill] sm:$0xff] %v8763_v58  ;;  %v6330_v47 = vpop.eup %6329  ;;  %v3480_v25 = vmul.f32 %v8763_v58, %v3304_v14  ;;  %6351 = vrcp.f32 %v2846_v63 }
 0x33e   :  { %v3310_v52 = vpop.permute.xlu0 %3309  ;;  %v6332_v3 = vpop.eup %6331  ;;  %6353 = vpow2.f32 %v5597_v60  ;;  %v2849_v37 = vadd.f32 1.0, %v6330_v47 }
 0x33f   :  { %3619 = vrot.lane.b32.xlu1 %v3478_v8, %s6706_s4  ;;  %v8768_v42 = vpop.eup %6333  ;;  %v5599_v8 = vmul.f32 -1.442695, %v8423_v22  ;;  %6355 = vpow2.f32 %v5598_v49  ;;  %v2850_v63 = vadd.f32 1.0, %v6332_v3  ;;  %v5602_v49 = vmul.f32 -1.442695, %v8435_v18 }
 0x340   :  { %3617 = vrot.lane.b32.xlu0 %v3477_v54, %s6706_s4  ;;  %11005 = vst [vmem:[#allocation35_spill] sm:$0xff] %v8768_v42  ;;  %v8773_v50 = vpop.eup %6335  ;;  %6357 = vrcp.f32 %v2847_v6  ;;  %v3481_v54 = vmul.f32 %v8768_v42, %v3306_v28 }
 0x341   :  { %v3316_v4 = vpop.permute.xlu1 %3315  ;;  %11006 = vst [vmem:[#allocation36_spill] sm:$0xff] %v8773_v50  ;;  %v6338_v36 = vpop.eup %6337  ;;  %v3482_v10 = vmul.f32 %v8773_v50, %v3308_v2  ;;  %6359 = vrcp.f32 %v2848_v27 }
 0x342   :  { %v3314_v34 = vpop.permute.xlu0 %3313  ;;  %v6340_v22 = vpop.eup %6339  ;;  %6361 = vpow2.f32 %v5599_v8  ;;  %v2851_v47 = vadd.f32 1.0, %v6338_v36 }
 0x343   :  { %3623 = vrot.lane.b32.xlu1 %v3480_v25, %s6706_s4  ;;  %v8778_v60 = vpop.eup %6341  ;;  %v5601_v25 = vmul.f32 -1.442695, %v8431_v56  ;;  %6363 = vpow2.f32 %v5600_v55  ;;  %v2852_v27 = vadd.f32 1.0, %v6340_v22  ;;  %v5604_v55 = vmul.f32 -1.442695, %v8443_v62 }
 0x344   :  { %3621 = vrot.lane.b32.xlu0 %v3479_v29, %s6706_s4  ;;  %11007 = vst [vmem:[#allocation37_spill] sm:$0xff] %v8778_v60  ;;  %v8783_v38 = vpop.eup %6343  ;;  %6365 = vrcp.f32 %v2849_v37  ;;  %v3483_v29 = vmul.f32 %v8778_v60, %v3310_v52 }
 0x345   :  { %v3320_v14 = vpop.permute.xlu1 %3319  ;;  %11008 = vst [vmem:[#allocation38_spill] sm:$0xff] %v8783_v38  ;;  %v6346_v28 = vpop.eup %6345  ;;  %v3484_v6 = vmul.f32 %v8783_v38, %v3312_v48  ;;  %6367 = vrcp.f32 %v2850_v63 }
 0x346   :  { %v3318_v5 = vpop.permute.xlu0 %3317  ;;  %v6348_v56 = vpop.eup %6347  ;;  %6369 = vpow2.f32 %v5601_v25  ;;  %v2853_v36 = vadd.f32 1.0, %v6346_v28 }
 0x347   :  { %3627 = vrot.lane.b32.xlu1 %v3482_v10, %s6706_s4  ;;  %v8788_v8 = vpop.eup %6349  ;;  %v5603_v10 = vmul.f32 -1.442695, %v8439_v41  ;;  %6371 = vpow2.f32 %v5602_v49  ;;  %v2854_v63 = vadd.f32 1.0, %v6348_v56  ;;  %v5606_v49 = vmul.f32 -1.442695, %v8451_v57 }
 0x348   :  { %3625 = vrot.lane.b32.xlu0 %v3481_v54, %s6706_s4  ;;  %11009 = vst [vmem:[#allocation39_spill] sm:$0xff] %v8788_v8  ;;  %v8793_v18 = vpop.eup %6351  ;;  %6373 = vrcp.f32 %v2851_v47  ;;  %v3485_v54 = vmul.f32 %v8788_v8, %v3314_v34 }
 0x349   :  { %v3324_v2 = vpop.permute.xlu1 %3323  ;;  %11010 = vst [vmem:[#allocation40_spill] sm:$0xff] %v8793_v18  ;;  %v6354_v52 = vpop.eup %6353  ;;  %v3486_v37 = vmul.f32 %v8793_v18, %v3316_v4  ;;  %6375 = vrcp.f32 %v2852_v27 }
 0x34a   :  { %v3322_v3 = vpop.permute.xlu0 %3321  ;;  %v6356_v41 = vpop.eup %6355  ;;  %6377 = vpow2.f32 %v5603_v10  ;;  %v2855_v28 = vadd.f32 1.0, %v6354_v52 }
 0x34b   :  { %3631 = vrot.lane.b32.xlu1 %v3484_v6, %s6706_s4  ;;  %v8798_v25 = vpop.eup %6357  ;;  %v5605_v6 = vmul.f32 -1.442695, %v8447_v16  ;;  %6379 = vpow2.f32 %v5604_v55  ;;  %v2856_v27 = vadd.f32 1.0, %v6356_v41  ;;  %v5608_v55 = vmul.f32 -1.442695, %v8459_v35 }
 0x34c   :  { %3629 = vrot.lane.b32.xlu0 %v3483_v29, %s6706_s4  ;;  %11011 = vst [vmem:[#allocation41_spill] sm:$0xff] %v8798_v25  ;;  %v8803_v62 = vpop.eup %6359  ;;  %6381 = vrcp.f32 %v2853_v36  ;;  %v3487_v29 = vmul.f32 %v8798_v25, %v3318_v5 }
 0x34d   :  { %v3328_v48 = vpop.permute.xlu1 %3327  ;;  %11012 = vst [vmem:[#allocation42_spill] sm:$0xff] %v8803_v62  ;;  %v6362_v34 = vpop.eup %6361  ;;  %v3488_v47 = vmul.f32 %v8803_v62, %v3320_v14  ;;  %6383 = vrcp.f32 %v2854_v63 }
 0x34e   :  { %v3326_v22 = vpop.permute.xlu0 %3325  ;;  %v6364_v16 = vpop.eup %6363  ;;  %6385 = vpow2.f32 %v5605_v6  ;;  %v2857_v52 = vadd.f32 1.0, %v6362_v34 }
 0x34f   :  { %3635 = vrot.lane.b32.xlu1 %v3486_v37, %s6706_s4  ;;  %v8808_v10 = vpop.eup %6365  ;;  %v5607_v37 = vmul.f32 -1.442695, %v8455_v19  ;;  %6387 = vpow2.f32 %v5606_v49  ;;  %v2858_v63 = vadd.f32 1.0, %v6364_v16  ;;  %v11017_v49 = vld [vmem:[#allocation13_spill] sm:$0xff] }
 0x350   :  { %3633 = vrot.lane.b32.xlu0 %v3485_v54, %s6706_s4  ;;  %11013 = vst [vmem:[#allocation43_spill] sm:$0xff] %v8808_v10  ;;  %v8813_v57 = vpop.eup %6367  ;;  %6389 = vrcp.f32 %v2855_v28  ;;  %v3489_v54 = vmul.f32 %v8808_v10, %v3322_v3  ;;  %v5610_v34 = vmul.f32 -1.442695, %v11017_v49 }
 0x351   :  { %v3332_v4 = vpop.permute.xlu1 %3331  ;;  %11014 = vst [vmem:[#allocation44_spill] sm:$0xff] %v8813_v57  ;;  %v6370_v5 = vpop.eup %6369  ;;  %v3490_v36 = vmul.f32 %v8813_v57, %v3324_v2  ;;  %6391 = vrcp.f32 %v2856_v27 }
 0x352   :  { %v3330_v56 = vpop.permute.xlu0 %3329  ;;  %v6372_v19 = vpop.eup %6371  ;;  %6393 = vpow2.f32 %v5607_v37  ;;  %v2859_v28 = vadd.f32 1.0, %v6370_v5  ;;  %v5612_v5 = vmul.f32 -1.442695, %v8475_v51 }
 0x353   :  { %3639 = vrot.lane.b32.xlu1 %v3488_v47, %s6706_s4  ;;  %v8818_v6 = vpop.eup %6373  ;;  %v5609_v47 = vmul.f32 -1.442695, %v8463_v23  ;;  %6395 = vpow2.f32 %v5608_v55  ;;  %v2860_v37 = vadd.f32 1.0, %v6372_v19 }
 0x354   :  { %3637 = vrot.lane.b32.xlu0 %v3487_v29, %s6706_s4  ;;  %11015 = vst [vmem:[#allocation45_spill] sm:$0xff] %v8818_v6  ;;  %v8823_v35 = vpop.eup %6375  ;;  %6397 = vrcp.f32 %v2857_v52  ;;  %v3491_v16 = vmul.f32 %v8818_v6, %v3326_v22 }
 0x355   :  { %v3336_v14 = vpop.permute.xlu1 %3335  ;;  %11016 = vst [vmem:[#allocation46_spill] sm:$0xff] %v8823_v35  ;;  %v6378_v3 = vpop.eup %6377  ;;  %v3492_v29 = vmul.f32 %v8823_v35, %v3328_v48  ;;  %6399 = vrcp.f32 %v2858_v63 }
 0x356   :  { %v3334_v41 = vpop.permute.xlu0 %3333  ;;  %v6380_v23 = vpop.eup %6379  ;;  %6401 = vpow2.f32 %v5609_v47  ;;  %v2861_v52 = vadd.f32 1.0, %v6378_v3 }
 0x357   :  { %3643 = vrot.lane.b32.xlu1 %v3490_v36, %s6706_s4  ;;  %v8828_v36 = vpop.eup %6381  ;;  %6403 = vpow2.f32 %v5610_v34  ;;  %v2862_v47 = vadd.f32 1.0, %v6380_v23  ;;  %v11022_v34 = vld [vmem:[#allocation15_spill] sm:$0xff] }
 0x358   :  { %3641 = vrot.lane.b32.xlu0 %v3489_v54, %s6706_s4  ;;  %11018 = vst [vmem:[#allocation13_spill] sm:$0xff] %v8828_v36  ;;  %v5611_v54 = vmul.f32 -1.442695, %v8471_v31  ;;  %v8833_v55 = vpop.eup %6383  ;;  %6405 = vrcp.f32 %v2859_v28  ;;  %v3493_v63 = vmul.f32 %v8828_v36, %v3330_v56  ;;  %v5614_v3 = vmul.f32 -1.442695, %v11022_v34 }
 0x359   :  { %v3340_v2 = vpop.permute.xlu1 %3339  ;;  %11019 = vst [vmem:[#allocation47_spill] sm:$0xff] %v8833_v55  ;;  %v6386_v22 = vpop.eup %6385  ;;  %v3494_v19 = vmul.f32 %v8833_v55, %v3332_v4  ;;  %6407 = vrcp.f32 %v2860_v37 }
 0x35a   :  { %v3338_v27 = vpop.permute.xlu0 %3337  ;;  %v6388_v31 = vpop.eup %6387  ;;  %6409 = vpow2.f32 %v5611_v54  ;;  %v2863_v28 = vadd.f32 1.0, %v6386_v22  ;;  %v11025_v22 = vld [vmem:[#allocation16_spill] sm:$0xff] }
 0x35b   :  { %3647 = vrot.lane.b32.xlu1 %v3492_v29, %s6706_s4  ;;  %v8838_v29 = vpop.eup %6389  ;;  %6411 = vpow2.f32 %v5612_v5  ;;  %v2864_v54 = vadd.f32 1.0, %v6388_v31 }
 0x35c   :  { %3645 = vrot.lane.b32.xlu0 %v3491_v16, %s6706_s4  ;;  %11020 = vst [vmem:[#allocation48_spill] sm:$0xff] %v8838_v29  ;;  %v5613_v16 = vmul.f32 -1.442695, %v10983_v21  ;;  %v8843_v51 = vpop.eup %6391  ;;  %6413 = vrcp.f32 %v2861_v52  ;;  %v3495_v37 = vmul.f32 %v8838_v29, %v3334_v41  ;;  %v5616_v52 = vmul.f32 -1.442695, %v11025_v22 }
 0x35d   :  { %v3344_v48 = vpop.permute.xlu1 %3343  ;;  %11021 = vst [vmem:[#allocation49_spill] sm:$0xff] %v8843_v51  ;;  %v6394_v56 = vpop.eup %6393  ;;  %v3496_v23 = vmul.f32 %v8843_v51, %v3336_v14  ;;  %6415 = vrcp.f32 %v2862_v47 }
 0x35e   :  { %v3342_v49 = vpop.permute.xlu0 %3341  ;;  %v6396_v21 = vpop.eup %6395  ;;  %6417 = vpow2.f32 %v5613_v16  ;;  %v2865_v34 = vadd.f32 1.0, %v6394_v56  ;;  %v11029_v56 = vld [vmem:[#allocation28_spill] sm:$0xff] }
 0x35f   :  { %3651 = vrot.lane.b32.xlu1 %v3494_v19, %s6706_s4  ;;  %v8848_v19 = vpop.eup %6397  ;;  %6419 = vpow2.f32 %v5614_v3  ;;  %v2866_v16 = vadd.f32 1.0, %v6396_v21 }
 0x360   :  { %3649 = vrot.lane.b32.xlu0 %v3493_v63, %s6706_s4  ;;  %11023 = vst [vmem:[#allocation15_spill] sm:$0xff] %v8848_v19  ;;  %v5615_v63 = vmul.f32 -1.442695, %v8487_v1  ;;  %v8853_v5 = vpop.eup %6399  ;;  %6421 = vrcp.f32 %v2863_v28  ;;  %v3497_v47 = vmul.f32 %v8848_v19, %v3338_v27  ;;  %v5618_v28 = vmul.f32 -1.442695, %v11029_v56 }
 0x361   :  { %v3348_v4 = vpop.permute.xlu1 %3347  ;;  %11024 = vst [vmem:[#allocation50_spill] sm:$0xff] %v8853_v5  ;;  %v6402_v41 = vpop.eup %6401  ;;  %v3498_v31 = vmul.f32 %v8853_v5, %v3340_v2  ;;  %6423 = vrcp.f32 %v2864_v54 }
 0x362   :  { %v3346_v36 = vpop.permute.xlu0 %3345  ;;  %v6404_v1 = vpop.eup %6403  ;;  %6425 = vpow2.f32 %v5615_v63  ;;  %v2867_v22 = vadd.f32 1.0, %v6402_v41  ;;  %v11032_v41 = vld [vmem:[#allocation17_spill] sm:$0xff] }
 0x363   :  { %3655 = vrot.lane.b32.xlu1 %v3496_v23, %s6706_s4  ;;  %v8858_v23 = vpop.eup %6405  ;;  %6427 = vpow2.f32 %v5616_v52  ;;  %v2868_v63 = vadd.f32 1.0, %v6404_v1 }
 0x364   :  { %3653 = vrot.lane.b32.xlu0 %v3495_v37, %s6706_s4  ;;  %11026 = vst [vmem:[#allocation16_spill] sm:$0xff] %v8858_v23  ;;  %v11027_v37 = vld [vmem:[#allocation14_spill] sm:$0xff]  ;;  %v8863_v3 = vpop.eup %6407  ;;  %6429 = vrcp.f32 %v2865_v34  ;;  %v3499_v54 = vmul.f32 %v8858_v23, %v3342_v49  ;;  %v5620_v34 = vmul.f32 -1.442695, %v11032_v41 }
 0x365   :  { %v3352_v14 = vpop.permute.xlu1 %3351  ;;  %v5617_v51 = vmul.f32 -1.442695, %v11027_v37  ;;  %11028 = vst [vmem:[#allocation14_spill] sm:$0xff] %v8863_v3  ;;  %v6410_v27 = vpop.eup %6409  ;;  %v3500_v21 = vmul.f32 %v8863_v3, %v3344_v48  ;;  %6431 = vrcp.f32 %v2866_v16 }
 0x366   :  { %v3350_v29 = vpop.permute.xlu0 %3349  ;;  %v6412_v37 = vpop.eup %6411  ;;  %v2869_v56 = vadd.f32 1.0, %v6410_v27  ;;  %v5622_v27 = vmul.f32 -1.442695, %v10987_v43 }
 0x367   :  { %3659 = vrot.lane.b32.xlu1 %v3498_v31, %s6706_s4  ;;  %v8868_v31 = vpop.eup %6413  ;;  %6433 = vpow2.f32 %v5617_v51  ;;  %v2870_v51 = vadd.f32 1.0, %v6412_v37 }
 0x368   :  { %3657 = vrot.lane.b32.xlu0 %v3497_v47, %s6706_s4  ;;  %11030 = vst [vmem:[#allocation28_spill] sm:$0xff] %v8868_v31  ;;  %v5619_v47 = vmul.f32 -1.442695, %v10985_v46  ;;  %v8873_v52 = vpop.eup %6415  ;;  %6435 = vpow2.f32 %v5618_v28  ;;  %v3501_v16 = vmul.f32 %v8868_v31, %v3346_v36 }
 0x369   :  { %v3356_v2 = vpop.permute.xlu1 %3355  ;;  %11031 = vst [vmem:[#allocation51_spill] sm:$0xff] %v8873_v52  ;;  %v6418_v49 = vpop.eup %6417  ;;  %6437 = vrcp.f32 %v2867_v22  ;;  %v3502_v1 = vmul.f32 %v8873_v52, %v3348_v4 }
 0x36a   :  { %v3354_v19 = vpop.permute.xlu0 %3353  ;;  %v6420_v46 = vpop.eup %6419  ;;  %6439 = vrcp.f32 %v2868_v63  ;;  %v2871_v22 = vadd.f32 1.0, %v6418_v49 }
 0x36b   :  { %3663 = vrot.lane.b32.xlu1 %v3500_v21, %s6706_s4  ;;  %v8878_v21 = vpop.eup %6421  ;;  %6441 = vpow2.f32 %v5619_v47  ;;  %v2872_v47 = vadd.f32 1.0, %v6420_v46 }
 0x36c   :  { %3661 = vrot.lane.b32.xlu0 %v3499_v54, %s6706_s4  ;;  %11033 = vst [vmem:[#allocation17_spill] sm:$0xff] %v8878_v21  ;;  %v5621_v54 = vmul.f32 -1.442695, %v8511_v12  ;;  %v8883_v28 = vpop.eup %6423  ;;  %6443 = vpow2.f32 %v5620_v34  ;;  %v3503_v63 = vmul.f32 %v8878_v21, %v3350_v29  ;;  %v5624_v34 = vmul.f32 -1.442695, %v8523_v39 }
 0x36d   :  { %v3360_v48 = vpop.permute.xlu1 %3359  ;;  %11034 = vst [vmem:[#allocation52_spill] sm:$0xff] %v8883_v28  ;;  %v6426_v36 = vpop.eup %6425  ;;  %6445 = vrcp.f32 %v2869_v56  ;;  %v3504_v37 = vmul.f32 %v8883_v28, %v3352_v14 }
 0x36e   :  { %v3358_v23 = vpop.permute.xlu0 %3357  ;;  %v6428_v12 = vpop.eup %6427  ;;  %6447 = vrcp.f32 %v2870_v51  ;;  %v2873_v49 = vadd.f32 1.0, %v6426_v36 }
 0x36f   :  { %3667 = vrot.lane.b32.xlu1 %v3502_v1, %s6706_s4  ;;  %v8888_v1 = vpop.eup %6429  ;;  %6449 = vpow2.f32 %v5621_v54  ;;  %v2874_v54 = vadd.f32 1.0, %v6428_v12 }
 0x370   :  { %3665 = vrot.lane.b32.xlu0 %v3501_v16, %s6706_s4  ;;  %11035 = vst [vmem:[#allocation53_spill] sm:$0xff] %v8888_v1  ;;  %v5623_v16 = vmul.f32 -1.442695, %v10988_v40  ;;  %v8893_v43 = vpop.eup %6431  ;;  %6451 = vpow2.f32 %v5622_v27  ;;  %v3505_v46 = vmul.f32 %v8888_v1, %v3354_v19  ;;  %v5626_v27 = vmul.f32 -1.442695, %v8529_v44 }
 0x371   :  { %v3364_v4 = vpop.permute.xlu1 %3363  ;;  %11036 = vst [vmem:[#allocation54_spill] sm:$0xff] %v8893_v43  ;;  %v6434_v29 = vpop.eup %6433  ;;  %6453 = vrcp.f32 %v2871_v22  ;;  %v3506_v56 = vmul.f32 %v8893_v43, %v3356_v2 }
 0x372   :  { %v3362_v41 = vpop.permute.xlu0 %3361  ;;  %v6436_v40 = vpop.eup %6435  ;;  %6455 = vrcp.f32 %v2872_v47  ;;  %v2875_v36 = vadd.f32 1.0, %v6434_v29 }
 0x373   :  { %3671 = vrot.lane.b32.xlu1 %v3504_v37, %s6706_s4  ;;  %v8898_v37 = vpop.eup %6437  ;;  %6457 = vpow2.f32 %v5623_v16  ;;  %v2876_v16 = vadd.f32 1.0, %v6436_v40 }
 0x374   :  { %3669 = vrot.lane.b32.xlu0 %v3503_v63, %s6706_s4  ;;  %11037 = vst [vmem:[#allocation55_spill] sm:$0xff] %v8898_v37  ;;  %v5625_v63 = vmul.f32 -1.442695, %v8526_v32  ;;  %v8903_v39 = vpop.eup %6439  ;;  %6459 = vpow2.f32 %v5624_v34  ;;  %v3507_v12 = vmul.f32 %v8898_v37, %v3358_v23  ;;  %v5627_v34 = vmul.f32 -1.442695, %v8533_v33 }
 0x375   :  { %v3368_v14 = vpop.permute.xlu1 %3367  ;;  %11038 = vst [vmem:[#allocation56_spill] sm:$0xff] %v8903_v39  ;;  %v6442_v19 = vpop.eup %6441  ;;  %6461 = vrcp.f32 %v2873_v49  ;;  %v3508_v22 = vmul.f32 %v8903_v39, %v3360_v48 }
 0x376   :  { %v3366_v51 = vpop.permute.xlu0 %3365  ;;  %v6444_v32 = vpop.eup %6443  ;;  %6463 = vrcp.f32 %v2874_v54  ;;  %v2877_v29 = vadd.f32 1.0, %v6442_v19 }
 0x377   :  { %3675 = vrot.lane.b32.xlu1 %v3506_v56, %s6706_s4  ;;  %v8908_v56 = vpop.eup %6445  ;;  %6465 = vpow2.f32 %v5625_v63  ;;  %v2878_v63 = vadd.f32 1.0, %v6444_v32 }
 0x378   :  { %3673 = vrot.lane.b32.xlu0 %v3505_v46, %s6706_s4  ;;  %11039 = vst [vmem:[#allocation57_spill] sm:$0xff] %v8908_v56  ;;  %v11040_v46 = vld [vmem:[#allocation23_spill] sm:$0xff]  ;;  %v8913_v44 = vpop.eup %6447  ;;  %6467 = vpow2.f32 %v5626_v27  ;;  %v3509_v40 = vmul.f32 %v8908_v56, %v3362_v41  ;;  %v11045_v27 = vld [vmem:[#allocation32_spill] sm:$0xff] }
 0x379   :  { %v3372_v2 = vpop.permute.xlu1 %3371  ;;  %v5628_v1 = vmul.f32 -1.442695, %v11040_v46  ;;  %11041 = vst [vmem:[#allocation23_spill] sm:$0xff] %v8913_v44  ;;  %v6450_v23 = vpop.eup %6449  ;;  %6469 = vrcp.f32 %v2875_v36  ;;  %v3510_v49 = vmul.f32 %v8913_v44, %v3364_v4  ;;  %v5630_v19 = vmul.f32 -1.442695, %v11045_v27 }
 0x37a   :  { %v3370_v47 = vpop.permute.xlu0 %3369  ;;  %v6452_v46 = vpop.eup %6451  ;;  %6471 = vrcp.f32 %v2876_v16  ;;  %v2879_v36 = vadd.f32 1.0, %v6450_v23 }
 0x37b   :  { %3679 = vrot.lane.b32.xlu1 %v3508_v22, %s6706_s4  ;;  %v8918_v22 = vpop.eup %6453  ;;  %6473 = vpow2.f32 %v5628_v1 }
 0x37c   :  { %3677 = vrot.lane.b32.xlu0 %v3507_v12, %s6706_s4  ;;  %11042 = vst [vmem:[#allocation58_spill] sm:$0xff] %v8918_v22  ;;  %v11043_v12 = vld [vmem:[#allocation31_spill] sm:$0xff]  ;;  %v8923_v33 = vpop.eup %6455  ;;  %6475 = vpow2.f32 %v5627_v34  ;;  %v3511_v16 = vmul.f32 %v8918_v22, %v3366_v51 }
 0x37d   :  { %v3376_v48 = vpop.permute.xlu1 %3375  ;;  %v5629_v37 = vmul.f32 -1.442695, %v11043_v12  ;;  %11044 = vst [vmem:[#allocation31_spill] sm:$0xff] %v8923_v33  ;;  %v6458_v41 = vpop.eup %6457  ;;  %6477 = vrcp.f32 %v2877_v29  ;;  %v3512_v32 = vmul.f32 %v8923_v33, %v3368_v14  ;;  %v2880_v12 = vadd.f32 1.0, %v6452_v46 }
 0x37e   :  { %v3374_v54 = vpop.permute.xlu0 %3373  ;;  %v6460_v56 = vpop.eup %6459  ;;  %6479 = vrcp.f32 %v2878_v63 }
 0x37f   :  { %3683 = vrot.lane.b32.xlu1 %v3510_v49, %s6706_s4  ;;  %v8928_v49 = vpop.eup %6461  ;;  %6481 = vpow2.f32 %v5629_v37  ;;  %v2882_v27 = vadd.f32 1.0, %v6460_v56 }
 0x380   :  { %3681 = vrot.lane.b32.xlu0 %v3509_v40, %s6706_s4  ;;  %11046 = vst [vmem:[#allocation32_spill] sm:$0xff] %v8928_v49  ;;  %v8932_v34 = vpop.eup %6463  ;;  %6483 = vpow2.f32 %v5630_v19  ;;  %v2881_v40 = vadd.f32 1.0, %v6458_v41  ;;  %v3513_v51 = vmul.f32 %v8928_v49, %v3370_v47 }
 0x381   :  { %v3380_v4 = vpop.permute.xlu1 %3379  ;;  %11047 = vst [vmem:[#allocation59_spill] sm:$0xff] %v8932_v34  ;;  %v6466_v29 = vpop.eup %6465  ;;  %6485 = vrcp.f32 %v2879_v36  ;;  %v3514_v14 = vmul.f32 %v8932_v34, %v3372_v2 }
 0x382   :  { %v3378_v1 = vpop.permute.xlu0 %3377  ;;  %v6468_v63 = vpop.eup %6467  ;;  %6487 = vrcp.f32 %v2880_v12  ;;  %v2883_v41 = vadd.f32 1.0, %v6466_v29 }
 0x383   :  { %3687 = vrot.lane.b32.xlu1 %v3512_v32, %s6706_s4  ;;  %v8936_v37 = vpop.eup %6469  ;;  %6489 = vrcp.f32 %v2881_v40  ;;  %v2884_v56 = vadd.f32 1.0, %v6468_v63 }
 0x384   :  { %3685 = vrot.lane.b32.xlu0 %v3511_v16, %s6706_s4  ;;  %11048 = vst [vmem:[#allocation60_spill] sm:$0xff] %v8936_v37  ;;  %v8940_v32 = vpop.eup %6471  ;;  %v3515_v47 = vmul.f32 %v8936_v37, %v3374_v54  ;;  %6491 = vrcp.f32 %v2882_v27 }
 0x385   :  { %v3384_v23 = vpop.permute.xlu1 %3383  ;;  %11049 = vst [vmem:[#allocation61_spill] sm:$0xff] %v8940_v32  ;;  %v6474_v16 = vpop.eup %6473  ;;  %v3516_v2 = vmul.f32 %v8940_v32, %v3376_v48  ;;  %6493 = vrcp.f32 %v2883_v41 }
 0x386   :  { %v3382_v46 = vpop.permute.xlu0 %3381  ;;  %v6476_v49 = vpop.eup %6475  ;;  %v2886_v29 = vadd.f32 1.0, %v6474_v16  ;;  %6495 = vrcp.f32 %v2884_v56 }
 0x387   :  { %3691 = vrot.lane.b32.xlu1 %v3514_v14, %s6706_s4  ;;  %v8944_v12 = vpop.eup %6477  ;;  %v2885_v63 = vadd.f32 1.0, %v6476_v49 }
 0x388   :  { %3689 = vrot.lane.b32.xlu0 %v3513_v51, %s6706_s4  ;;  %11050 = vst [vmem:[#allocation62_spill] sm:$0xff] %v8944_v12  ;;  %v8948_v14 = vpop.eup %6479  ;;  %v3517_v54 = vmul.f32 %v8944_v12, %v3378_v1  ;;  %6497 = vrcp.f32 %v2886_v29 }
 0x389   :  { %v3388_v19 = vpop.permute.xlu1 %3387  ;;  %11051 = vst [vmem:[#allocation63_spill] sm:$0xff] %v8948_v14  ;;  %v6482_v34 = vpop.eup %6481  ;;  %v3518_v48 = vmul.f32 %v8948_v14, %v3380_v4  ;;  %6499 = vrcp.f32 %v2885_v63 }
 0x38a   :  { %v3386_v36 = vpop.permute.xlu0 %3385  ;;  %v6484_v37 = vpop.eup %6483  ;;  %v2887_v16 = vadd.f32 1.0, %v6482_v34 }
 0x38b   :  { %3695 = vrot.lane.b32.xlu1 %v3516_v2, %s6706_s4  ;;  %v8952_v27 = vpop.eup %6485  ;;  %v2888_v12 = vadd.f32 1.0, %v6484_v37  ;;  %v3081_v37 = vld [vmem:[%s10723_s3] sm:$0xff] }
 0x38c   :  { %3693 = vrot.lane.b32.xlu0 %v3515_v47, %s6706_s4  ;;  %11052 = vst [vmem:[#allocation64_spill] sm:$0xff] %v8952_v27  ;;  %v8956_v2 = vpop.eup %6487  ;;  %v3519_v4 = vmul.f32 %v8952_v27, %v3382_v46  ;;  %6501 = vrcp.f32 %v2887_v16  ;;  %v3082_v46 = vld [vmem:[%s10723_s3 + $0x8] sm:$0xff]  ;;  %v3084_v16 = vld [vmem:[%s10723_s3 + $0x18] sm:$0xff] }
 0x38d   :  { %v3392_v51 = vpop.permute.xlu1 %3391  ;;  %11053 = vst [vmem:[#allocation65_spill] sm:$0xff] %v8956_v2  ;;  %v3520_v41 = vmul.f32 %v8956_v2, %v3384_v23  ;;  %v8960_v49 = vpop.eup %6489  ;;  %6503 = vrcp.f32 %v2888_v12  ;;  %v3083_v12 = vld [vmem:[%s10723_s3 + $0x10] sm:$0xff] }
 0x38e   :  { %v3390_v40 = vpop.permute.xlu0 %3389  ;;  %11054 = vst [vmem:[#allocation66_spill] sm:$0xff] %v8960_v49  ;;  %v8964_v56 = vpop.eup %6491  ;;  %v3521_v34 = vmul.f32 %v8960_v49, %v3386_v36  ;;  %v3145_v36 = vmul.f32 %v8688_v20, %v3081_v37  ;;  %v3148_v20 = vmul.f32 %v8702_v9, %v3084_v16  ;;  %v3086_v16 = vld [vmem:[%s10723_s3 + $0x28] sm:$0xff]  ;;  %v3087_v9 = vld [vmem:[%s10723_s3 + $0x30] sm:$0xff] }
 0x38f   :  { %3699 = vrot.lane.b32.xlu1 %v3518_v48, %s6706_s4  ;;  %11055 = vst [vmem:[#allocation67_spill] sm:$0xff] %v8964_v56  ;;  %v3522_v29 = vmul.f32 %v8964_v56, %v3388_v19  ;;  %v3146_v19 = vmul.f32 %v8692_v30, %v3082_v46  ;;  %v3147_v30 = vmul.f32 %v8697_v53, %v3083_v12  ;;  %v3085_v12 = vld [vmem:[%s10723_s3 + $0x20] sm:$0xff] }
 0x390   :  { %3697 = vrot.lane.b32.xlu0 %v3517_v54, %s6706_s4  ;;  %v8974_v54 = vpop.eup %6493 }
 0x391   :  { %v3396_v47 = vpop.permute.xlu1 %3395  ;;  %11056 = vst [vmem:[#allocation68_spill] sm:$0xff] %v8974_v54  ;;  %v8978_v63 = vpop.eup %6495 }
 0x392   :  { %v3394_v1 = vpop.permute.xlu0 %3393  ;;  %11057 = vst [vmem:[#allocation69_spill] sm:$0xff] %v8978_v63  ;;  %v8994_v37 = vpop.eup %6497 }
 0x393   :  { %3703 = vrot.lane.b32.xlu1 %v3520_v41, %s6706_s4  ;;  %v3524_v41 = vmul.f32 %v8978_v63, %v3392_v51  ;;  %11060 = vst [vmem:[#allocation72_spill] sm:$0xff] %v8994_v37  ;;  %v9000_v51 = vpop.eup %6499 }
 0x394   :  { %3701 = vrot.lane.b32.xlu0 %v3519_v4, %s6706_s4  ;;  %v3523_v4 = vmul.f32 %v8974_v54, %v3390_v40  ;;  %11061 = vst [vmem:[#allocation73_spill] sm:$0xff] %v9000_v51 }
 0x395   :  { %v3400_v48 = vpop.permute.xlu1 %3399 }
 0x396   :  { %v3398_v23 = vpop.permute.xlu0 %3397  ;;  %v9031_v56 = vpop.eup %6501 }
 0x397   :  { %3707 = vrot.lane.b32.xlu1 %v3522_v29, %s6706_s4  ;;  %11063 = vst [vmem:[#allocation75_spill] sm:$0xff] %v9031_v56 }
 0x398   :  { %3705 = vrot.lane.b32.xlu0 %v3521_v34, %s6706_s4 }
 0x399   :  { %v3596_v29 = vpop.permute.xlu1 %3595 }
 0x39a   :  { %v3594_v34 = vpop.permute.xlu0 %3593  ;;  %v8990_v49 = vadd.f32 %v3596_v29, %v3146_v19  ;;  %v3525_v29 = vmul.f32 %v9000_v51, %v3394_v1  ;;  %v3149_v1 = vmul.f32 %v8708_v59, %v3085_v12  ;;  %v9037_v51 = vpop.eup %6503 }
 0x39b   :  { %v8992_v46 = vadd.f32 %v3594_v34, %v3145_v36  ;;  %3711 = vrot.lane.b32.xlu1 %v3524_v41, %s6706_s4  ;;  %11064 = vst [vmem:[#allocation76_spill] sm:$0xff] %v9037_v51 }
 0x39c   :  { %11058 = vst [vmem:[#allocation70_spill] sm:$0xff] %v8990_v49  ;;  %3709 = vrot.lane.b32.xlu0 %v3523_v4, %s6706_s4  ;;  %v3851_v40 = vsel %vm3849_vm1, %v8990_v49, 0.0  ;;  %v3985_v19 = vmul.f32 %v8990_v49, %v8990_v49  ;;  %5229 = vst.msk [vmem:[#allocation6 + $0x8] sm:$0xff] %vm3849_vm1, %v8990_v49  ;;  %v3526_v4 = vmul.f32 %v8994_v37, %v3396_v47 }
 0x39d   :  { %11059 = vst [vmem:[#allocation71_spill] sm:$0xff] %v8992_v46  ;;  %v3850_v36 = vsel %vm3849_vm1, %v8992_v46, 0.0  ;;  %v3984_v41 = vmul.f32 %v8992_v46, %v8992_v46  ;;  %5228 = vst.msk [vmem:[#allocation6] sm:$0xff] %vm3849_vm1, %v8992_v46  ;;  %v3600_v34 = vpop.permute.xlu1 %3599  ;;  %v3150_v47 = vmul.f32 %v8713_v17, %v3086_v16 }
 0x39e   :  { %v3598_v53 = vpop.permute.xlu0 %3597  ;;  %v4049_v49 = vsel %vm3849_vm1, %v3985_v19, 0.0  ;;  %v9027_v54 = vadd.f32 %v3600_v34, %v3148_v20  ;;  %v3852_v27 = vadd.f32 %v3851_v40, %v3850_v36  ;;  %v3151_v40 = vmul.f32 %v8718_v26, %v3087_v9  ;;  %v11088_v26 = vld [vmem:[#allocation48_spill] sm:$0xff] }
 0x39f   :  { %v4048_v46 = vsel %vm3849_vm1, %v3984_v41, 0.0  ;;  %v9029_v63 = vadd.f32 %v3598_v53, %v3147_v30  ;;  %3715 = vrot.lane.b32.xlu1 %v3526_v4, %s6706_s4  ;;  %v3088_v53 = vld [vmem:[%s10723_s3 + $0x38] sm:$0xff]  ;;  %v3528_v36 = vmul.f32 %v9037_v51, %v3400_v48  ;;  %v3527_v41 = vmul.f32 %v9031_v56, %v3398_v23  ;;  %v3090_v23 = vld [vmem:[%s10723_s3 + $0x48] sm:$0xff] }
 0x3a0   :  { %3713 = vrot.lane.b32.xlu0 %v3525_v29, %s6706_s4  ;;  %v3987_v19 = vmul.f32 %v9027_v54, %v9027_v54  ;;  %5231 = vst.msk [vmem:[#allocation6 + $0x18] sm:$0xff] %vm3849_vm1, %v9027_v54  ;;  %v4050_v16 = vadd.f32 %v4049_v49, %v4048_v46  ;;  %v3855_v34 = vsel %vm3849_vm1, %v9027_v54, 0.0  ;;  %v3152_v9 = vmul.f32 %v8723_v11, %v3088_v53  ;;  %v3089_v46 = vld [vmem:[%s10723_s3 + $0x40] sm:$0xff] }
 0x3a1   :  { %11062 = vst [vmem:[#allocation74_spill] sm:$0xff] %v9029_v63  ;;  %v3853_v20 = vsel %vm3849_vm1, %v9029_v63, 0.0  ;;  %v3986_v30 = vmul.f32 %v9029_v63, %v9029_v63  ;;  %5230 = vst.msk [vmem:[#allocation6 + $0x10] sm:$0xff] %vm3849_vm1, %v9029_v63  ;;  %v3604_v4 = vpop.permute.xlu1 %3603 }
 0x3a2   :  { %v3854_v12 = vadd.f32 %v3853_v20, %v3852_v27  ;;  %v3602_v29 = vpop.permute.xlu0 %3601  ;;  %v9058_v17 = vadd.f32 %v3604_v4, %v3150_v47  ;;  %v4053_v27 = vsel %vm3849_vm1, %v3987_v19, 0.0  ;;  %v3154_v4 = vmul.f32 %v8733_v61, %v3090_v23 }
 0x3a3   :  { %v4051_v59 = vsel %vm3849_vm1, %v3986_v30, 0.0  ;;  %v9060_v63 = vadd.f32 %v3602_v29, %v3149_v1  ;;  %3719 = vrot.lane.b32.xlu1 %v3528_v36, %s6706_s4  ;;  %v3153_v29 = vmul.f32 %v8728_v15, %v3089_v46 }
 0x3a4   :  { %v3856_v37 = vadd.f32 %v3855_v34, %v3854_v12  ;;  %v4052_v2 = vadd.f32 %v4051_v59, %v4050_v16  ;;  %3717 = vrot.lane.b32.xlu0 %v3527_v41, %s6706_s4  ;;  %v3989_v49 = vmul.f32 %v9058_v17, %v9058_v17  ;;  %5233 = vst.msk [vmem:[#allocation6 + $0x28] sm:$0xff] %vm3849_vm1, %v9058_v17  ;;  %v3859_v30 = vsel %vm3849_vm1, %v9058_v17, 0.0 }
 0x3a5   :  { %11065 = vst [vmem:[#allocation77_spill] sm:$0xff] %v9060_v63  ;;  %v3857_v48 = vsel %vm3849_vm1, %v9060_v63, 0.0  ;;  %v3988_v59 = vmul.f32 %v9060_v63, %v9060_v63  ;;  %5232 = vst.msk [vmem:[#allocation6 + $0x20] sm:$0xff] %vm3849_vm1, %v9060_v63  ;;  %v3608_v19 = vpop.permute.xlu1 %3607 }
 0x3a6   :  { %v4054_v47 = vadd.f32 %v4053_v27, %v4052_v2  ;;  %v3858_v1 = vadd.f32 %v3857_v48, %v3856_v37  ;;  %v3606_v20 = vpop.permute.xlu0 %3605  ;;  %v9085_v36 = vadd.f32 %v3608_v19, %v3152_v9  ;;  %v4057_v2 = vsel %vm3849_vm1, %v3989_v49, 0.0  ;;  %v3092_v9 = vld [vmem:[%s10723_s3 + $0x58] sm:$0xff]  ;;  %v3091_v27 = vld [vmem:[%s10723_s3 + $0x50] sm:$0xff] }
 0x3a7   :  { %v4055_v53 = vsel %vm3849_vm1, %v3988_v59, 0.0  ;;  %v9087_v41 = vadd.f32 %v3606_v20, %v3151_v40  ;;  %v3155_v15 = vmul.f32 %v8738_v7, %v3091_v27 }
 0x3a8   :  { %11066 = vst [vmem:[#allocation78_spill] sm:$0xff] %v9085_v36  ;;  %v4056_v16 = vadd.f32 %v4055_v53, %v4054_v47  ;;  %v3860_v12 = vadd.f32 %v3859_v30, %v3858_v1  ;;  %v3991_v37 = vmul.f32 %v9085_v36, %v9085_v36  ;;  %5235 = vst.msk [vmem:[#allocation6 + $0x38] sm:$0xff] %vm3849_vm1, %v9085_v36  ;;  %v3863_v46 = vsel %vm3849_vm1, %v9085_v36, 0.0 }
 0x3a9   :  { %11067 = vst [vmem:[#allocation79_spill] sm:$0xff] %v9087_v41  ;;  %v3861_v34 = vsel %vm3849_vm1, %v9087_v41, 0.0  ;;  %v3990_v40 = vmul.f32 %v9087_v41, %v9087_v41  ;;  %5234 = vst.msk [vmem:[#allocation6 + $0x30] sm:$0xff] %vm3849_vm1, %v9087_v41  ;;  %v3612_v59 = vpop.permute.xlu1 %3611  ;;  %v3156_v53 = vmul.f32 %v8743_v24, %v3092_v9 }
 0x3aa   :  { %v3862_v49 = vadd.f32 %v3861_v34, %v3860_v12  ;;  %v4058_v48 = vadd.f32 %v4057_v2, %v4056_v16  ;;  %v3610_v23 = vpop.permute.xlu0 %3609  ;;  %v9111_v1 = vadd.f32 %v3612_v59, %v3154_v4  ;;  %v4061_v12 = vsel %vm3849_vm1, %v3991_v37, 0.0  ;;  %v3094_v2 = vld [vmem:[%s10723_s3 + $0x68] sm:$0xff]  ;;  %v3093_v37 = vld [vmem:[%s10723_s3 + $0x60] sm:$0xff] }
 0x3ab   :  { %v4059_v47 = vsel %vm3849_vm1, %v3990_v40, 0.0  ;;  %v9113_v19 = vadd.f32 %v3610_v23, %v3153_v29  ;;  %v3158_v7 = vmul.f32 %v8753_v13, %v3094_v2  ;;  %v3157_v24 = vmul.f32 %v8748_v45, %v3093_v37 }
 0x3ac   :  { %11068 = vst [vmem:[#allocation80_spill] sm:$0xff] %v9111_v1  ;;  %v4060_v20 = vadd.f32 %v4059_v47, %v4058_v48  ;;  %v3864_v30 = vadd.f32 %v3863_v46, %v3862_v49  ;;  %v3993_v16 = vmul.f32 %v9111_v1, %v9111_v1  ;;  %5237 = vst.msk [vmem:[#allocation6 + $0x48] sm:$0xff] %vm3849_vm1, %v9111_v1  ;;  %v3867_v49 = vsel %vm3849_vm1, %v9111_v1, 0.0 }
 0x3ad   :  { %11069 = vst [vmem:[#allocation81_spill] sm:$0xff] %v9113_v19  ;;  %v3865_v4 = vsel %vm3849_vm1, %v9113_v19, 0.0  ;;  %v3992_v29 = vmul.f32 %v9113_v19, %v9113_v19  ;;  %5236 = vst.msk [vmem:[#allocation6 + $0x40] sm:$0xff] %vm3849_vm1, %v9113_v19  ;;  %v3616_v9 = vpop.permute.xlu1 %3615 }
 0x3ae   :  { %v3866_v34 = vadd.f32 %v3865_v4, %v3864_v30  ;;  %v4062_v40 = vadd.f32 %v4061_v12, %v4060_v20  ;;  %v3614_v27 = vpop.permute.xlu0 %3613  ;;  %v9137_v59 = vadd.f32 %v3616_v9, %v3156_v53  ;;  %v4065_v30 = vsel %vm3849_vm1, %v3993_v16, 0.0  ;;  %v3096_v12 = vld [vmem:[%s10723_s3 + $0x78] sm:$0xff]  ;;  %v3095_v16 = vld [vmem:[%s10723_s3 + $0x70] sm:$0xff] }
 0x3af   :  { %v4063_v48 = vsel %vm3849_vm1, %v3992_v29, 0.0  ;;  %v9139_v23 = vadd.f32 %v3614_v27, %v3155_v15  ;;  %v3160_v45 = vmul.f32 %v8763_v58, %v3096_v12  ;;  %v3159_v13 = vmul.f32 %v8758_v0, %v3095_v16 }
 0x3b0   :  { %11070 = vst [vmem:[#allocation82_spill] sm:$0xff] %v9137_v59  ;;  %v4064_v46 = vadd.f32 %v4063_v48, %v4062_v40  ;;  %v3868_v47 = vadd.f32 %v3867_v49, %v3866_v34  ;;  %v3995_v20 = vmul.f32 %v9137_v59, %v9137_v59  ;;  %5239 = vst.msk [vmem:[#allocation6 + $0x58] sm:$0xff] %vm3849_vm1, %v9137_v59  ;;  %v3871_v34 = vsel %vm3849_vm1, %v9137_v59, 0.0  ;;  %v11105_v59 = vld [vmem:[#allocation73_spill] sm:$0xff] }
 0x3b1   :  { %11071 = vst [vmem:[#allocation83_spill] sm:$0xff] %v9139_v23  ;;  %v3869_v53 = vsel %vm3849_vm1, %v9139_v23, 0.0  ;;  %v3994_v15 = vmul.f32 %v9139_v23, %v9139_v23  ;;  %5238 = vst.msk [vmem:[#allocation6 + $0x50] sm:$0xff] %vm3849_vm1, %v9139_v23  ;;  %v3620_v2 = vpop.permute.xlu1 %3619 }
 0x3b2   :  { %v3870_v4 = vadd.f32 %v3869_v53, %v3868_v47  ;;  %v4066_v29 = vadd.f32 %v4065_v30, %v4064_v46  ;;  %v3618_v37 = vpop.permute.xlu0 %3617  ;;  %v9163_v9 = vadd.f32 %v3620_v2, %v3158_v7  ;;  %v4069_v47 = vsel %vm3849_vm1, %v3995_v20, 0.0  ;;  %v3098_v30 = vld [vmem:[%s10723_s3 + $0x88] sm:$0xff]  ;;  %v3097_v20 = vld [vmem:[%s10723_s3 + $0x80] sm:$0xff] }
 0x3b3   :  { %v4067_v40 = vsel %vm3849_vm1, %v3994_v15, 0.0  ;;  %v9165_v27 = vadd.f32 %v3618_v37, %v3157_v24  ;;  %v3162_v0 = vmul.f32 %v8773_v50, %v3098_v30  ;;  %v3161_v58 = vmul.f32 %v8768_v42, %v3097_v20 }
 0x3b4   :  { %11072 = vst [vmem:[#allocation84_spill] sm:$0xff] %v9163_v9  ;;  %v4068_v49 = vadd.f32 %v4067_v40, %v4066_v29  ;;  %v3872_v48 = vadd.f32 %v3871_v34, %v3870_v4  ;;  %v3997_v46 = vmul.f32 %v9163_v9, %v9163_v9  ;;  %5241 = vst.msk [vmem:[#allocation6 + $0x68] sm:$0xff] %vm3849_vm1, %v9163_v9  ;;  %v3875_v4 = vsel %vm3849_vm1, %v9163_v9, 0.0  ;;  %v11103_v9 = vld [vmem:[#allocation68_spill] sm:$0xff] }
 0x3b5   :  { %11073 = vst [vmem:[#allocation85_spill] sm:$0xff] %v9165_v27  ;;  %v3873_v7 = vsel %vm3849_vm1, %v9165_v27, 0.0  ;;  %v3996_v24 = vmul.f32 %v9165_v27, %v9165_v27  ;;  %5240 = vst.msk [vmem:[#allocation6 + $0x60] sm:$0xff] %vm3849_vm1, %v9165_v27  ;;  %v3624_v12 = vpop.permute.xlu1 %3623 }
 0x3b6   :  { %v3874_v53 = vadd.f32 %v3873_v7, %v3872_v48  ;;  %v4070_v15 = vadd.f32 %v4069_v47, %v4068_v49  ;;  %v3622_v16 = vpop.permute.xlu0 %3621  ;;  %v9189_v2 = vadd.f32 %v3624_v12, %v3160_v45  ;;  %v4073_v48 = vsel %vm3849_vm1, %v3997_v46, 0.0  ;;  %v3100_v47 = vld [vmem:[%s10723_s3 + $0x98] sm:$0xff]  ;;  %v3099_v46 = vld [vmem:[%s10723_s3 + $0x90] sm:$0xff] }
 0x3b7   :  { %v4071_v29 = vsel %vm3849_vm1, %v3996_v24, 0.0  ;;  %v9191_v37 = vadd.f32 %v3622_v16, %v3159_v13  ;;  %v3164_v42 = vmul.f32 %v8783_v38, %v3100_v47  ;;  %v3163_v50 = vmul.f32 %v8778_v60, %v3099_v46 }
 0x3b8   :  { %11074 = vst [vmem:[#allocation86_spill] sm:$0xff] %v9189_v2  ;;  %v4072_v34 = vadd.f32 %v4071_v29, %v4070_v15  ;;  %v3876_v40 = vadd.f32 %v3875_v4, %v3874_v53  ;;  %v3999_v49 = vmul.f32 %v9189_v2, %v9189_v2  ;;  %5243 = vst.msk [vmem:[#allocation6 + $0x78] sm:$0xff] %vm3849_vm1, %v9189_v2  ;;  %v3879_v53 = vsel %vm3849_vm1, %v9189_v2, 0.0  ;;  %v11101_v2 = vld [vmem:[#allocation66_spill] sm:$0xff] }
 0x3b9   :  { %11075 = vst [vmem:[#allocation87_spill] sm:$0xff] %v9191_v37  ;;  %v3877_v45 = vsel %vm3849_vm1, %v9191_v37, 0.0  ;;  %v3998_v13 = vmul.f32 %v9191_v37, %v9191_v37  ;;  %5242 = vst.msk [vmem:[#allocation6 + $0x70] sm:$0xff] %vm3849_vm1, %v9191_v37  ;;  %v3628_v30 = vpop.permute.xlu1 %3627 }
 0x3ba   :  { %v3878_v7 = vadd.f32 %v3877_v45, %v3876_v40  ;;  %v4074_v24 = vadd.f32 %v4073_v48, %v4072_v34  ;;  %v3626_v20 = vpop.permute.xlu0 %3625  ;;  %v9215_v12 = vadd.f32 %v3628_v30, %v3162_v0  ;;  %v4077_v40 = vsel %vm3849_vm1, %v3999_v49, 0.0  ;;  %v3102_v48 = vld [vmem:[%s10723_s3 + $0xa8] sm:$0xff]  ;;  %v3101_v49 = vld [vmem:[%s10723_s3 + $0xa0] sm:$0xff] }
 0x3bb   :  { %v4075_v15 = vsel %vm3849_vm1, %v3998_v13, 0.0  ;;  %v9217_v16 = vadd.f32 %v3626_v20, %v3161_v58  ;;  %v3166_v60 = vmul.f32 %v8793_v18, %v3102_v48  ;;  %v3165_v38 = vmul.f32 %v8788_v8, %v3101_v49 }
 0x3bc   :  { %11076 = vst [vmem:[#allocation88_spill] sm:$0xff] %v9215_v12  ;;  %v4076_v4 = vadd.f32 %v4075_v15, %v4074_v24  ;;  %v3880_v29 = vadd.f32 %v3879_v53, %v3878_v7  ;;  %v4001_v34 = vmul.f32 %v9215_v12, %v9215_v12  ;;  %5245 = vst.msk [vmem:[#allocation6 + $0x88] sm:$0xff] %vm3849_vm1, %v9215_v12  ;;  %v3883_v7 = vsel %vm3849_vm1, %v9215_v12, 0.0  ;;  %v11099_v12 = vld [vmem:[#allocation64_spill] sm:$0xff] }
 0x3bd   :  { %11077 = vst [vmem:[#allocation89_spill] sm:$0xff] %v9217_v16  ;;  %v3881_v0 = vsel %vm3849_vm1, %v9217_v16, 0.0  ;;  %v4000_v58 = vmul.f32 %v9217_v16, %v9217_v16  ;;  %5244 = vst.msk [vmem:[#allocation6 + $0x80] sm:$0xff] %vm3849_vm1, %v9217_v16  ;;  %v3632_v47 = vpop.permute.xlu1 %3631 }
 0x3be   :  { %v3882_v45 = vadd.f32 %v3881_v0, %v3880_v29  ;;  %v4078_v13 = vadd.f32 %v4077_v40, %v4076_v4  ;;  %v3630_v46 = vpop.permute.xlu0 %3629  ;;  %v9241_v30 = vadd.f32 %v3632_v47, %v3164_v42  ;;  %v4081_v29 = vsel %vm3849_vm1, %v4001_v34, 0.0  ;;  %v3104_v40 = vld [vmem:[%s10723_s3 + $0xb8] sm:$0xff]  ;;  %v3103_v34 = vld [vmem:[%s10723_s3 + $0xb0] sm:$0xff] }
 0x3bf   :  { %v4079_v24 = vsel %vm3849_vm1, %v4000_v58, 0.0  ;;  %v9243_v20 = vadd.f32 %v3630_v46, %v3163_v50  ;;  %v3168_v8 = vmul.f32 %v8803_v62, %v3104_v40  ;;  %v3167_v18 = vmul.f32 %v8798_v25, %v3103_v34 }
 0x3c0   :  { %11078 = vst [vmem:[#allocation90_spill] sm:$0xff] %v9241_v30  ;;  %v4080_v53 = vadd.f32 %v4079_v24, %v4078_v13  ;;  %v3884_v15 = vadd.f32 %v3883_v7, %v3882_v45  ;;  %v4003_v4 = vmul.f32 %v9241_v30, %v9241_v30  ;;  %5247 = vst.msk [vmem:[#allocation6 + $0x98] sm:$0xff] %vm3849_vm1, %v9241_v30  ;;  %v3887_v45 = vsel %vm3849_vm1, %v9241_v30, 0.0 }
 0x3c1   :  { %11079 = vst [vmem:[#allocation91_spill] sm:$0xff] %v9243_v20  ;;  %v3885_v42 = vsel %vm3849_vm1, %v9243_v20, 0.0  ;;  %v4002_v50 = vmul.f32 %v9243_v20, %v9243_v20  ;;  %5246 = vst.msk [vmem:[#allocation6 + $0x90] sm:$0xff] %vm3849_vm1, %v9243_v20  ;;  %v3636_v48 = vpop.permute.xlu1 %3635 }
 0x3c2   :  { %v3886_v0 = vadd.f32 %v3885_v42, %v3884_v15  ;;  %v4082_v58 = vadd.f32 %v4081_v29, %v4080_v53  ;;  %v3634_v49 = vpop.permute.xlu0 %3633  ;;  %v9267_v47 = vadd.f32 %v3636_v48, %v3166_v60  ;;  %v4085_v15 = vsel %vm3849_vm1, %v4003_v4, 0.0  ;;  %v3106_v29 = vld [vmem:[%s10723_s3 + $0xc8] sm:$0xff]  ;;  %v3105_v4 = vld [vmem:[%s10723_s3 + $0xc0] sm:$0xff] }
 0x3c3   :  { %v4083_v13 = vsel %vm3849_vm1, %v4002_v50, 0.0  ;;  %v9269_v46 = vadd.f32 %v3634_v49, %v3165_v38  ;;  %v3170_v25 = vmul.f32 %v8813_v57, %v3106_v29  ;;  %v3169_v62 = vmul.f32 %v8808_v10, %v3105_v4 }
 0x3c4   :  { %11080 = vst [vmem:[#allocation92_spill] sm:$0xff] %v9267_v47  ;;  %v4084_v7 = vadd.f32 %v4083_v13, %v4082_v58  ;;  %v3888_v24 = vadd.f32 %v3887_v45, %v3886_v0  ;;  %v4005_v53 = vmul.f32 %v9267_v47, %v9267_v47  ;;  %5249 = vst.msk [vmem:[#allocation6 + $0xa8] sm:$0xff] %vm3849_vm1, %v9267_v47  ;;  %v3891_v0 = vsel %vm3849_vm1, %v9267_v47, 0.0  ;;  %v11095_v47 = vld [vmem:[#allocation32_spill] sm:$0xff] }
 0x3c5   :  { %11081 = vst [vmem:[#allocation93_spill] sm:$0xff] %v9269_v46  ;;  %v3889_v60 = vsel %vm3849_vm1, %v9269_v46, 0.0  ;;  %v4004_v38 = vmul.f32 %v9269_v46, %v9269_v46  ;;  %5248 = vst.msk [vmem:[#allocation6 + $0xa0] sm:$0xff] %vm3849_vm1, %v9269_v46  ;;  %v3640_v40 = vpop.permute.xlu1 %3639 }
 0x3c6   :  { %v3890_v42 = vadd.f32 %v3889_v60, %v3888_v24  ;;  %v4086_v50 = vadd.f32 %v4085_v15, %v4084_v7  ;;  %v3638_v34 = vpop.permute.xlu0 %3637  ;;  %v9293_v48 = vadd.f32 %v3640_v40, %v3168_v8  ;;  %v4089_v24 = vsel %vm3849_vm1, %v4005_v53, 0.0  ;;  %v3108_v15 = vld [vmem:[%s10723_s3 + $0xd8] sm:$0xff]  ;;  %v3107_v53 = vld [vmem:[%s10723_s3 + $0xd0] sm:$0xff] }
 0x3c7   :  { %v4087_v58 = vsel %vm3849_vm1, %v4004_v38, 0.0  ;;  %v9295_v49 = vadd.f32 %v3638_v34, %v3167_v18  ;;  %v3172_v10 = vmul.f32 %v8823_v35, %v3108_v15  ;;  %v3171_v57 = vmul.f32 %v8818_v6, %v3107_v53  ;;  %v11086_v35 = vld [vmem:[#allocation13_spill] sm:$0xff] }
 0x3c8   :  { %11082 = vst [vmem:[#allocation94_spill] sm:$0xff] %v9293_v48  ;;  %v4088_v45 = vadd.f32 %v4087_v58, %v4086_v50  ;;  %v3892_v13 = vadd.f32 %v3891_v0, %v3890_v42  ;;  %v4007_v7 = vmul.f32 %v9293_v48, %v9293_v48  ;;  %5251 = vst.msk [vmem:[#allocation6 + $0xb8] sm:$0xff] %vm3849_vm1, %v9293_v48  ;;  %v3895_v42 = vsel %vm3849_vm1, %v9293_v48, 0.0 }
 0x3c9   :  { %11083 = vst [vmem:[#allocation95_spill] sm:$0xff] %v9295_v49  ;;  %v3893_v8 = vsel %vm3849_vm1, %v9295_v49, 0.0  ;;  %v4006_v18 = vmul.f32 %v9295_v49, %v9295_v49  ;;  %5250 = vst.msk [vmem:[#allocation6 + $0xb0] sm:$0xff] %vm3849_vm1, %v9295_v49  ;;  %v3644_v29 = vpop.permute.xlu1 %3643 }
 0x3ca   :  { %v3894_v60 = vadd.f32 %v3893_v8, %v3892_v13  ;;  %v4090_v38 = vadd.f32 %v4089_v24, %v4088_v45  ;;  %v3642_v4 = vpop.permute.xlu0 %3641  ;;  %v9319_v40 = vadd.f32 %v3644_v29, %v3170_v25  ;;  %v4093_v13 = vsel %vm3849_vm1, %v4007_v7, 0.0  ;;  %v3110_v24 = vld [vmem:[%s10723_s3 + $0xe8] sm:$0xff]  ;;  %v3109_v7 = vld [vmem:[%s10723_s3 + $0xe0] sm:$0xff] }
 0x3cb   :  { %v4091_v50 = vsel %vm3849_vm1, %v4006_v18, 0.0  ;;  %v9321_v34 = vadd.f32 %v3642_v4, %v3169_v62  ;;  %v3174_v6 = vmul.f32 %v8833_v55, %v3110_v24  ;;  %v3173_v61 = vmul.f32 %v11086_v35, %v3109_v7  ;;  %v11087_v35 = vld [vmem:[#allocation49_spill] sm:$0xff] }
 0x3cc   :  { %11084 = vst [vmem:[#allocation96_spill] sm:$0xff] %v9319_v40  ;;  %v4092_v0 = vadd.f32 %v4091_v50, %v4090_v38  ;;  %v3896_v58 = vadd.f32 %v3895_v42, %v3894_v60  ;;  %v4009_v45 = vmul.f32 %v9319_v40, %v9319_v40  ;;  %5253 = vst.msk [vmem:[#allocation6 + $0xc8] sm:$0xff] %vm3849_vm1, %v9319_v40  ;;  %v3899_v60 = vsel %vm3849_vm1, %v9319_v40, 0.0 }
 0x3cd   :  { %11085 = vst [vmem:[#allocation97_spill] sm:$0xff] %v9321_v34  ;;  %v3897_v25 = vsel %vm3849_vm1, %v9321_v34, 0.0  ;;  %v4008_v62 = vmul.f32 %v9321_v34, %v9321_v34  ;;  %5252 = vst.msk [vmem:[#allocation6 + $0xc0] sm:$0xff] %vm3849_vm1, %v9321_v34  ;;  %v3648_v15 = vpop.permute.xlu1 %3647 }
 0x3ce   :  { %v3898_v8 = vadd.f32 %v3897_v25, %v3896_v58  ;;  %v4094_v18 = vadd.f32 %v4093_v13, %v4092_v0  ;;  %v3646_v53 = vpop.permute.xlu0 %3645  ;;  %v9345_v29 = vadd.f32 %v3648_v15, %v3172_v10  ;;  %v4097_v58 = vsel %vm3849_vm1, %v4009_v45, 0.0  ;;  %v3112_v13 = vld [vmem:[%s10723_s3 + $0xf8] sm:$0xff]  ;;  %v3111_v45 = vld [vmem:[%s10723_s3 + $0xf0] sm:$0xff] }
 0x3cf   :  { %v4095_v38 = vsel %vm3849_vm1, %v4008_v62, 0.0  ;;  %v9347_v4 = vadd.f32 %v3646_v53, %v3171_v57  ;;  %v3176_v55 = vmul.f32 %v11087_v35, %v3112_v13  ;;  %v3175_v11 = vmul.f32 %v11088_v26, %v3111_v45  ;;  %v11089_v35 = vld [vmem:[#allocation15_spill] sm:$0xff] }
 0x3d0   :  { %v4096_v42 = vadd.f32 %v4095_v38, %v4094_v18  ;;  %v3900_v50 = vadd.f32 %v3899_v60, %v3898_v8  ;;  %v4011_v0 = vmul.f32 %v9345_v29, %v9345_v29  ;;  %5255 = vst.msk [vmem:[#allocation6 + $0xd8] sm:$0xff] %vm3849_vm1, %v9345_v29  ;;  %v3903_v8 = vsel %vm3849_vm1, %v9345_v29, 0.0 }
 0x3d1   :  { %v3901_v10 = vsel %vm3849_vm1, %v9347_v4, 0.0  ;;  %v4010_v57 = vmul.f32 %v9347_v4, %v9347_v4  ;;  %5254 = vst.msk [vmem:[#allocation6 + $0xd0] sm:$0xff] %vm3849_vm1, %v9347_v4  ;;  %v3652_v24 = vpop.permute.xlu1 %3651 }
 0x3d2   :  { %v3902_v25 = vadd.f32 %v3901_v10, %v3900_v50  ;;  %v4098_v62 = vadd.f32 %v4097_v58, %v4096_v42  ;;  %v3650_v7 = vpop.permute.xlu0 %3649  ;;  %v9371_v15 = vadd.f32 %v3652_v24, %v3174_v6  ;;  %v4101_v50 = vsel %vm3849_vm1, %v4011_v0, 0.0  ;;  %v3114_v58 = vld [vmem:[%s10723_s3 + $0x108] sm:$0xff]  ;;  %v3113_v0 = vld [vmem:[%s10723_s3 + $0x100] sm:$0xff] }
 0x3d3   :  { %v4099_v18 = vsel %vm3849_vm1, %v4010_v57, 0.0  ;;  %v9373_v53 = vadd.f32 %v3650_v7, %v3173_v61  ;;  %v3178_v26 = vmul.f32 %v8853_v5, %v3114_v58  ;;  %v3177_v34 = vmul.f32 %v11089_v35, %v3113_v0  ;;  %v11090_v5 = vld [vmem:[#allocation16_spill] sm:$0xff] }
 0x3d4   :  { %v4100_v60 = vadd.f32 %v4099_v18, %v4098_v62  ;;  %v3904_v38 = vadd.f32 %v3903_v8, %v3902_v25  ;;  %v4013_v42 = vmul.f32 %v9371_v15, %v9371_v15  ;;  %5257 = vst.msk [vmem:[#allocation6 + $0xe8] sm:$0xff] %vm3849_vm1, %v9371_v15  ;;  %v3907_v25 = vsel %vm3849_vm1, %v9371_v15, 0.0 }
 0x3d5   :  { %v3905_v6 = vsel %vm3849_vm1, %v9373_v53, 0.0  ;;  %v4012_v61 = vmul.f32 %v9373_v53, %v9373_v53  ;;  %5256 = vst.msk [vmem:[#allocation6 + $0xe0] sm:$0xff] %vm3849_vm1, %v9373_v53  ;;  %v3656_v13 = vpop.permute.xlu1 %3655 }
 0x3d6   :  { %v3906_v10 = vadd.f32 %v3905_v6, %v3904_v38  ;;  %v4102_v57 = vadd.f32 %v4101_v50, %v4100_v60  ;;  %v3654_v45 = vpop.permute.xlu0 %3653  ;;  %v9397_v24 = vadd.f32 %v3656_v13, %v3176_v55  ;;  %v4105_v38 = vsel %vm3849_vm1, %v4013_v42, 0.0  ;;  %v3116_v50 = vld [vmem:[%s10723_s3 + $0x118] sm:$0xff]  ;;  %v3115_v42 = vld [vmem:[%s10723_s3 + $0x110] sm:$0xff] }
 0x3d7   :  { %v4103_v62 = vsel %vm3849_vm1, %v4012_v61, 0.0  ;;  %v9399_v7 = vadd.f32 %v3654_v45, %v3175_v11  ;;  %v3180_v35 = vmul.f32 %v8863_v3, %v3116_v50  ;;  %v3179_v40 = vmul.f32 %v11090_v5, %v3115_v42 }
 0x3d8   :  { %v4104_v8 = vadd.f32 %v4103_v62, %v4102_v57  ;;  %v3908_v18 = vadd.f32 %v3907_v25, %v3906_v10  ;;  %v4015_v60 = vmul.f32 %v9397_v24, %v9397_v24  ;;  %5259 = vst.msk [vmem:[#allocation6 + $0xf8] sm:$0xff] %vm3849_vm1, %v9397_v24  ;;  %v3911_v10 = vsel %vm3849_vm1, %v9397_v24, 0.0 }
 0x3d9   :  { %v3909_v55 = vsel %vm3849_vm1, %v9399_v7, 0.0  ;;  %v4014_v11 = vmul.f32 %v9399_v7, %v9399_v7  ;;  %5258 = vst.msk [vmem:[#allocation6 + $0xf0] sm:$0xff] %vm3849_vm1, %v9399_v7  ;;  %v3660_v58 = vpop.permute.xlu1 %3659 }
 0x3da   :  { %v3910_v6 = vadd.f32 %v3909_v55, %v3908_v18  ;;  %v4106_v61 = vadd.f32 %v4105_v38, %v4104_v8  ;;  %v3658_v0 = vpop.permute.xlu0 %3657  ;;  %v9423_v13 = vadd.f32 %v3660_v58, %v3178_v26  ;;  %v4109_v18 = vsel %vm3849_vm1, %v4015_v60, 0.0  ;;  %v3118_v38 = vld [vmem:[%s10723_s3 + $0x128] sm:$0xff]  ;;  %v3117_v60 = vld [vmem:[%s10723_s3 + $0x120] sm:$0xff] }
 0x3db   :  { %v4107_v57 = vsel %vm3849_vm1, %v4014_v11, 0.0  ;;  %v9425_v45 = vadd.f32 %v3658_v0, %v3177_v34  ;;  %v3182_v5 = vmul.f32 %v8873_v52, %v3118_v38  ;;  %v3181_v3 = vmul.f32 %v8868_v31, %v3117_v60 }
 0x3dc   :  { %v4108_v25 = vadd.f32 %v4107_v57, %v4106_v61  ;;  %v3912_v62 = vadd.f32 %v3911_v10, %v3910_v6  ;;  %v4017_v8 = vmul.f32 %v9423_v13, %v9423_v13  ;;  %5261 = vst.msk [vmem:[#allocation6 + $0x108] sm:$0xff] %vm3849_vm1, %v9423_v13  ;;  %v3915_v6 = vsel %vm3849_vm1, %v9423_v13, 0.0 }
 0x3dd   :  { %v3913_v26 = vsel %vm3849_vm1, %v9425_v45, 0.0  ;;  %v4016_v34 = vmul.f32 %v9425_v45, %v9425_v45  ;;  %5260 = vst.msk [vmem:[#allocation6 + $0x100] sm:$0xff] %vm3849_vm1, %v9425_v45  ;;  %v3664_v50 = vpop.permute.xlu1 %3663 }
 0x3de   :  { %v3914_v55 = vadd.f32 %v3913_v26, %v3912_v62  ;;  %v4110_v11 = vadd.f32 %v4109_v18, %v4108_v25  ;;  %v3662_v42 = vpop.permute.xlu0 %3661  ;;  %v9449_v58 = vadd.f32 %v3664_v50, %v3180_v35  ;;  %v4113_v62 = vsel %vm3849_vm1, %v4017_v8, 0.0  ;;  %v3120_v18 = vld [vmem:[%s10723_s3 + $0x138] sm:$0xff]  ;;  %v3119_v8 = vld [vmem:[%s10723_s3 + $0x130] sm:$0xff] }
 0x3df   :  { %v4111_v61 = vsel %vm3849_vm1, %v4016_v34, 0.0  ;;  %v9451_v0 = vadd.f32 %v3662_v42, %v3179_v40  ;;  %v3184_v31 = vmul.f32 %v8883_v28, %v3120_v18  ;;  %v3183_v52 = vmul.f32 %v8878_v21, %v3119_v8  ;;  %v11091_v28 = vld [vmem:[#allocation53_spill] sm:$0xff] }
 0x3e0   :  { %v4112_v10 = vadd.f32 %v4111_v61, %v4110_v11  ;;  %v3916_v57 = vadd.f32 %v3915_v6, %v3914_v55  ;;  %v4019_v25 = vmul.f32 %v9449_v58, %v9449_v58  ;;  %5263 = vst.msk [vmem:[#allocation6 + $0x118] sm:$0xff] %vm3849_vm1, %v9449_v58  ;;  %v3919_v55 = vsel %vm3849_vm1, %v9449_v58, 0.0 }
 0x3e1   :  { %v3917_v35 = vsel %vm3849_vm1, %v9451_v0, 0.0  ;;  %v4018_v40 = vmul.f32 %v9451_v0, %v9451_v0  ;;  %5262 = vst.msk [vmem:[#allocation6 + $0x110] sm:$0xff] %vm3849_vm1, %v9451_v0  ;;  %v3668_v38 = vpop.permute.xlu1 %3667 }
 0x3e2   :  { %v3918_v26 = vadd.f32 %v3917_v35, %v3916_v57  ;;  %v4114_v34 = vadd.f32 %v4113_v62, %v4112_v10  ;;  %v3666_v60 = vpop.permute.xlu0 %3665  ;;  %v9475_v50 = vadd.f32 %v3668_v38, %v3182_v5  ;;  %v4117_v57 = vsel %vm3849_vm1, %v4019_v25, 0.0  ;;  %v3122_v62 = vld [vmem:[%s10723_s3 + $0x148] sm:$0xff]  ;;  %v3121_v25 = vld [vmem:[%s10723_s3 + $0x140] sm:$0xff] }
 0x3e3   :  { %v4115_v11 = vsel %vm3849_vm1, %v4018_v40, 0.0  ;;  %v9477_v42 = vadd.f32 %v3666_v60, %v3181_v3  ;;  %v3186_v21 = vmul.f32 %v8893_v43, %v3122_v62  ;;  %v3185_v49 = vmul.f32 %v11091_v28, %v3121_v25  ;;  %v11092_v43 = vld [vmem:[#allocation55_spill] sm:$0xff] }
 0x3e4   :  { %v4116_v6 = vadd.f32 %v4115_v11, %v4114_v34  ;;  %v3920_v61 = vadd.f32 %v3919_v55, %v3918_v26  ;;  %v4021_v10 = vmul.f32 %v9475_v50, %v9475_v50  ;;  %5265 = vst.msk [vmem:[#allocation6 + $0x128] sm:$0xff] %vm3849_vm1, %v9475_v50  ;;  %v3923_v26 = vsel %vm3849_vm1, %v9475_v50, 0.0 }
 0x3e5   :  { %v3921_v5 = vsel %vm3849_vm1, %v9477_v42, 0.0  ;;  %v4020_v3 = vmul.f32 %v9477_v42, %v9477_v42  ;;  %5264 = vst.msk [vmem:[#allocation6 + $0x120] sm:$0xff] %vm3849_vm1, %v9477_v42  ;;  %v3672_v18 = vpop.permute.xlu1 %3671 }
 0x3e6   :  { %v3922_v35 = vadd.f32 %v3921_v5, %v3920_v61  ;;  %v4118_v40 = vadd.f32 %v4117_v57, %v4116_v6  ;;  %v3670_v8 = vpop.permute.xlu0 %3669  ;;  %v9501_v38 = vadd.f32 %v3672_v18, %v3184_v31  ;;  %v4121_v61 = vsel %vm3849_vm1, %v4021_v10, 0.0  ;;  %v3124_v57 = vld [vmem:[%s10723_s3 + $0x158] sm:$0xff]  ;;  %v3123_v10 = vld [vmem:[%s10723_s3 + $0x150] sm:$0xff] }
 0x3e7   :  { %v4119_v34 = vsel %vm3849_vm1, %v4020_v3, 0.0  ;;  %v9503_v60 = vadd.f32 %v3670_v8, %v3183_v52  ;;  %v3188_v28 = vmul.f32 %v8903_v39, %v3124_v57  ;;  %v3187_v48 = vmul.f32 %v11092_v43, %v3123_v10  ;;  %v11093_v39 = vld [vmem:[#allocation57_spill] sm:$0xff] }
 0x3e8   :  { %v4120_v55 = vadd.f32 %v4119_v34, %v4118_v40  ;;  %v3924_v11 = vadd.f32 %v3923_v26, %v3922_v35  ;;  %v4023_v6 = vmul.f32 %v9501_v38, %v9501_v38  ;;  %5267 = vst.msk [vmem:[#allocation6 + $0x138] sm:$0xff] %vm3849_vm1, %v9501_v38  ;;  %v3927_v35 = vsel %vm3849_vm1, %v9501_v38, 0.0 }
 0x3e9   :  { %v3925_v31 = vsel %vm3849_vm1, %v9503_v60, 0.0  ;;  %v4022_v52 = vmul.f32 %v9503_v60, %v9503_v60  ;;  %5266 = vst.msk [vmem:[#allocation6 + $0x130] sm:$0xff] %vm3849_vm1, %v9503_v60  ;;  %v3676_v62 = vpop.permute.xlu1 %3675 }
 0x3ea   :  { %v3926_v5 = vadd.f32 %v3925_v31, %v3924_v11  ;;  %v4122_v3 = vadd.f32 %v4121_v61, %v4120_v55  ;;  %v3674_v25 = vpop.permute.xlu0 %3673  ;;  %v9527_v18 = vadd.f32 %v3676_v62, %v3186_v21  ;;  %v4125_v11 = vsel %vm3849_vm1, %v4023_v6, 0.0  ;;  %v3126_v61 = vld [vmem:[%s10723_s3 + $0x168] sm:$0xff]  ;;  %v3125_v6 = vld [vmem:[%s10723_s3 + $0x160] sm:$0xff] }
 0x3eb   :  { %v4123_v40 = vsel %vm3849_vm1, %v4022_v52, 0.0  ;;  %v9529_v8 = vadd.f32 %v3674_v25, %v3185_v49  ;;  %v3190_v43 = vmul.f32 %v8913_v44, %v3126_v61  ;;  %v3189_v46 = vmul.f32 %v11093_v39, %v3125_v6 }
 0x3ec   :  { %v4124_v26 = vadd.f32 %v4123_v40, %v4122_v3  ;;  %v3928_v34 = vadd.f32 %v3927_v35, %v3926_v5  ;;  %v4025_v55 = vmul.f32 %v9527_v18, %v9527_v18  ;;  %5269 = vst.msk [vmem:[#allocation6 + $0x148] sm:$0xff] %vm3849_vm1, %v9527_v18  ;;  %v3931_v5 = vsel %vm3849_vm1, %v9527_v18, 0.0 }
 0x3ed   :  { %v3929_v21 = vsel %vm3849_vm1, %v9529_v8, 0.0  ;;  %v4024_v49 = vmul.f32 %v9529_v8, %v9529_v8  ;;  %5268 = vst.msk [vmem:[#allocation6 + $0x140] sm:$0xff] %vm3849_vm1, %v9529_v8  ;;  %v3680_v57 = vpop.permute.xlu1 %3679 }
 0x3ee   :  { %v3930_v31 = vadd.f32 %v3929_v21, %v3928_v34  ;;  %v4126_v52 = vadd.f32 %v4125_v11, %v4124_v26  ;;  %v3678_v10 = vpop.permute.xlu0 %3677  ;;  %v9553_v62 = vadd.f32 %v3680_v57, %v3188_v28  ;;  %v4129_v34 = vsel %vm3849_vm1, %v4025_v55, 0.0  ;;  %v3128_v11 = vld [vmem:[%s10723_s3 + $0x178] sm:$0xff]  ;;  %v3127_v55 = vld [vmem:[%s10723_s3 + $0x170] sm:$0xff] }
 0x3ef   :  { %v4127_v3 = vsel %vm3849_vm1, %v4024_v49, 0.0  ;;  %v9555_v25 = vadd.f32 %v3678_v10, %v3187_v48  ;;  %v3192_v39 = vmul.f32 %v8923_v33, %v3128_v11  ;;  %v3191_v44 = vmul.f32 %v8918_v22, %v3127_v55  ;;  %v11094_v22 = vld [vmem:[#allocation59_spill] sm:$0xff] }
 0x3f0   :  { %v4128_v35 = vadd.f32 %v4127_v3, %v4126_v52  ;;  %v3932_v40 = vadd.f32 %v3931_v5, %v3930_v31  ;;  %v4027_v26 = vmul.f32 %v9553_v62, %v9553_v62  ;;  %5271 = vst.msk [vmem:[#allocation6 + $0x158] sm:$0xff] %vm3849_vm1, %v9553_v62  ;;  %v3935_v31 = vsel %vm3849_vm1, %v9553_v62, 0.0 }
 0x3f1   :  { %v3933_v28 = vsel %vm3849_vm1, %v9555_v25, 0.0  ;;  %v4026_v48 = vmul.f32 %v9555_v25, %v9555_v25  ;;  %5270 = vst.msk [vmem:[#allocation6 + $0x150] sm:$0xff] %vm3849_vm1, %v9555_v25  ;;  %v3684_v61 = vpop.permute.xlu1 %3683 }
 0x3f2   :  { %v3934_v21 = vadd.f32 %v3933_v28, %v3932_v40  ;;  %v4130_v49 = vadd.f32 %v4129_v34, %v4128_v35  ;;  %v3682_v6 = vpop.permute.xlu0 %3681  ;;  %v9579_v57 = vadd.f32 %v3684_v61, %v3190_v43  ;;  %v4133_v40 = vsel %vm3849_vm1, %v4027_v26, 0.0  ;;  %v3130_v34 = vld [vmem:[%s10723_s3 + $0x188] sm:$0xff]  ;;  %v3129_v26 = vld [vmem:[%s10723_s3 + $0x180] sm:$0xff] }
 0x3f3   :  { %v4131_v52 = vsel %vm3849_vm1, %v4026_v48, 0.0  ;;  %v9581_v10 = vadd.f32 %v3682_v6, %v3189_v46  ;;  %v3194_v33 = vmul.f32 %v11094_v22, %v3130_v34  ;;  %v3193_v20 = vmul.f32 %v11095_v47, %v3129_v26  ;;  %v11096_v22 = vld [vmem:[#allocation60_spill] sm:$0xff] }
 0x3f4   :  { %v4132_v5 = vadd.f32 %v4131_v52, %v4130_v49  ;;  %v3936_v3 = vadd.f32 %v3935_v31, %v3934_v21  ;;  %v4029_v35 = vmul.f32 %v9579_v57, %v9579_v57  ;;  %5273 = vst.msk [vmem:[#allocation6 + $0x168] sm:$0xff] %vm3849_vm1, %v9579_v57  ;;  %v3939_v21 = vsel %vm3849_vm1, %v9579_v57, 0.0 }
 0x3f5   :  { %v3937_v43 = vsel %vm3849_vm1, %v9581_v10, 0.0  ;;  %v4028_v46 = vmul.f32 %v9581_v10, %v9581_v10  ;;  %5272 = vst.msk [vmem:[#allocation6 + $0x160] sm:$0xff] %vm3849_vm1, %v9581_v10  ;;  %v3688_v11 = vpop.permute.xlu1 %3687 }
 0x3f6   :  { %v3938_v28 = vadd.f32 %v3937_v43, %v3936_v3  ;;  %v4134_v48 = vadd.f32 %v4133_v40, %v4132_v5  ;;  %v3686_v55 = vpop.permute.xlu0 %3685  ;;  %v9605_v61 = vadd.f32 %v3688_v11, %v3192_v39  ;;  %v4137_v3 = vsel %vm3849_vm1, %v4029_v35, 0.0  ;;  %v3132_v40 = vld [vmem:[%s10723_s3 + $0x198] sm:$0xff]  ;;  %v3131_v35 = vld [vmem:[%s10723_s3 + $0x190] sm:$0xff] }
 0x3f7   :  { %v4135_v49 = vsel %vm3849_vm1, %v4028_v46, 0.0  ;;  %v9607_v6 = vadd.f32 %v3686_v55, %v3191_v44  ;;  %v3196_v47 = vmul.f32 %v8940_v32, %v3132_v40  ;;  %v3195_v30 = vmul.f32 %v11096_v22, %v3131_v35  ;;  %v11097_v32 = vld [vmem:[#allocation62_spill] sm:$0xff] }
 0x3f8   :  { %v4136_v31 = vadd.f32 %v4135_v49, %v4134_v48  ;;  %v3940_v52 = vadd.f32 %v3939_v21, %v3938_v28  ;;  %v4031_v5 = vmul.f32 %v9605_v61, %v9605_v61  ;;  %5275 = vst.msk [vmem:[#allocation6 + $0x178] sm:$0xff] %vm3849_vm1, %v9605_v61  ;;  %v3943_v28 = vsel %vm3849_vm1, %v9605_v61, 0.0 }
 0x3f9   :  { %v3941_v39 = vsel %vm3849_vm1, %v9607_v6, 0.0  ;;  %v4030_v44 = vmul.f32 %v9607_v6, %v9607_v6  ;;  %5274 = vst.msk [vmem:[#allocation6 + $0x170] sm:$0xff] %vm3849_vm1, %v9607_v6  ;;  %v3692_v34 = vpop.permute.xlu1 %3691 }
 0x3fa   :  { %v3942_v43 = vadd.f32 %v3941_v39, %v3940_v52  ;;  %v4138_v46 = vadd.f32 %v4137_v3, %v4136_v31  ;;  %v3690_v26 = vpop.permute.xlu0 %3689  ;;  %v9631_v11 = vadd.f32 %v3692_v34, %v3194_v33  ;;  %v4141_v52 = vsel %vm3849_vm1, %v4031_v5, 0.0  ;;  %v3134_v3 = vld [vmem:[%s10723_s3 + $0x1a8] sm:$0xff]  ;;  %v3133_v5 = vld [vmem:[%s10723_s3 + $0x1a0] sm:$0xff] }
 0x3fb   :  { %v4139_v48 = vsel %vm3849_vm1, %v4030_v44, 0.0  ;;  %v9633_v55 = vadd.f32 %v3690_v26, %v3193_v20  ;;  %v3198_v22 = vmul.f32 %v8948_v14, %v3134_v3  ;;  %v3197_v16 = vmul.f32 %v11097_v32, %v3133_v5  ;;  %v11098_v32 = vld [vmem:[#allocation65_spill] sm:$0xff] }
 0x3fc   :  { %v4140_v21 = vadd.f32 %v4139_v48, %v4138_v46  ;;  %v3944_v49 = vadd.f32 %v3943_v28, %v3942_v43  ;;  %v4033_v31 = vmul.f32 %v9631_v11, %v9631_v11  ;;  %5277 = vst.msk [vmem:[#allocation6 + $0x188] sm:$0xff] %vm3849_vm1, %v9631_v11  ;;  %v3947_v43 = vsel %vm3849_vm1, %v9631_v11, 0.0 }
 0x3fd   :  { %v3945_v33 = vsel %vm3849_vm1, %v9633_v55, 0.0  ;;  %v4032_v20 = vmul.f32 %v9633_v55, %v9633_v55  ;;  %5276 = vst.msk [vmem:[#allocation6 + $0x180] sm:$0xff] %vm3849_vm1, %v9633_v55  ;;  %v3696_v40 = vpop.permute.xlu1 %3695 }
 0x3fe   :  { %v3946_v39 = vadd.f32 %v3945_v33, %v3944_v49  ;;  %v4142_v44 = vadd.f32 %v4141_v52, %v4140_v21  ;;  %v3694_v35 = vpop.permute.xlu0 %3693  ;;  %v9657_v34 = vadd.f32 %v3696_v40, %v3196_v47  ;;  %v4145_v49 = vsel %vm3849_vm1, %v4033_v31, 0.0  ;;  %v3136_v52 = vld [vmem:[%s10723_s3 + $0x1b8] sm:$0xff]  ;;  %v3135_v31 = vld [vmem:[%s10723_s3 + $0x1b0] sm:$0xff] }
 0x3ff   :  { %v4143_v46 = vsel %vm3849_vm1, %v4032_v20, 0.0  ;;  %v9659_v26 = vadd.f32 %v3694_v35, %v3195_v30  ;;  %v3200_v14 = vmul.f32 %v11098_v32, %v3136_v52  ;;  %v3199_v37 = vmul.f32 %v11099_v12, %v3135_v31  ;;  %v11100_v12 = vld [vmem:[#allocation67_spill] sm:$0xff] }
 0x400   :  { %v4144_v28 = vadd.f32 %v4143_v46, %v4142_v44  ;;  %v3948_v48 = vadd.f32 %v3947_v43, %v3946_v39  ;;  %v4035_v21 = vmul.f32 %v9657_v34, %v9657_v34  ;;  %5279 = vst.msk [vmem:[#allocation6 + $0x198] sm:$0xff] %vm3849_vm1, %v9657_v34  ;;  %v3951_v39 = vsel %vm3849_vm1, %v9657_v34, 0.0 }
 0x401   :  { %v3949_v47 = vsel %vm3849_vm1, %v9659_v26, 0.0  ;;  %v4034_v30 = vmul.f32 %v9659_v26, %v9659_v26  ;;  %5278 = vst.msk [vmem:[#allocation6 + $0x190] sm:$0xff] %vm3849_vm1, %v9659_v26  ;;  %v3700_v3 = vpop.permute.xlu1 %3699 }
 0x402   :  { %v3950_v33 = vadd.f32 %v3949_v47, %v3948_v48  ;;  %v4146_v20 = vadd.f32 %v4145_v49, %v4144_v28  ;;  %v3698_v5 = vpop.permute.xlu0 %3697  ;;  %v9683_v40 = vadd.f32 %v3700_v3, %v3198_v22  ;;  %v4149_v48 = vsel %vm3849_vm1, %v4035_v21, 0.0  ;;  %v3138_v49 = vld [vmem:[%s10723_s3 + $0x1c8] sm:$0xff]  ;;  %v3137_v21 = vld [vmem:[%s10723_s3 + $0x1c0] sm:$0xff] }
 0x403   :  { %v4147_v44 = vsel %vm3849_vm1, %v4034_v30, 0.0  ;;  %v9685_v35 = vadd.f32 %v3698_v5, %v3197_v16  ;;  %v3202_v32 = vmul.f32 %v11100_v12, %v3138_v49  ;;  %v3201_v27 = vmul.f32 %v11101_v2, %v3137_v21  ;;  %v11102_v2 = vld [vmem:[#allocation69_spill] sm:$0xff] }
 0x404   :  { %v4148_v43 = vadd.f32 %v4147_v44, %v4146_v20  ;;  %v3952_v46 = vadd.f32 %v3951_v39, %v3950_v33  ;;  %v4037_v28 = vmul.f32 %v9683_v40, %v9683_v40  ;;  %5281 = vst.msk [vmem:[#allocation6 + $0x1a8] sm:$0xff] %vm3849_vm1, %v9683_v40  ;;  %v3955_v33 = vsel %vm3849_vm1, %v9683_v40, 0.0 }
 0x405   :  { %v3953_v22 = vsel %vm3849_vm1, %v9685_v35, 0.0  ;;  %v4036_v16 = vmul.f32 %v9685_v35, %v9685_v35  ;;  %5280 = vst.msk [vmem:[#allocation6 + $0x1a0] sm:$0xff] %vm3849_vm1, %v9685_v35  ;;  %v3704_v52 = vpop.permute.xlu1 %3703 }
 0x406   :  { %v3954_v47 = vadd.f32 %v3953_v22, %v3952_v46  ;;  %v4150_v30 = vadd.f32 %v4149_v48, %v4148_v43  ;;  %v3702_v31 = vpop.permute.xlu0 %3701  ;;  %v9709_v3 = vadd.f32 %v3704_v52, %v3200_v14  ;;  %v4153_v46 = vsel %vm3849_vm1, %v4037_v28, 0.0  ;;  %v3140_v48 = vld [vmem:[%s10723_s3 + $0x1d8] sm:$0xff]  ;;  %v3139_v28 = vld [vmem:[%s10723_s3 + $0x1d0] sm:$0xff] }
 0x407   :  { %v4151_v20 = vsel %vm3849_vm1, %v4036_v16, 0.0  ;;  %v9711_v5 = vadd.f32 %v3702_v31, %v3199_v37  ;;  %v3204_v12 = vmul.f32 %v11102_v2, %v3140_v48  ;;  %v3203_v23 = vmul.f32 %v11103_v9, %v3139_v28  ;;  %v11104_v9 = vld [vmem:[#allocation72_spill] sm:$0xff] }
 0x408   :  { %v4152_v39 = vadd.f32 %v4151_v20, %v4150_v30  ;;  %v3956_v44 = vadd.f32 %v3955_v33, %v3954_v47  ;;  %v4039_v43 = vmul.f32 %v9709_v3, %v9709_v3  ;;  %5283 = vst.msk [vmem:[#allocation6 + $0x1b8] sm:$0xff] %vm3849_vm1, %v9709_v3  ;;  %v3959_v47 = vsel %vm3849_vm1, %v9709_v3, 0.0 }
 0x409   :  { %v3957_v14 = vsel %vm3849_vm1, %v9711_v5, 0.0  ;;  %v4038_v37 = vmul.f32 %v9711_v5, %v9711_v5  ;;  %5282 = vst.msk [vmem:[#allocation6 + $0x1b0] sm:$0xff] %vm3849_vm1, %v9711_v5  ;;  %v3708_v49 = vpop.permute.xlu1 %3707 }
 0x40a   :  { %v3958_v22 = vadd.f32 %v3957_v14, %v3956_v44  ;;  %v4154_v16 = vadd.f32 %v4153_v46, %v4152_v39  ;;  %v3706_v21 = vpop.permute.xlu0 %3705  ;;  %v9735_v52 = vadd.f32 %v3708_v49, %v3202_v32  ;;  %v4157_v44 = vsel %vm3849_vm1, %v4039_v43, 0.0  ;;  %v3142_v46 = vld [vmem:[%s10723_s3 + $0x1e8] sm:$0xff]  ;;  %v3141_v43 = vld [vmem:[%s10723_s3 + $0x1e0] sm:$0xff] }
 0x40b   :  { %v4155_v30 = vsel %vm3849_vm1, %v4038_v37, 0.0  ;;  %v9737_v31 = vadd.f32 %v3706_v21, %v3201_v27  ;;  %v3206_v2 = vmul.f32 %v11104_v9, %v3142_v46  ;;  %v3205_v19 = vmul.f32 %v11105_v59, %v3141_v43 }
 0x40c   :  { %v4156_v33 = vadd.f32 %v4155_v30, %v4154_v16  ;;  %v3960_v20 = vadd.f32 %v3959_v47, %v3958_v22  ;;  %v4041_v39 = vmul.f32 %v9735_v52, %v9735_v52  ;;  %5285 = vst.msk [vmem:[#allocation6 + $0x1c8] sm:$0xff] %vm3849_vm1, %v9735_v52  ;;  %v3963_v22 = vsel %vm3849_vm1, %v9735_v52, 0.0 }
 0x40d   :  { %v3961_v32 = vsel %vm3849_vm1, %v9737_v31, 0.0  ;;  %v4040_v27 = vmul.f32 %v9737_v31, %v9737_v31  ;;  %5284 = vst.msk [vmem:[#allocation6 + $0x1c0] sm:$0xff] %vm3849_vm1, %v9737_v31  ;;  %v3712_v48 = vpop.permute.xlu1 %3711 }
 0x40e   :  { %v3962_v14 = vadd.f32 %v3961_v32, %v3960_v20  ;;  %v4158_v37 = vadd.f32 %v4157_v44, %v4156_v33  ;;  %v3710_v28 = vpop.permute.xlu0 %3709  ;;  %v9761_v49 = vadd.f32 %v3712_v48, %v3204_v12  ;;  %v4161_v20 = vsel %vm3849_vm1, %v4041_v39, 0.0  ;;  %v3144_v44 = vld [vmem:[%s10723_s3 + $0x1f8] sm:$0xff]  ;;  %v3143_v39 = vld [vmem:[%s10723_s3 + $0x1f0] sm:$0xff] }
 0x40f   :  { %v4159_v16 = vsel %vm3849_vm1, %v4040_v27, 0.0  ;;  %v9763_v21 = vadd.f32 %v3710_v28, %v3203_v23  ;;  %v3208_v59 = vmul.f32 %v9037_v51, %v3144_v44  ;;  %v3207_v9 = vmul.f32 %v9031_v56, %v3143_v39 }
 0x410   :  { %v4160_v47 = vadd.f32 %v4159_v16, %v4158_v37  ;;  %v3964_v30 = vadd.f32 %v3963_v22, %v3962_v14  ;;  %v4043_v33 = vmul.f32 %v9761_v49, %v9761_v49  ;;  %5287 = vst.msk [vmem:[#allocation6 + $0x1d8] sm:$0xff] %vm3849_vm1, %v9761_v49  ;;  %v3967_v14 = vsel %vm3849_vm1, %v9761_v49, 0.0 }
 0x411   :  { %v3965_v12 = vsel %vm3849_vm1, %v9763_v21, 0.0  ;;  %v4042_v23 = vmul.f32 %v9763_v21, %v9763_v21  ;;  %5286 = vst.msk [vmem:[#allocation6 + $0x1d0] sm:$0xff] %vm3849_vm1, %v9763_v21  ;;  %v3716_v46 = vpop.permute.xlu1 %3715 }
 0x412   :  { %v3966_v32 = vadd.f32 %v3965_v12, %v3964_v30  ;;  %v4162_v27 = vadd.f32 %v4161_v20, %v4160_v47  ;;  %v3714_v43 = vpop.permute.xlu0 %3713  ;;  %v9787_v48 = vadd.f32 %v3716_v46, %v3206_v2  ;;  %v4165_v30 = vsel %vm3849_vm1, %v4043_v33, 0.0 }
 0x413   :  { %v4163_v37 = vsel %vm3849_vm1, %v4042_v23, 0.0  ;;  %v9789_v28 = vadd.f32 %v3714_v43, %v3205_v19 }
 0x414   :  { %v4164_v22 = vadd.f32 %v4163_v37, %v4162_v27  ;;  %v3968_v16 = vadd.f32 %v3967_v14, %v3966_v32  ;;  %v4045_v47 = vmul.f32 %v9787_v48, %v9787_v48  ;;  %5289 = vst.msk [vmem:[#allocation6 + $0x1e8] sm:$0xff] %vm3849_vm1, %v9787_v48  ;;  %v3971_v33 = vsel %vm3849_vm1, %v9787_v48, 0.0 }
 0x415   :  { %v3969_v2 = vsel %vm3849_vm1, %v9789_v28, 0.0  ;;  %v4044_v19 = vmul.f32 %v9789_v28, %v9789_v28  ;;  %5288 = vst.msk [vmem:[#allocation6 + $0x1e0] sm:$0xff] %vm3849_vm1, %v9789_v28  ;;  %v3720_v23 = vpop.permute.xlu1 %3719 }
 0x416   :  { %v3970_v20 = vadd.f32 %v3969_v2, %v3968_v16  ;;  %v4166_v12 = vadd.f32 %v4165_v30, %v4164_v22  ;;  %v3718_v44 = vpop.permute.xlu0 %3717  ;;  %v9807_v32 = vadd.f32 %v3720_v23, %v3208_v59  ;;  %v4169_v14 = vsel %vm3849_vm1, %v4045_v47, 0.0 }
 0x417   :  { %v4167_v39 = vsel %vm3849_vm1, %v4044_v19, 0.0  ;;  %v3847_v27 = vadd.f32 %v3718_v44, %v3207_v9 }
 0x418   :  { %v4168_v46 = vadd.f32 %v4167_v39, %v4166_v12  ;;  %v3972_v43 = vadd.f32 %v3971_v33, %v3970_v20  ;;  %v4047_v37 = vmul.f32 %v9807_v32, %v9807_v32  ;;  %5291 = vst.msk [vmem:[#allocation6 + $0x1f8] sm:$0xff] %vm3849_vm1, %v9807_v32  ;;  %v3975_v59 = vsel %vm3849_vm1, %v9807_v32, 0.0 }
 0x419   :  { %v3973_v22 = vsel %vm3849_vm1, %v3847_v27, 0.0  ;;  %v4046_v16 = vmul.f32 %v3847_v27, %v3847_v27  ;;  %5290 = vst.msk [vmem:[#allocation6 + $0x1f0] sm:$0xff] %vm3849_vm1, %v3847_v27 }
 0x41a   :  { %v3974_v30 = vadd.f32 %v3973_v22, %v3972_v43  ;;  %v4170_v2 = vadd.f32 %v4169_v14, %v4168_v46  ;;  %v4173_v20 = vsel %vm3849_vm1, %v4047_v37, 0.0  ;;  %v4185_v37 = vld [vmem:[%s10726_s6] sm:$0x1]  ;;  %s6707_s6 = smov 32  }
 0x41b   :  { %v4171_v9 = vsel %vm3849_vm1, %v4046_v16, 0.0 }
 0x41c   :  { %v3976_v19 = vadd.f32 %v3975_v59, %v3974_v30  ;;  %v4172_v47 = vadd.f32 %v4171_v9, %v4170_v2 }
 0x41e   :  { %v3977_v12 = vrot.slane %v3976_v19, 4  ;;  %v4174_v23 = vadd.f32 %v4173_v20, %v4172_v47 }
 0x420   :  { %v3978_v44 = vadd.f32 %v3977_v12, %v3976_v19  ;;  %v4175_v33 = vrot.slane %v4174_v23, 4  ;;  %v11107_v12 = vld [vmem:[#allocation71_spill] sm:$0xff] }
 0x422   :  { %v3979_v39 = vrot.slane %v3978_v44, 2  ;;  %v4176_v56 = vadd.f32 %v4175_v33, %v4174_v23 }
 0x424   :  { %v3980_v51 = vadd.f32 %v3979_v39, %v3978_v44  ;;  %v4177_v1 = vrot.slane %v4176_v56, 2  ;;  %v11108_v44 = vld [vmem:[#allocation70_spill] sm:$0xff] }
 0x425   :  { %v11109_v39 = vld [vmem:[#allocation74_spill] sm:$0xff] }
 0x426   :  { %v3981_v41 = vrot.slane %v3980_v51, 1  ;;  %v4178_v43 = vadd.f32 %v4177_v1, %v4176_v56  ;;  %v4189_v56 = vld [vmem:[%s10727_s7] sm:$0x1] }
 0x428   :  { %v3982_v46 = vadd.f32 %v3981_v41, %v3980_v51  ;;  %v4179_v14 = vrot.slane %v4178_v43, 1  ;;  %v11106_v41 = vld [vmem:[#allocation21_spill] sm:$0xff] }
 0x42a   :  { %v3983_v22 = vmul.f32 0.001953125, %v3982_v46  ;;  %v4180_v36 = vadd.f32 %v4179_v14, %v4178_v43 }
 0x42c   :  { %v4181_v63 = vmul.f32 0.001953125, %v4180_v36  ;;  %v4182_v16 = vmul.f32 %v3983_v22, %v3983_v22 }
 0x42e   :  { %v4183_v30 = vsub.f32 %v4181_v63, %v4182_v16 }
 0x430   :  { %v4184_v2 = vmax.f32 %v4183_v30, 0.0 }
 0x432   :  { %v4186_v59 = vadd.f32 1e-05, %v4184_v2 }
 0x434   :  { %6505 = vrsqrt.f32 %v4186_v59 }
 0x43e   :  { %v6506_v9 = vpop.eup %6505 }
 0x43f   :  { %v4188_v19 = vmul.f32 %v6506_v9, %v4185_v37 }
 0x441   :  { %v4190_v51 = vmul.f32 %v4188_v19, %v3983_v22  ;;  %v9827_v1 = vrot.slane %v4188_v19, %v11106_v41 }
 0x443   :  { %v4191_v36 = vsub.f32 %v4189_v56, %v4190_v51  ;;  %v4260_v63 = vmul.f32 %v9827_v1, %v3847_v27  ;;  %v4198_v23 = vmul.f32 %v9827_v1, %v11107_v12  ;;  %v4199_v33 = vmul.f32 %v9827_v1, %v11108_v44 }
 0x444   :  { %v9842_v43 = vmul.f32 %v9827_v1, %v11109_v39  ;;  %v4201_v46 = vmul.f32 %v9827_v1, %v9027_v54  ;;  %v4224_v27 = vmul.f32 %v9827_v1, %v9347_v4  ;;  %v4225_v14 = vmul.f32 %v9827_v1, %v9345_v29 }
 0x445   :  { %v9831_v47 = vrot.slane %v4191_v36, %v11106_v41  ;;  %v4226_v22 = vmul.f32 %v9827_v1, %v9373_v53  ;;  %v4227_v16 = vmul.f32 %v9827_v1, %v9371_v15  ;;  %v4228_v30 = vmul.f32 %v9827_v1, %v9399_v7 }
 0x446   :  { %v4229_v2 = vmul.f32 %v9827_v1, %v9397_v24  ;;  %v4230_v54 = vmul.f32 %v9827_v1, %v9425_v45  ;;  %v4231_v4 = vmul.f32 %v9827_v1, %v9423_v13  ;;  %v4232_v29 = vmul.f32 %v9827_v1, %v9451_v0 }
 0x447   :  { %v9834_v20 = vadd.f32 %v9831_v47, %v4260_v63  ;;  %v4233_v53 = vmul.f32 %v9827_v1, %v9449_v58  ;;  %v4234_v15 = vmul.f32 %v9827_v1, %v9477_v42  ;;  %v9870_v7 = vmul.f32 %v9827_v1, %v9789_v28 }
 0x448   :  { %v9874_v24 = vmul.f32 %v9827_v1, %v9787_v48  ;;  %v9878_v13 = vmul.f32 %v9827_v1, %v9807_v32  ;;  %v4235_v45 = vmul.f32 %v9827_v1, %v9475_v50  ;;  %v4236_v58 = vmul.f32 %v9827_v1, %v9503_v60 }
 0x449   :  { %v4237_v0 = vmul.f32 %v9827_v1, %v9501_v38  ;;  %v4269_v42 = vadd.f32 %v9831_v47, %v4199_v33  ;;  %v4238_v28 = vmul.f32 %v9827_v1, %v9529_v8  ;;  %v4239_v48 = vmul.f32 %v9827_v1, %v9527_v18 }
 0x44a   :  { %v4240_v32 = vmul.f32 %v9827_v1, %v9555_v25  ;;  %v4241_v50 = vmul.f32 %v9827_v1, %v9553_v62  ;;  %v4242_v60 = vmul.f32 %v9827_v1, %v9581_v10  ;;  %v4243_v38 = vmul.f32 %v9827_v1, %v9579_v57 }
 0x44b   :  { %v4244_v59 = vmul.f32 %v9827_v1, %v9607_v6  ;;  %6507 = vtanh.f32 %v4269_v42  ;;  %v4245_v8 = vmul.f32 %v9827_v1, %v9605_v61  ;;  %v4246_v18 = vmul.f32 %v9827_v1, %v9633_v55 }
 0x44c   :  { %v4247_v25 = vmul.f32 %v9827_v1, %v9631_v11  ;;  %v4248_v62 = vmul.f32 %v9827_v1, %v9659_v26  ;;  %v4249_v10 = vmul.f32 %v9827_v1, %v9657_v34  ;;  %v4250_v57 = vmul.f32 %v9827_v1, %v9685_v35 }
 0x44d   :  { %v4251_v6 = vmul.f32 %v9827_v1, %v9683_v40  ;;  %v4252_v61 = vmul.f32 %v9827_v1, %v9711_v5  ;;  %v4253_v55 = vmul.f32 %v9827_v1, %v9709_v3  ;;  %v4254_v11 = vmul.f32 %v9827_v1, %v9737_v31 }
 0x44e   :  { %v4255_v26 = vmul.f32 %v9827_v1, %v9735_v52  ;;  %v4256_v34 = vmul.f32 %v9827_v1, %v9763_v21  ;;  %v4257_v35 = vmul.f32 %v9827_v1, %v9761_v49  ;;  %v4268_v40 = vadd.f32 %v9831_v47, %v4198_v23 }
 0x44f   :  { %v4271_v37 = vadd.f32 %v9831_v47, %v4201_v46  ;;  %v9930_v5 = vadd.f32 %v9831_v47, %v4224_v27  ;;  %v9933_v3 = vadd.f32 %v9831_v47, %v4225_v14  ;;  %v9936_v31 = vadd.f32 %v9831_v47, %v4226_v22 }
 0x450   :  { %v9939_v52 = vadd.f32 %v9831_v47, %v4227_v16  ;;  %v9942_v21 = vadd.f32 %v9831_v47, %v4228_v30  ;;  %v9945_v49 = vadd.f32 %v9831_v47, %v4229_v2  ;;  %v9948_v9 = vadd.f32 %v9831_v47, %v4230_v54 }
 0x451   :  { %v9951_v19 = vadd.f32 %v9831_v47, %v4231_v4  ;;  %v9954_v56 = vadd.f32 %v9831_v47, %v4232_v29  ;;  %v9957_v51 = vadd.f32 %v9831_v47, %v4233_v53  ;;  %v9960_v41 = vadd.f32 %v9831_v47, %v4234_v15 }
 0x452   :  { %v9963_v36 = vadd.f32 %v9831_v47, %v4235_v45  ;;  %v9966_v63 = vadd.f32 %v9831_v47, %v4236_v58  ;;  %v9969_v12 = vadd.f32 %v9831_v47, %v4237_v0  ;;  %v9972_v23 = vadd.f32 %v9831_v47, %v4238_v28 }
 0x453   :  { %v9975_v44 = vadd.f32 %v9831_v47, %v4239_v48  ;;  %v9978_v33 = vadd.f32 %v9831_v47, %v4240_v32  ;;  %v9981_v39 = vadd.f32 %v9831_v47, %v4241_v50  ;;  %v9984_v46 = vadd.f32 %v9831_v47, %v4242_v60 }
 0x454   :  { %v9987_v27 = vadd.f32 %v9831_v47, %v4243_v38  ;;  %v9990_v14 = vadd.f32 %v9831_v47, %v4244_v59  ;;  %v9993_v16 = vadd.f32 %v9831_v47, %v4245_v8  ;;  %v9996_v30 = vadd.f32 %v9831_v47, %v4246_v18  ;;  %v11110_v59 = vld [vmem:[#allocation77_spill] sm:$0xff]  ;;  %v11111_v18 = vld [vmem:[#allocation78_spill] sm:$0xff] }
 0x455   :  { %v6508_v22 = vpop.eup %6507  ;;  %v9999_v2 = vadd.f32 %v9831_v47, %v4247_v25  ;;  %v10002_v54 = vadd.f32 %v9831_v47, %v4248_v62  ;;  %v10006_v4 = vadd.f32 %v9831_v47, %v4249_v10  ;;  %v10009_v29 = vadd.f32 %v9831_v47, %v4250_v57 }
 0x456   :  { %4462 = vrot.lane.b32.xlu1 %v6508_v22, %s6706_s4  ;;  %v10012_v53 = vadd.f32 %v9831_v47, %v4251_v6  ;;  %v10015_v15 = vadd.f32 %v9831_v47, %v4252_v61  ;;  %v10018_v45 = vadd.f32 %v9831_v47, %v4253_v55  ;;  %v10021_v58 = vadd.f32 %v9831_v47, %v4254_v11  ;;  %v11114_v61 = vld [vmem:[#allocation81_spill] sm:$0xff]  ;;  %v11116_v22 = vld [vmem:[#allocation83_spill] sm:$0xff] }
 0x457   :  { %v10024_v0 = vadd.f32 %v9831_v47, %v4255_v26  ;;  %v10027_v42 = vadd.f32 %v9831_v47, %v4256_v34  ;;  %v10030_v28 = vadd.f32 %v9831_v47, %v4257_v35  ;;  %v10034_v48 = vadd.f32 %v9831_v47, %v9870_v7  ;;  %v11115_v34 = vld [vmem:[#allocation82_spill] sm:$0xff] }
 0x458   :  { %v10038_v32 = vadd.f32 %v9831_v47, %v9874_v24  ;;  %v10042_v50 = vadd.f32 %v9831_v47, %v9878_v13  ;;  %v4203_v60 = vmul.f32 %v9827_v1, %v9058_v17  ;;  %v4270_v38 = vadd.f32 %v9831_v47, %v9842_v43  ;;  %v11112_v13 = vld [vmem:[#allocation79_spill] sm:$0xff]  ;;  %v11113_v43 = vld [vmem:[#allocation80_spill] sm:$0xff] }
 0x459   :  { %6509 = vtanh.f32 %v4268_v40  ;;  %v4202_v8 = vmul.f32 %v9827_v1, %v11110_v59  ;;  %v4205_v24 = vmul.f32 %v9827_v1, %v11111_v18  ;;  %v4204_v62 = vmul.f32 %v9827_v1, %v11112_v13 }
 0x45a   :  { %v4273_v7 = vadd.f32 %v9831_v47, %v4203_v60  ;;  %6511 = vtanh.f32 %v4271_v37  ;;  %v4207_v10 = vmul.f32 %v9827_v1, %v11113_v43  ;;  %v4206_v55 = vmul.f32 %v9827_v1, %v11114_v61  ;;  %v11119_v43 = vld [vmem:[#allocation86_spill] sm:$0xff]  ;;  %v11120_v61 = vld [vmem:[#allocation87_spill] sm:$0xff] }
 0x45b   :  { %v4272_v25 = vadd.f32 %v9831_v47, %v4202_v8  ;;  %6513 = vtanh.f32 %v4270_v38  ;;  %v4275_v17 = vadd.f32 %v9831_v47, %v4205_v24  ;;  %v4274_v57 = vadd.f32 %v9831_v47, %v4204_v62  ;;  %v11117_v8 = vld [vmem:[#allocation84_spill] sm:$0xff] }
 0x45c   :  { %6515 = vtanh.f32 %v4273_v7  ;;  %v4277_v11 = vadd.f32 %v9831_v47, %v4207_v10  ;;  %v4209_v35 = vmul.f32 %v9827_v1, %v11115_v34  ;;  %v4276_v40 = vadd.f32 %v9831_v47, %v4206_v55  ;;  %v11121_v34 = vld [vmem:[#allocation88_spill] sm:$0xff] }
 0x45d   :  { %6517 = vtanh.f32 %v4272_v25  ;;  %v4208_v60 = vmul.f32 %v9827_v1, %v11116_v22  ;;  %v4211_v7 = vmul.f32 %v9827_v1, %v11117_v8  ;;  %v11118_v25 = vld [vmem:[#allocation85_spill] sm:$0xff]  ;;  %v4213_v10 = vmul.f32 %v9827_v1, %v11119_v43  ;;  %v11123_v8 = vld [vmem:[#allocation90_spill] sm:$0xff]  ;;  %v11125_v43 = vld [vmem:[#allocation92_spill] sm:$0xff] }
 0x45e   :  { %6519 = vtanh.f32 %v4275_v17  ;;  %v4279_v38 = vadd.f32 %v9831_v47, %v4209_v35  ;;  %v4210_v13 = vmul.f32 %v9827_v1, %v11118_v25  ;;  %v4212_v55 = vmul.f32 %v9827_v1, %v11120_v61  ;;  %v11122_v22 = vld [vmem:[#allocation89_spill] sm:$0xff]  ;;  %v11124_v25 = vld [vmem:[#allocation91_spill] sm:$0xff] }
 0x45f   :  { %6521 = vtanh.f32 %v4274_v57  ;;  %v4278_v18 = vadd.f32 %v9831_v47, %v4208_v60  ;;  %v4281_v62 = vadd.f32 %v9831_v47, %v4211_v7  ;;  %v4215_v35 = vmul.f32 %v9827_v1, %v11121_v34  ;;  %v11126_v61 = vld [vmem:[#allocation93_spill] sm:$0xff]  ;;  %v11127_v34 = vld [vmem:[#allocation94_spill] sm:$0xff] }
 0x460   :  { %6523 = vtanh.f32 %v4277_v11  ;;  %v4280_v57 = vadd.f32 %v9831_v47, %v4210_v13  ;;  %v4283_v11 = vadd.f32 %v9831_v47, %v4213_v10  ;;  %v4214_v60 = vmul.f32 %v9827_v1, %v11122_v22  ;;  %v11128_v22 = vld [vmem:[#allocation95_spill] sm:$0xff] }
 0x461   :  { %6525 = vtanh.f32 %v4276_v40  ;;  %v4282_v40 = vadd.f32 %v9831_v47, %v4212_v55  ;;  %v4217_v7 = vmul.f32 %v9827_v1, %v11123_v8  ;;  %v4216_v13 = vmul.f32 %v9827_v1, %v11124_v25  ;;  %v11129_v8 = vld [vmem:[#allocation96_spill] sm:$0xff]  ;;  %v11130_v25 = vld [vmem:[#allocation97_spill] sm:$0xff] }
 0x462   :  { %6527 = vtanh.f32 %v4279_v38  ;;  %v4285_v38 = vadd.f32 %v9831_v47, %v4215_v35  ;;  %v4219_v10 = vmul.f32 %v9827_v1, %v11125_v43  ;;  %v4218_v55 = vmul.f32 %v9827_v1, %v11126_v61 }
 0x463   :  { %v6510_v6 = vpop.eup %6509  ;;  %6529 = vtanh.f32 %v4278_v18  ;;  %v4284_v18 = vadd.f32 %v9831_v47, %v4214_v60  ;;  %v4221_v35 = vmul.f32 %v9827_v1, %v11127_v34  ;;  %v4220_v60 = vmul.f32 %v9827_v1, %v11128_v22  ;;  %v11131_v22 = vld [vmem:[#allocation19_spill] sm:$0xff] }
 0x464   :  { %4460 = vrot.lane.b32.xlu0 %v6510_v6, %s6706_s4  ;;  %v6512_v26 = vpop.eup %6511  ;;  %6531 = vtanh.f32 %v4281_v62  ;;  %v4287_v62 = vadd.f32 %v9831_v47, %v4217_v7  ;;  %v4223_v7 = vmul.f32 %v9827_v1, %v11129_v8 }
 0x465   :  { %4466 = vrot.lane.b32.xlu1 %v6512_v26, %s6706_s4  ;;  %v6514_v37 = vpop.eup %6513  ;;  %6533 = vtanh.f32 %v4280_v57  ;;  %v4286_v57 = vadd.f32 %v9831_v47, %v4216_v13  ;;  %v4222_v13 = vmul.f32 %v9827_v1, %v11130_v25 }
 0x466   :  { %v6516_v59 = vpop.eup %6515  ;;  %6535 = vtanh.f32 %v4283_v11  ;;  %v4289_v11 = vadd.f32 %v9831_v47, %v4219_v10 }
 0x467   :  { %v6518_v24 = vpop.eup %6517  ;;  %6537 = vtanh.f32 %v4282_v40  ;;  %v4288_v40 = vadd.f32 %v9831_v47, %v4218_v55  ;;  %v4292_v43 = vadd.f32 %v9831_v47, %v4222_v13  ;;  %v11134_v13 = vld [vmem:[#allocation20_spill] sm:$0xff] }
 0x468   :  { %4464 = vrot.lane.b32.xlu0 %v6514_v37, %s6706_s4  ;;  %v6520_v17 = vpop.eup %6519  ;;  %6539 = vtanh.f32 %v4285_v38  ;;  %v4291_v38 = vadd.f32 %v9831_v47, %v4221_v35 }
 0x469   :  { %4470 = vrot.lane.b32.xlu1 %v6516_v59, %s6706_s4  ;;  %v6522_v6 = vpop.eup %6521  ;;  %6541 = vtanh.f32 %v4284_v18  ;;  %v4290_v18 = vadd.f32 %v9831_v47, %v4220_v60 }
 0x46a   :  { %v6524_v26 = vpop.eup %6523  ;;  %6543 = vtanh.f32 %v4287_v62  ;;  %v4293_v62 = vadd.f32 %v9831_v47, %v4223_v7 }
 0x46b   :  { %v6526_v37 = vpop.eup %6525  ;;  %6545 = vtanh.f32 %v4286_v57 }
 0x46c   :  { %4468 = vrot.lane.b32.xlu0 %v6518_v24, %s6706_s4  ;;  %v6528_v59 = vpop.eup %6527  ;;  %6547 = vtanh.f32 %v4289_v11 }
 0x46d   :  { %4474 = vrot.lane.b32.xlu1 %v6520_v17, %s6706_s4  ;;  %v6530_v24 = vpop.eup %6529  ;;  %6549 = vtanh.f32 %v4288_v40 }
 0x46e   :  { %v6532_v17 = vpop.eup %6531  ;;  %6551 = vtanh.f32 %v4291_v38 }
 0x46f   :  { %6553 = vtanh.f32 %v4290_v18  ;;  %v11133_v18 = vld [vmem:[#allocation24_spill] sm:$0xff] }
 0x470   :  { %4472 = vrot.lane.b32.xlu0 %v6522_v6, %s6706_s4  ;;  %v6534_v6 = vpop.eup %6533  ;;  %6555 = vtanh.f32 %v4293_v62 }
 0x471   :  { %4478 = vrot.lane.b32.xlu1 %v6524_v26, %s6706_s4  ;;  %v6536_v26 = vpop.eup %6535  ;;  %6557 = vtanh.f32 %v4292_v43  ;;  %v11135_v43 = vld [vmem:[#allocation26_spill] sm:$0xff] }
 0x472   :  { %6559 = vtanh.f32 %v9933_v3 }
 0x473   :  { %6561 = vtanh.f32 %v9930_v5 }
 0x474   :  { %4476 = vrot.lane.b32.xlu0 %v6526_v37, %s6706_s4  ;;  %v6538_v37 = vpop.eup %6537  ;;  %6563 = vtanh.f32 %v9939_v52 }
 0x475   :  { %4482 = vrot.lane.b32.xlu1 %v6528_v59, %s6706_s4  ;;  %v6540_v59 = vpop.eup %6539  ;;  %6565 = vtanh.f32 %v9936_v31 }
 0x476   :  { %6567 = vtanh.f32 %v9945_v49 }
 0x477   :  { %6569 = vtanh.f32 %v9942_v21 }
 0x478   :  { %4480 = vrot.lane.b32.xlu0 %v6530_v24, %s6706_s4  ;;  %v6542_v24 = vpop.eup %6541  ;;  %6571 = vtanh.f32 %v9951_v19 }
 0x479   :  { %4486 = vrot.lane.b32.xlu1 %v6532_v17, %s6706_s4  ;;  %v6544_v17 = vpop.eup %6543  ;;  %6573 = vtanh.f32 %v9948_v9 }
 0x47a   :  { %v6546_v10 = vpop.eup %6545  ;;  %6575 = vtanh.f32 %v9957_v51 }
 0x47b   :  { %v6548_v57 = vpop.eup %6547  ;;  %6577 = vtanh.f32 %v9954_v56 }
 0x47c   :  { %4484 = vrot.lane.b32.xlu0 %v6534_v6, %s6706_s4  ;;  %v6550_v1 = vpop.eup %6549  ;;  %6579 = vtanh.f32 %v9963_v36 }
 0x47d   :  { %4490 = vrot.lane.b32.xlu1 %v6536_v26, %s6706_s4  ;;  %v6552_v6 = vpop.eup %6551  ;;  %6581 = vtanh.f32 %v9960_v41 }
 0x47e   :  { %v6554_v47 = vpop.eup %6553  ;;  %6583 = vtanh.f32 %v9969_v12 }
 0x47f   :  { %v6556_v61 = vpop.eup %6555  ;;  %6585 = vtanh.f32 %v9966_v63 }
 0x480   :  { %4488 = vrot.lane.b32.xlu0 %v6538_v37, %s6706_s4  ;;  %v6558_v55 = vpop.eup %6557  ;;  %6587 = vtanh.f32 %v9975_v44 }
 0x481   :  { %4494 = vrot.lane.b32.xlu1 %v6540_v59, %s6706_s4  ;;  %v6560_v3 = vpop.eup %6559  ;;  %6589 = vtanh.f32 %v9972_v23  ;;  %v11132_v59 = vld [vmem:[#allocation33_spill] sm:$0xff] }
 0x482   :  { %v6562_v5 = vpop.eup %6561  ;;  %6591 = vtanh.f32 %v9981_v39 }
 0x483   :  { %v6564_v52 = vpop.eup %6563  ;;  %6593 = vtanh.f32 %v9978_v33 }
 0x484   :  { %4492 = vrot.lane.b32.xlu0 %v6542_v24, %s6706_s4  ;;  %v6566_v31 = vpop.eup %6565  ;;  %6595 = vtanh.f32 %v9987_v27 }
 0x485   :  { %4498 = vrot.lane.b32.xlu1 %v6544_v17, %s6706_s4  ;;  %v6568_v49 = vpop.eup %6567  ;;  %6597 = vtanh.f32 %v9984_v46 }
 0x486   :  { %v6570_v21 = vpop.eup %6569  ;;  %6599 = vtanh.f32 %v9993_v16 }
 0x487   :  { %v6572_v19 = vpop.eup %6571  ;;  %6601 = vtanh.f32 %v9990_v14 }
 0x488   :  { %4496 = vrot.lane.b32.xlu0 %v6546_v10, %s6706_s4  ;;  %v6574_v9 = vpop.eup %6573  ;;  %6603 = vtanh.f32 %v9999_v2 }
 0x489   :  { %4502 = vrot.lane.b32.xlu1 %v6548_v57, %s6706_s4  ;;  %v6576_v51 = vpop.eup %6575  ;;  %6605 = vtanh.f32 %v9996_v30 }
 0x48a   :  { %v6578_v56 = vpop.eup %6577  ;;  %6607 = vtanh.f32 %v10006_v4 }
 0x48b   :  { %v6580_v36 = vpop.eup %6579  ;;  %6609 = vtanh.f32 %v10002_v54 }
 0x48c   :  { %4500 = vrot.lane.b32.xlu0 %v6550_v1, %s6706_s4  ;;  %v6582_v41 = vpop.eup %6581  ;;  %6611 = vtanh.f32 %v10012_v53  ;;  %v11136_v1 = vld [vmem:[#allocation22_spill] sm:$0xff] }
 0x48d   :  { %4506 = vrot.lane.b32.xlu1 %v6552_v6, %s6706_s4  ;;  %v6584_v12 = vpop.eup %6583  ;;  %6613 = vtanh.f32 %v10009_v29 }
 0x48e   :  { %v6586_v63 = vpop.eup %6585  ;;  %6615 = vtanh.f32 %v10018_v45 }
 0x48f   :  { %v6588_v44 = vpop.eup %6587  ;;  %6617 = vtanh.f32 %v10015_v15 }
 0x490   :  { %4504 = vrot.lane.b32.xlu0 %v6554_v47, %s6706_s4  ;;  %v6590_v23 = vpop.eup %6589  ;;  %6619 = vtanh.f32 %v10024_v0 }
 0x491   :  { %4510 = vrot.lane.b32.xlu1 %v6556_v61, %s6706_s4  ;;  %v6592_v39 = vpop.eup %6591  ;;  %6621 = vtanh.f32 %v10021_v58  ;;  %v11137_v61 = vld [vmem:[#allocation27_spill] sm:$0xff] }
 0x492   :  { %v6594_v33 = vpop.eup %6593  ;;  %6623 = vtanh.f32 %v10030_v28 }
 0x493   :  { %v6596_v27 = vpop.eup %6595  ;;  %6625 = vtanh.f32 %v10027_v42 }
 0x494   :  { %4508 = vrot.lane.b32.xlu0 %v6558_v55, %s6706_s4  ;;  %v6598_v46 = vpop.eup %6597  ;;  %6627 = vtanh.f32 %v10038_v32 }
 0x495   :  { %4514 = vrot.lane.b32.xlu1 %v6560_v3, %s6706_s4  ;;  %v6600_v16 = vpop.eup %6599  ;;  %6629 = vtanh.f32 %v10034_v48 }
 0x496   :  { %v6602_v14 = vpop.eup %6601  ;;  %6631 = vtanh.f32 %v10042_v50 }
 0x497   :  { %v6604_v2 = vpop.eup %6603  ;;  %6633 = vtanh.f32 %v9834_v20 }
 0x498   :  { %4512 = vrot.lane.b32.xlu0 %v6562_v5, %s6706_s4  ;;  %v6606_v30 = vpop.eup %6605  ;;  %v11138_v5 = vld [vmem:[#allocation25_spill] sm:$0xff] }
 0x499   :  { %4518 = vrot.lane.b32.xlu1 %v6564_v52, %s6706_s4  ;;  %v6608_v4 = vpop.eup %6607 }
 0x49a   :  { %v6610_v54 = vpop.eup %6609 }
 0x49b   :  { %v6612_v53 = vpop.eup %6611 }
 0x49c   :  { %4516 = vrot.lane.b32.xlu0 %v6566_v31, %s6706_s4  ;;  %v6614_v29 = vpop.eup %6613 }
 0x49d   :  { %4522 = vrot.lane.b32.xlu1 %v6568_v49, %s6706_s4  ;;  %v6616_v45 = vpop.eup %6615  ;;  %v11139_v49 = vld [vmem:[#allocation11_spill] sm:$0xff] }
 0x49e   :  { %v6618_v15 = vpop.eup %6617 }
 0x49f   :  { %v6620_v0 = vpop.eup %6619 }
 0x4a0   :  { %4520 = vrot.lane.b32.xlu0 %v6570_v21, %s6706_s4  ;;  %v6622_v11 = vpop.eup %6621 }
 0x4a1   :  { %4526 = vrot.lane.b32.xlu1 %v6572_v19, %s6706_s4  ;;  %v6624_v28 = vpop.eup %6623 }
 0x4a2   :  { %v6626_v32 = vpop.eup %6625 }
 0x4a3   :  { %v6628_v34 = vpop.eup %6627 }
 0x4a4   :  { %4524 = vrot.lane.b32.xlu0 %v6574_v9, %s6706_s4  ;;  %v6630_v35 = vpop.eup %6629  ;;  %v11140_v9 = vld [vmem:[#allocation9_spill] sm:$0xff] }
 0x4a5   :  { %4530 = vrot.lane.b32.xlu1 %v6576_v51, %s6706_s4  ;;  %v6632_v40 = vpop.eup %6631 }
 0x4a6   :  { %v6634_v20 = vpop.eup %6633 }
 0x4a8   :  { %4528 = vrot.lane.b32.xlu0 %v6578_v56, %s6706_s4 }
 0x4a9   :  { %4534 = vrot.lane.b32.xlu1 %v6580_v36, %s6706_s4  ;;  %v11141_v36 = vld [vmem:[#allocation12_spill] sm:$0xff] }
 0x4ac   :  { %4532 = vrot.lane.b32.xlu0 %v6582_v41, %s6706_s4 }
 0x4ad   :  { %4538 = vrot.lane.b32.xlu1 %v6584_v12, %s6706_s4 }
 0x4b0   :  { %4536 = vrot.lane.b32.xlu0 %v6586_v63, %s6706_s4  ;;  %v11142_v63 = vld [vmem:[#allocation10_spill] sm:$0xff] }
 0x4b1   :  { %4542 = vrot.lane.b32.xlu1 %v6588_v44, %s6706_s4 }
 0x4b4   :  { %4540 = vrot.lane.b32.xlu0 %v6590_v23, %s6706_s4 }
 0x4b5   :  { %4546 = vrot.lane.b32.xlu1 %v6592_v39, %s6706_s4  ;;  %v11143_v39 = vld [vmem:[#allocation18_spill] sm:$0xff] }
 0x4b8   :  { %4544 = vrot.lane.b32.xlu0 %v6594_v33, %s6706_s4 }
 0x4b9   :  { %4550 = vrot.lane.b32.xlu1 %v6596_v27, %s6706_s4 }
 0x4bc   :  { %4548 = vrot.lane.b32.xlu0 %v6598_v46, %s6706_s4  ;;  %v11144_v46 = vld [vmem:[#allocation29_spill] sm:$0xff] }
 0x4bd   :  { %4554 = vrot.lane.b32.xlu1 %v6600_v16, %s6706_s4 }
 0x4c0   :  { %4552 = vrot.lane.b32.xlu0 %v6602_v14, %s6706_s4 }
 0x4c1   :  { %4558 = vrot.lane.b32.xlu1 %v6604_v2, %s6706_s4  ;;  %v11145_v2 = vld [vmem:[#allocation34_spill] sm:$0xff] }
 0x4c4   :  { %4556 = vrot.lane.b32.xlu0 %v6606_v30, %s6706_s4 }
 0x4c5   :  { %4562 = vrot.lane.b32.xlu1 %v6608_v4, %s6706_s4 }
 0x4c8   :  { %4560 = vrot.lane.b32.xlu0 %v6610_v54, %s6706_s4  ;;  %v4463_v58 = vpop.permute.xlu1 %4462  ;;  %v11146_v54 = vld [vmem:[#allocation30_spill] sm:$0xff] }
 0x4c9   :  { %4566 = vrot.lane.b32.xlu1 %v6612_v53, %s6706_s4  ;;  %v4653_v60 = vmul.f32 %v11131_v22, %v4463_v58  ;;  %v11148_v58 = vld [vmem:[#allocation35_spill] sm:$0xff] }
 0x4cc   :  { %4564 = vrot.lane.b32.xlu0 %v6614_v29, %s6706_s4 }
 0x4cd   :  { %4570 = vrot.lane.b32.xlu1 %v6616_v45, %s6706_s4  ;;  %v11147_v45 = vld [vmem:[#allocation36_spill] sm:$0xff] }
 0x4d0   :  { %4568 = vrot.lane.b32.xlu0 %v6618_v15, %s6706_s4 }
 0x4d1   :  { %4574 = vrot.lane.b32.xlu1 %v6620_v0, %s6706_s4 }
 0x4d4   :  { %4572 = vrot.lane.b32.xlu0 %v6622_v11, %s6706_s4 }
 0x4d5   :  { %4578 = vrot.lane.b32.xlu1 %v6624_v28, %s6706_s4 }
 0x4d6   :  { %v4461_v42 = vpop.permute.xlu0 %4460 }
 0x4d7   :  { %v4467_v26 = vpop.permute.xlu1 %4466  ;;  %v4652_v8 = vmul.f32 %v11132_v59, %v4461_v42  ;;  %v11149_v42 = vld [vmem:[#allocation38_spill] sm:$0xff] }
 0x4d8   :  { %4576 = vrot.lane.b32.xlu0 %v6626_v32, %s6706_s4  ;;  %v4655_v24 = vmul.f32 %v11133_v18, %v4467_v26 }
 0x4d9   :  { %4582 = vrot.lane.b32.xlu1 %v6628_v34, %s6706_s4  ;;  %v11150_v34 = vld [vmem:[#allocation37_spill] sm:$0xff] }
 0x4da   :  { %v4465_v48 = vpop.permute.xlu0 %4464 }
 0x4db   :  { %v4471_v50 = vpop.permute.xlu1 %4470  ;;  %v4654_v62 = vmul.f32 %v11134_v13, %v4465_v48 }
 0x4dc   :  { %4580 = vrot.lane.b32.xlu0 %v6630_v35, %s6706_s4  ;;  %v4657_v10 = vmul.f32 %v11135_v43, %v4471_v50  ;;  %v11151_v50 = vld [vmem:[#allocation40_spill] sm:$0xff] }
 0x4dd   :  { %4586 = vrot.lane.b32.xlu1 %v6632_v40, %s6706_s4 }
 0x4de   :  { %v4469_v37 = vpop.permute.xlu0 %4468 }
 0x4df   :  { %v4475_v38 = vpop.permute.xlu1 %4474  ;;  %v4656_v6 = vmul.f32 %v11136_v1, %v4469_v37 }
 0x4e0   :  { %4584 = vrot.lane.b32.xlu0 %v6634_v20, %s6706_s4  ;;  %v4659_v55 = vmul.f32 %v11137_v61, %v4475_v38  ;;  %v11152_v20 = vld [vmem:[#allocation39_spill] sm:$0xff]  ;;  %v11153_v38 = vld [vmem:[#allocation42_spill] sm:$0xff] }
 0x4e1   :  { %4846 = vrot.lane.b32.xlu1 %v4653_v60, %s6707_s6 }
 0x4e2   :  { %v4473_v7 = vpop.permute.xlu0 %4472 }
 0x4e3   :  { %v4479_v25 = vpop.permute.xlu1 %4478  ;;  %v4658_v52 = vmul.f32 %v11138_v5, %v4473_v7  ;;  %v11154_v7 = vld [vmem:[#allocation41_spill] sm:$0xff] }
 0x4e4   :  { %4844 = vrot.lane.b32.xlu0 %v4652_v8, %s6707_s6  ;;  %v4661_v21 = vmul.f32 %v11139_v49, %v4479_v25  ;;  %v11155_v25 = vld [vmem:[#allocation44_spill] sm:$0xff] }
 0x4e5   :  { %4850 = vrot.lane.b32.xlu1 %v4655_v24, %s6707_s6 }
 0x4e6   :  { %v4477_v17 = vpop.permute.xlu0 %4476 }
 0x4e7   :  { %v4483_v57 = vpop.permute.xlu1 %4482  ;;  %v4660_v51 = vmul.f32 %v11140_v9, %v4477_v17  ;;  %v11156_v17 = vld [vmem:[#allocation43_spill] sm:$0xff] }
 0x4e8   :  { %4848 = vrot.lane.b32.xlu0 %v4654_v62, %s6707_s6  ;;  %v4663_v41 = vmul.f32 %v11141_v36, %v4483_v57  ;;  %v11157_v57 = vld [vmem:[#allocation46_spill] sm:$0xff] }
 0x4e9   :  { %4854 = vrot.lane.b32.xlu1 %v4657_v10, %s6707_s6 }
 0x4ea   :  { %v4481_v47 = vpop.permute.xlu0 %4480 }
 0x4eb   :  { %v4487_v3 = vpop.permute.xlu1 %4486  ;;  %v4662_v44 = vmul.f32 %v11142_v63, %v4481_v47  ;;  %v11158_v47 = vld [vmem:[#allocation45_spill] sm:$0xff] }
 0x4ec   :  { %4852 = vrot.lane.b32.xlu0 %v4656_v6, %s6707_s6  ;;  %v4665_v33 = vmul.f32 %v11143_v39, %v4487_v3  ;;  %v11159_v3 = vld [vmem:[#allocation47_spill] sm:$0xff] }
 0x4ed   :  { %4858 = vrot.lane.b32.xlu1 %v4659_v55, %s6707_s6 }
 0x4ee   :  { %v4485_v31 = vpop.permute.xlu0 %4484 }
 0x4ef   :  { %v4491_v19 = vpop.permute.xlu1 %4490  ;;  %v4664_v16 = vmul.f32 %v11144_v46, %v4485_v31  ;;  %v11160_v31 = vld [vmem:[#allocation13_spill] sm:$0xff] }
 0x4f0   :  { %4856 = vrot.lane.b32.xlu0 %v4658_v52, %s6707_s6  ;;  %v4667_v30 = vmul.f32 %v11145_v2, %v4491_v19  ;;  %v11161_v19 = vld [vmem:[#allocation49_spill] sm:$0xff] }
 0x4f1   :  { %4862 = vrot.lane.b32.xlu1 %v4661_v21, %s6707_s6 }
 0x4f2   :  { %v4489_v56 = vpop.permute.xlu0 %4488 }
 0x4f3   :  { %v4495_v12 = vpop.permute.xlu1 %4494  ;;  %v4666_v53 = vmul.f32 %v11146_v54, %v4489_v56  ;;  %v11162_v56 = vld [vmem:[#allocation48_spill] sm:$0xff] }
 0x4f4   :  { %4860 = vrot.lane.b32.xlu0 %v4660_v51, %s6707_s6  ;;  %v4669_v15 = vmul.f32 %v11147_v45, %v4495_v12  ;;  %v11163_v12 = vld [vmem:[#allocation50_spill] sm:$0xff] }
 0x4f5   :  { %4866 = vrot.lane.b32.xlu1 %v4663_v41, %s6707_s6 }
 0x4f6   :  { %v4493_v23 = vpop.permute.xlu0 %4492 }
 0x4f7   :  { %v4499_v27 = vpop.permute.xlu1 %4498  ;;  %v4668_v11 = vmul.f32 %v11148_v58, %v4493_v23  ;;  %v11164_v23 = vld [vmem:[#allocation15_spill] sm:$0xff] }
 0x4f8   :  { %4864 = vrot.lane.b32.xlu0 %v4662_v44, %s6707_s6  ;;  %v4671_v32 = vmul.f32 %v11149_v42, %v4499_v27  ;;  %v11165_v27 = vld [vmem:[#allocation14_spill] sm:$0xff] }
 0x4f9   :  { %4870 = vrot.lane.b32.xlu1 %v4665_v33, %s6707_s6 }
 0x4fa   :  { %v4497_v14 = vpop.permute.xlu0 %4496 }
 0x4fb   :  { %v4503_v4 = vpop.permute.xlu1 %4502  ;;  %v4670_v48 = vmul.f32 %v11150_v34, %v4497_v14  ;;  %v11166_v14 = vld [vmem:[#allocation16_spill] sm:$0xff] }
 0x4fc   :  { %4868 = vrot.lane.b32.xlu0 %v4664_v16, %s6707_s6  ;;  %v4673_v40 = vmul.f32 %v11151_v50, %v4503_v4  ;;  %v11167_v4 = vld [vmem:[#allocation51_spill] sm:$0xff] }
 0x4fd   :  { %4874 = vrot.lane.b32.xlu1 %v4667_v30, %s6707_s6 }
 0x4fe   :  { %v4501_v29 = vpop.permute.xlu0 %4500 }
 0x4ff   :  { %v4507_v0 = vpop.permute.xlu1 %4506  ;;  %v4672_v22 = vmul.f32 %v11152_v20, %v4501_v29  ;;  %v11168_v29 = vld [vmem:[#allocation28_spill] sm:$0xff] }
 0x500   :  { %4872 = vrot.lane.b32.xlu0 %v4666_v53, %s6707_s6  ;;  %v4675_v59 = vmul.f32 %v11153_v38, %v4507_v0  ;;  %v11169_v0 = vld [vmem:[#allocation52_spill] sm:$0xff] }
 0x501   :  { %4878 = vrot.lane.b32.xlu1 %v4669_v15, %s6707_s6 }
 0x502   :  { %v4505_v28 = vpop.permute.xlu0 %4504 }
 0x503   :  { %v4511_v26 = vpop.permute.xlu1 %4510  ;;  %v4674_v18 = vmul.f32 %v11154_v7, %v4505_v28  ;;  %v11170_v28 = vld [vmem:[#allocation17_spill] sm:$0xff] }
 0x504   :  { %4876 = vrot.lane.b32.xlu0 %v4668_v11, %s6707_s6  ;;  %v4677_v13 = vmul.f32 %v11155_v25, %v4511_v26  ;;  %v11171_v26 = vld [vmem:[#allocation54_spill] sm:$0xff] }
 0x505   :  { %4882 = vrot.lane.b32.xlu1 %v4671_v32, %s6707_s6 }
 0x506   :  { %v4509_v35 = vpop.permute.xlu0 %4508 }
 0x507   :  { %v4515_v37 = vpop.permute.xlu1 %4514  ;;  %v4676_v43 = vmul.f32 %v11156_v17, %v4509_v35  ;;  %v11172_v35 = vld [vmem:[#allocation53_spill] sm:$0xff] }
 0x508   :  { %4880 = vrot.lane.b32.xlu0 %v4670_v48, %s6707_s6  ;;  %v4679_v1 = vmul.f32 %v11157_v57, %v4515_v37  ;;  %v11173_v37 = vld [vmem:[#allocation56_spill] sm:$0xff] }
 0x509   :  { %4886 = vrot.lane.b32.xlu1 %v4673_v40, %s6707_s6 }
 0x50a   :  { %v4513_v60 = vpop.permute.xlu0 %4512 }
 0x50b   :  { %v4519_v8 = vpop.permute.xlu1 %4518  ;;  %v4678_v61 = vmul.f32 %v11158_v47, %v4513_v60  ;;  %v11174_v60 = vld [vmem:[#allocation55_spill] sm:$0xff] }
 0x50c   :  { %4884 = vrot.lane.b32.xlu0 %v4672_v22, %s6707_s6  ;;  %v4681_v5 = vmul.f32 %v11159_v3, %v4519_v8  ;;  %v11175_v8 = vld [vmem:[#allocation23_spill] sm:$0xff] }
 0x50d   :  { %4890 = vrot.lane.b32.xlu1 %v4675_v59, %s6707_s6 }
 0x50e   :  { %v4517_v24 = vpop.permute.xlu0 %4516 }
 0x50f   :  { %v4523_v62 = vpop.permute.xlu1 %4522  ;;  %v4680_v49 = vmul.f32 %v11160_v31, %v4517_v24  ;;  %v11176_v24 = vld [vmem:[#allocation57_spill] sm:$0xff] }
 0x510   :  { %4888 = vrot.lane.b32.xlu0 %v4674_v18, %s6707_s6  ;;  %v4683_v9 = vmul.f32 %v11161_v19, %v4523_v62  ;;  %v11177_v62 = vld [vmem:[#allocation31_spill] sm:$0xff] }
 0x511   :  { %4894 = vrot.lane.b32.xlu1 %v4677_v13, %s6707_s6 }
 0x512   :  { %v4521_v10 = vpop.permute.xlu0 %4520 }
 0x513   :  { %v4527_v6 = vpop.permute.xlu1 %4526  ;;  %v4682_v36 = vmul.f32 %v11162_v56, %v4521_v10  ;;  %v11178_v10 = vld [vmem:[#allocation58_spill] sm:$0xff] }
 0x514   :  { %4892 = vrot.lane.b32.xlu0 %v4676_v43, %s6707_s6  ;;  %v4685_v63 = vmul.f32 %v11163_v12, %v4527_v6  ;;  %v11179_v6 = vld [vmem:[#allocation59_spill] sm:$0xff] }
 0x515   :  { %4898 = vrot.lane.b32.xlu1 %v4679_v1, %s6707_s6 }
 0x516   :  { %v4525_v55 = vpop.permute.xlu0 %4524 }
 0x517   :  { %v4531_v52 = vpop.permute.xlu1 %4530  ;;  %v4684_v39 = vmul.f32 %v11164_v23, %v4525_v55  ;;  %v11180_v55 = vld [vmem:[#allocation32_spill] sm:$0xff] }
 0x518   :  { %4896 = vrot.lane.b32.xlu0 %v4678_v61, %s6707_s6  ;;  %v4687_v46 = vmul.f32 %v11165_v27, %v4531_v52  ;;  %v11181_v52 = vld [vmem:[#allocation61_spill] sm:$0xff] }
 0x519   :  { %4902 = vrot.lane.b32.xlu1 %v4681_v5, %s6707_s6 }
 0x51a   :  { %v4529_v21 = vpop.permute.xlu0 %4528 }
 0x51b   :  { %v4535_v51 = vpop.permute.xlu1 %4534  ;;  %v4686_v2 = vmul.f32 %v11166_v14, %v4529_v21  ;;  %v11182_v21 = vld [vmem:[#allocation60_spill] sm:$0xff] }
 0x51c   :  { %4900 = vrot.lane.b32.xlu0 %v4680_v49, %s6707_s6  ;;  %v4689_v54 = vmul.f32 %v11167_v4, %v4535_v51  ;;  %v11183_v51 = vld [vmem:[#allocation63_spill] sm:$0xff] }
 0x51d   :  { %4906 = vrot.lane.b32.xlu1 %v4683_v9, %s6707_s6 }
 0x51e   :  { %v4533_v41 = vpop.permute.xlu0 %4532 }
 0x51f   :  { %v4539_v44 = vpop.permute.xlu1 %4538  ;;  %v4688_v45 = vmul.f32 %v11168_v29, %v4533_v41  ;;  %v11184_v41 = vld [vmem:[#allocation62_spill] sm:$0xff]  ;;  %v11189_v29 = vld [vmem:[#allocation69_spill] sm:$0xff] }
 0x520   :  { %4904 = vrot.lane.b32.xlu0 %v4682_v36, %s6707_s6  ;;  %v4691_v58 = vmul.f32 %v11169_v0, %v4539_v44  ;;  %v11185_v44 = vld [vmem:[#allocation65_spill] sm:$0xff] }
 0x521   :  { %4910 = vrot.lane.b32.xlu1 %v4685_v63, %s6707_s6  ;;  %v4716_v0 = vld [vmem:[%s10722_s2] sm:$0xff] }
 0x522   :  { %v4537_v33 = vpop.permute.xlu0 %4536 }
 0x523   :  { %v4543_v16 = vpop.permute.xlu1 %4542  ;;  %v4690_v42 = vmul.f32 %v11170_v28, %v4537_v33  ;;  %v11186_v33 = vld [vmem:[#allocation64_spill] sm:$0xff] }
 0x524   :  { %4908 = vrot.lane.b32.xlu0 %v4684_v39, %s6707_s6  ;;  %v4693_v34 = vmul.f32 %v11171_v26, %v4543_v16  ;;  %v11187_v16 = vld [vmem:[#allocation67_spill] sm:$0xff] }
 0x525   :  { %4914 = vrot.lane.b32.xlu1 %v4687_v46, %s6707_s6 }
 0x526   :  { %v4541_v30 = vpop.permute.xlu0 %4540 }
 0x527   :  { %v4547_v53 = vpop.permute.xlu1 %4546  ;;  %v4692_v50 = vmul.f32 %v11172_v35, %v4541_v30  ;;  %v11188_v30 = vld [vmem:[#allocation66_spill] sm:$0xff] }
 0x528   :  { %4912 = vrot.lane.b32.xlu0 %v4686_v2, %s6707_s6  ;;  %v4695_v20 = vmul.f32 %v11173_v37, %v4547_v53  ;;  %v4717_v53 = vld [vmem:[%s10722_s2 + $0x8] sm:$0xff]  ;;  %v11192_v37 = vld [vmem:[#allocation73_spill] sm:$0xff] }
 0x529   :  { %4918 = vrot.lane.b32.xlu1 %v4689_v54, %s6707_s6 }
 0x52a   :  { %v4545_v15 = vpop.permute.xlu0 %4544 }
 0x52b   :  { %v4551_v11 = vpop.permute.xlu1 %4550  ;;  %v4694_v38 = vmul.f32 %v11174_v60, %v4545_v15  ;;  %v4721_v60 = vld [vmem:[%s10722_s2 + $0x28] sm:$0xff] }
 0x52c   :  { %4916 = vrot.lane.b32.xlu0 %v4688_v45, %s6707_s6  ;;  %v4697_v7 = vmul.f32 %v11175_v8, %v4551_v11  ;;  %v11190_v11 = vld [vmem:[#allocation68_spill] sm:$0xff] }
 0x52d   :  { %4922 = vrot.lane.b32.xlu1 %v4691_v58, %s6707_s6 }
 0x52e   :  { %v4549_v32 = vpop.permute.xlu0 %4548 }
 0x52f   :  { %v4555_v48 = vpop.permute.xlu1 %4554  ;;  %v4696_v25 = vmul.f32 %v11176_v24, %v4549_v32  ;;  %v4719_v32 = vld [vmem:[%s10722_s2 + $0x18] sm:$0xff] }
 0x530   :  { %4920 = vrot.lane.b32.xlu0 %v4690_v42, %s6707_s6  ;;  %v4699_v17 = vmul.f32 %v11177_v62, %v4555_v48 }
 0x531   :  { %4926 = vrot.lane.b32.xlu1 %v4693_v34, %s6707_s6  ;;  %v11191_v34 = vld [vmem:[#allocation72_spill] sm:$0xff] }
 0x532   :  { %v4553_v40 = vpop.permute.xlu0 %4552 }
 0x533   :  { %v4559_v22 = vpop.permute.xlu1 %4558  ;;  %v4698_v57 = vmul.f32 %v11178_v10, %v4553_v40 }
 0x534   :  { %4924 = vrot.lane.b32.xlu0 %v4692_v50, %s6707_s6  ;;  %v4701_v47 = vmul.f32 %v11179_v6, %v4559_v22  ;;  %v4718_v50 = vld [vmem:[%s10722_s2 + $0x10] sm:$0xff] }
 0x535   :  { %4930 = vrot.lane.b32.xlu1 %v4695_v20, %s6707_s6 }
 0x536   :  { %v4557_v59 = vpop.permute.xlu0 %4556 }
 0x537   :  { %v4563_v18 = vpop.permute.xlu1 %4562  ;;  %v4700_v3 = vmul.f32 %v11180_v55, %v4557_v59  ;;  %v11193_v59 = vld [vmem:[#allocation76_spill] sm:$0xff] }
 0x538   :  { %4928 = vrot.lane.b32.xlu0 %v4694_v38, %s6707_s6  ;;  %v4703_v31 = vmul.f32 %v11181_v52, %v4563_v18  ;;  %v4720_v18 = vld [vmem:[%s10722_s2 + $0x20] sm:$0xff] }
 0x539   :  { %4934 = vrot.lane.b32.xlu1 %v4697_v7, %s6707_s6 }
 0x53a   :  { %v4561_v13 = vpop.permute.xlu0 %4560 }
 0x53b   :  { %v4567_v43 = vpop.permute.xlu1 %4566  ;;  %v4702_v19 = vmul.f32 %v11182_v21, %v4561_v13 }
 0x53c   :  { %4932 = vrot.lane.b32.xlu0 %v4696_v25, %s6707_s6  ;;  %v4705_v56 = vmul.f32 %v11183_v51, %v4567_v43  ;;  %v11194_v25 = vld [vmem:[#allocation75_spill] sm:$0xff] }
 0x53d   :  { %4938 = vrot.lane.b32.xlu1 %v4699_v17, %s6707_s6  ;;  %v4723_v17 = vld [vmem:[%s10722_s2 + $0x38] sm:$0xff] }
 0x53e   :  { %v4565_v1 = vpop.permute.xlu0 %4564 }
 0x53f   :  { %v4571_v61 = vpop.permute.xlu1 %4570  ;;  %v4704_v12 = vmul.f32 %v11184_v41, %v4565_v1 }
 0x540   :  { %4936 = vrot.lane.b32.xlu0 %v4698_v57, %s6707_s6  ;;  %v4707_v23 = vmul.f32 %v11185_v44, %v4571_v61  ;;  %v4722_v57 = vld [vmem:[%s10722_s2 + $0x30] sm:$0xff] }
 0x541   :  { %4942 = vrot.lane.b32.xlu1 %v4701_v47, %s6707_s6  ;;  %v4725_v47 = vld [vmem:[%s10722_s2 + $0x48] sm:$0xff] }
 0x542   :  { %v4569_v5 = vpop.permute.xlu0 %4568 }
 0x543   :  { %v4575_v49 = vpop.permute.xlu1 %4574  ;;  %v4706_v27 = vmul.f32 %v11186_v33, %v4569_v5 }
 0x544   :  { %4940 = vrot.lane.b32.xlu0 %v4700_v3, %s6707_s6  ;;  %v4709_v14 = vmul.f32 %v11187_v16, %v4575_v49  ;;  %v4724_v3 = vld [vmem:[%s10722_s2 + $0x40] sm:$0xff] }
 0x545   :  { %4946 = vrot.lane.b32.xlu1 %v4703_v31, %s6707_s6  ;;  %v4727_v31 = vld [vmem:[%s10722_s2 + $0x58] sm:$0xff] }
 0x546   :  { %v4573_v9 = vpop.permute.xlu0 %4572 }
 0x547   :  { %v4579_v36 = vpop.permute.xlu1 %4578  ;;  %v4708_v4 = vmul.f32 %v11188_v30, %v4573_v9 }
 0x548   :  { %4944 = vrot.lane.b32.xlu0 %v4702_v19, %s6707_s6  ;;  %v4711_v45 = vmul.f32 %v11189_v29, %v4579_v36  ;;  %v4726_v19 = vld [vmem:[%s10722_s2 + $0x50] sm:$0xff]  ;;  %v4735_v29 = vld [vmem:[%s10722_s2 + $0x98] sm:$0xff] }
 0x549   :  { %4950 = vrot.lane.b32.xlu1 %v4705_v56, %s6707_s6  ;;  %v4729_v56 = vld [vmem:[%s10722_s2 + $0x68] sm:$0xff] }
 0x54a   :  { %v4577_v63 = vpop.permute.xlu0 %4576 }
 0x54b   :  { %v4583_v39 = vpop.permute.xlu1 %4582  ;;  %v4710_v28 = vmul.f32 %v11190_v11, %v4577_v63 }
 0x54c   :  { %4948 = vrot.lane.b32.xlu0 %v4704_v12, %s6707_s6  ;;  %v4713_v48 = vmul.f32 %v11191_v34, %v4583_v39  ;;  %v4728_v12 = vld [vmem:[%s10722_s2 + $0x60] sm:$0xff] }
 0x54d   :  { %4954 = vrot.lane.b32.xlu1 %v4707_v23, %s6707_s6  ;;  %v4731_v23 = vld [vmem:[%s10722_s2 + $0x78] sm:$0xff] }
 0x54e   :  { %v4581_v46 = vpop.permute.xlu0 %4580 }
 0x54f   :  { %v4587_v2 = vpop.permute.xlu1 %4586  ;;  %v4712_v20 = vmul.f32 %v11192_v37, %v4581_v46  ;;  %v4738_v37 = vld [vmem:[%s10722_s2 + $0xb0] sm:$0xff] }
 0x550   :  { %4952 = vrot.lane.b32.xlu0 %v4706_v27, %s6707_s6  ;;  %v4715_v8 = vmul.f32 %v11193_v59, %v4587_v2  ;;  %v4730_v27 = vld [vmem:[%s10722_s2 + $0x70] sm:$0xff] }
 0x551   :  { %4958 = vrot.lane.b32.xlu1 %v4709_v14, %s6707_s6  ;;  %v4733_v14 = vld [vmem:[%s10722_s2 + $0x88] sm:$0xff] }
 0x552   :  { %v4585_v54 = vpop.permute.xlu0 %4584 }
 0x553   :  { %v4847_v15 = vpop.permute.xlu1 %4846  ;;  %v4714_v13 = vmul.f32 %v11194_v25, %v4585_v54 }
 0x554   :  { %4956 = vrot.lane.b32.xlu0 %v4708_v4, %s6707_s6  ;;  %v5037_v58 = vadd.f32 %v4847_v15, %v4717_v53  ;;  %5165 = vst.msk [vmem:[#allocation4 + $0x8] sm:$0xff] %vm3849_vm1, %v4847_v15  ;;  %v4732_v4 = vld [vmem:[%s10722_s2 + $0x80] sm:$0xff] }
 0x555   :  { %4962 = vrot.lane.b32.xlu1 %v4711_v45, %s6707_s6 }
 0x556   :  { %v4845_v42 = vpop.permute.xlu0 %4844  ;;  %5101 = vst.msk [vmem:[#allocation2 + $0x8] sm:$0xff] %vm3849_vm1, %v5037_v58 }
 0x557   :  { %v5036_v26 = vadd.f32 %v4845_v42, %v4716_v0  ;;  %5164 = vst.msk [vmem:[#allocation4] sm:$0xff] %vm3849_vm1, %v4845_v42  ;;  %v4851_v35 = vpop.permute.xlu1 %4850  ;;  %v4734_v0 = vld [vmem:[%s10722_s2 + $0x90] sm:$0xff] }
 0x558   :  { %4960 = vrot.lane.b32.xlu0 %v4710_v28, %s6707_s6  ;;  %v5039_v40 = vadd.f32 %v4851_v35, %v4719_v32  ;;  %5167 = vst.msk [vmem:[#allocation4 + $0x18] sm:$0xff] %vm3849_vm1, %v4851_v35  ;;  %v4737_v28 = vld [vmem:[%s10722_s2 + $0xa8] sm:$0xff]  ;;  %v4739_v35 = vld [vmem:[%s10722_s2 + $0xb8] sm:$0xff] }
 0x559   :  { %5100 = vst.msk [vmem:[#allocation2] sm:$0xff] %vm3849_vm1, %v5036_v26  ;;  %4966 = vrot.lane.b32.xlu1 %v4713_v48, %s6707_s6  ;;  %v4736_v26 = vld [vmem:[%s10722_s2 + $0xa0] sm:$0xff] }
 0x55a   :  { %v4849_v22 = vpop.permute.xlu0 %4848  ;;  %5103 = vst.msk [vmem:[#allocation2 + $0x18] sm:$0xff] %vm3849_vm1, %v5039_v40 }
 0x55b   :  { %v5038_v38 = vadd.f32 %v4849_v22, %v4718_v50  ;;  %5166 = vst.msk [vmem:[#allocation4 + $0x10] sm:$0xff] %vm3849_vm1, %v4849_v22  ;;  %v4855_v7 = vpop.permute.xlu1 %4854 }
 0x55c   :  { %4964 = vrot.lane.b32.xlu0 %v4712_v20, %s6707_s6  ;;  %v5041_v24 = vadd.f32 %v4855_v7, %v4721_v60  ;;  %5169 = vst.msk [vmem:[#allocation4 + $0x28] sm:$0xff] %vm3849_vm1, %v4855_v7  ;;  %v4741_v60 = vld [vmem:[%s10722_s2 + $0xc8] sm:$0xff] }
 0x55d   :  { %5102 = vst.msk [vmem:[#allocation2 + $0x10] sm:$0xff] %vm3849_vm1, %v5038_v38  ;;  %4970 = vrot.lane.b32.xlu1 %v4715_v8, %s6707_s6  ;;  %v4740_v8 = vld [vmem:[%s10722_s2 + $0xc0] sm:$0xff] }
 0x55e   :  { %v4853_v62 = vpop.permute.xlu0 %4852  ;;  %5105 = vst.msk [vmem:[#allocation2 + $0x28] sm:$0xff] %vm3849_vm1, %v5041_v24  ;;  %v4743_v24 = vld [vmem:[%s10722_s2 + $0xd8] sm:$0xff] }
 0x55f   :  { %v5040_v43 = vadd.f32 %v4853_v62, %v4720_v18  ;;  %5168 = vst.msk [vmem:[#allocation4 + $0x20] sm:$0xff] %vm3849_vm1, %v4853_v62  ;;  %v4859_v10 = vpop.permute.xlu1 %4858  ;;  %v4742_v62 = vld [vmem:[%s10722_s2 + $0xd0] sm:$0xff] }
 0x560   :  { %4968 = vrot.lane.b32.xlu0 %v4714_v13, %s6707_s6  ;;  %v5043_v1 = vadd.f32 %v4859_v10, %v4723_v17  ;;  %5171 = vst.msk [vmem:[#allocation4 + $0x38] sm:$0xff] %vm3849_vm1, %v4859_v10  ;;  %v4745_v10 = vld [vmem:[%s10722_s2 + $0xe8] sm:$0xff]  ;;  %s6635_s6 = scalar_lea.vmem %s5310_s24, 8192 }
 0x561   :  { %5104 = vst.msk [vmem:[#allocation2 + $0x20] sm:$0xff] %vm3849_vm1, %v5040_v43  ;;  %p6636_p0 = scmp.ne.s32.totalorder %s5310_s24, %s6635_s6  ;;  %p6641_p2 = scmp.lt.s32.totalorder %s6635_s6, %s6635_s6 }
 0x562   :  { %v4857_v6 = vpop.permute.xlu0 %4856  ;;  %5107 = vst.msk [vmem:[#allocation2 + $0x38] sm:$0xff] %vm3849_vm1, %v5043_v1 }
 0x563   :  { %v5042_v61 = vadd.f32 %v4857_v6, %v4722_v57  ;;  %5170 = vst.msk [vmem:[#allocation4 + $0x30] sm:$0xff] %vm3849_vm1, %v4857_v6  ;;  %v4863_v55 = vpop.permute.xlu1 %4862  ;;  %v4744_v6 = vld [vmem:[%s10722_s2 + $0xe0] sm:$0xff]  ;;  %p6642_p3 = por %p6641_p2, %p6640_p1 }
 0x564   :  { %v5045_v5 = vadd.f32 %v4863_v55, %v4725_v47  ;;  %5173 = vst.msk [vmem:[#allocation4 + $0x48] sm:$0xff] %vm3849_vm1, %v4863_v55  ;;  %v4747_v55 = vld [vmem:[%s10722_s2 + $0xf8] sm:$0xff] }
 0x565   :  { %5106 = vst.msk [vmem:[#allocation2 + $0x30] sm:$0xff] %vm3849_vm1, %v5042_v61  ;;  %p6643_p4 = pnand %p6642_p3, %p6636_p0 }
 0x566   :  { %v4861_v52 = vpop.permute.xlu0 %4860  ;;  %5109 = vst.msk [vmem:[#allocation2 + $0x48] sm:$0xff] %vm3849_vm1, %v5045_v5 }
 0x567   :  { %v5044_v49 = vadd.f32 %v4861_v52, %v4724_v3  ;;  %5172 = vst.msk [vmem:[#allocation4 + $0x40] sm:$0xff] %vm3849_vm1, %v4861_v52  ;;  %v4867_v21 = vpop.permute.xlu1 %4866  ;;  %v4746_v52 = vld [vmem:[%s10722_s2 + $0xf0] sm:$0xff] }
 0x568   :  { %v5047_v9 = vadd.f32 %v4867_v21, %v4727_v31  ;;  %5175 = vst.msk [vmem:[#allocation4 + $0x58] sm:$0xff] %vm3849_vm1, %v4867_v21  ;;  %v4749_v21 = vld [vmem:[%s10722_s2 + $0x108] sm:$0xff] }
 0x569   :  { %5108 = vst.msk [vmem:[#allocation2 + $0x40] sm:$0xff] %vm3849_vm1, %v5044_v49 }
 0x56a   :  { %v4865_v51 = vpop.permute.xlu0 %4864  ;;  %5111 = vst.msk [vmem:[#allocation2 + $0x58] sm:$0xff] %vm3849_vm1, %v5047_v9 }
 0x56b   :  { %v5046_v36 = vadd.f32 %v4865_v51, %v4726_v19  ;;  %5174 = vst.msk [vmem:[#allocation4 + $0x50] sm:$0xff] %vm3849_vm1, %v4865_v51  ;;  %v4871_v41 = vpop.permute.xlu1 %4870  ;;  %v4748_v51 = vld [vmem:[%s10722_s2 + $0x100] sm:$0xff] }
 0x56c   :  { %v5049_v63 = vadd.f32 %v4871_v41, %v4729_v56  ;;  %5177 = vst.msk [vmem:[#allocation4 + $0x68] sm:$0xff] %vm3849_vm1, %v4871_v41  ;;  %v4751_v41 = vld [vmem:[%s10722_s2 + $0x118] sm:$0xff] }
 0x56d   :  { %5110 = vst.msk [vmem:[#allocation2 + $0x50] sm:$0xff] %vm3849_vm1, %v5046_v36 }
 0x56e   :  { %v4869_v44 = vpop.permute.xlu0 %4868  ;;  %5113 = vst.msk [vmem:[#allocation2 + $0x68] sm:$0xff] %vm3849_vm1, %v5049_v63 }
 0x56f   :  { %v5048_v39 = vadd.f32 %v4869_v44, %v4728_v12  ;;  %5176 = vst.msk [vmem:[#allocation4 + $0x60] sm:$0xff] %vm3849_vm1, %v4869_v44  ;;  %v4875_v33 = vpop.permute.xlu1 %4874  ;;  %v4750_v44 = vld [vmem:[%s10722_s2 + $0x110] sm:$0xff] }
 0x570   :  { %v5051_v46 = vadd.f32 %v4875_v33, %v4731_v23  ;;  %5179 = vst.msk [vmem:[#allocation4 + $0x78] sm:$0xff] %vm3849_vm1, %v4875_v33  ;;  %v4753_v33 = vld [vmem:[%s10722_s2 + $0x128] sm:$0xff] }
 0x571   :  { %5112 = vst.msk [vmem:[#allocation2 + $0x60] sm:$0xff] %vm3849_vm1, %v5048_v39 }
 0x572   :  { %v4873_v16 = vpop.permute.xlu0 %4872  ;;  %5115 = vst.msk [vmem:[#allocation2 + $0x78] sm:$0xff] %vm3849_vm1, %v5051_v46 }
 0x573   :  { %v5050_v2 = vadd.f32 %v4873_v16, %v4730_v27  ;;  %5178 = vst.msk [vmem:[#allocation4 + $0x70] sm:$0xff] %vm3849_vm1, %v4873_v16  ;;  %v4879_v30 = vpop.permute.xlu1 %4878  ;;  %v4752_v16 = vld [vmem:[%s10722_s2 + $0x120] sm:$0xff] }
 0x574   :  { %v5053_v54 = vadd.f32 %v4879_v30, %v4733_v14  ;;  %5181 = vst.msk [vmem:[#allocation4 + $0x88] sm:$0xff] %vm3849_vm1, %v4879_v30  ;;  %v4755_v30 = vld [vmem:[%s10722_s2 + $0x138] sm:$0xff] }
 0x575   :  { %5114 = vst.msk [vmem:[#allocation2 + $0x70] sm:$0xff] %vm3849_vm1, %v5050_v2 }
 0x576   :  { %v4877_v53 = vpop.permute.xlu0 %4876  ;;  %5117 = vst.msk [vmem:[#allocation2 + $0x88] sm:$0xff] %vm3849_vm1, %v5053_v54 }
 0x577   :  { %v5052_v45 = vadd.f32 %v4877_v53, %v4732_v4  ;;  %5180 = vst.msk [vmem:[#allocation4 + $0x80] sm:$0xff] %vm3849_vm1, %v4877_v53  ;;  %v4883_v15 = vpop.permute.xlu1 %4882  ;;  %v4754_v53 = vld [vmem:[%s10722_s2 + $0x130] sm:$0xff] }
 0x578   :  { %v5055_v58 = vadd.f32 %v4883_v15, %v4735_v29  ;;  %5183 = vst.msk [vmem:[#allocation4 + $0x98] sm:$0xff] %vm3849_vm1, %v4883_v15  ;;  %v4757_v15 = vld [vmem:[%s10722_s2 + $0x148] sm:$0xff] }
 0x579   :  { %5116 = vst.msk [vmem:[#allocation2 + $0x80] sm:$0xff] %vm3849_vm1, %v5052_v45 }
 0x57a   :  { %v4881_v11 = vpop.permute.xlu0 %4880  ;;  %5119 = vst.msk [vmem:[#allocation2 + $0x98] sm:$0xff] %vm3849_vm1, %v5055_v58 }
 0x57b   :  { %v5054_v42 = vadd.f32 %v4881_v11, %v4734_v0  ;;  %5182 = vst.msk [vmem:[#allocation4 + $0x90] sm:$0xff] %vm3849_vm1, %v4881_v11  ;;  %v4887_v32 = vpop.permute.xlu1 %4886  ;;  %v4756_v11 = vld [vmem:[%s10722_s2 + $0x140] sm:$0xff] }
 0x57c   :  { %v5057_v34 = vadd.f32 %v4887_v32, %v4737_v28  ;;  %5185 = vst.msk [vmem:[#allocation4 + $0xa8] sm:$0xff] %vm3849_vm1, %v4887_v32  ;;  %v4759_v32 = vld [vmem:[%s10722_s2 + $0x158] sm:$0xff] }
 0x57d   :  { %5118 = vst.msk [vmem:[#allocation2 + $0x90] sm:$0xff] %vm3849_vm1, %v5054_v42 }
 0x57e   :  { %v4885_v48 = vpop.permute.xlu0 %4884  ;;  %5121 = vst.msk [vmem:[#allocation2 + $0xa8] sm:$0xff] %vm3849_vm1, %v5057_v34 }
 0x57f   :  { %v5056_v50 = vadd.f32 %v4885_v48, %v4736_v26  ;;  %5184 = vst.msk [vmem:[#allocation4 + $0xa0] sm:$0xff] %vm3849_vm1, %v4885_v48  ;;  %v4891_v40 = vpop.permute.xlu1 %4890  ;;  %v4758_v48 = vld [vmem:[%s10722_s2 + $0x150] sm:$0xff] }
 0x580   :  { %v5059_v20 = vadd.f32 %v4891_v40, %v4739_v35  ;;  %5187 = vst.msk [vmem:[#allocation4 + $0xb8] sm:$0xff] %vm3849_vm1, %v4891_v40  ;;  %v4761_v40 = vld [vmem:[%s10722_s2 + $0x168] sm:$0xff] }
 0x581   :  { %5120 = vst.msk [vmem:[#allocation2 + $0xa0] sm:$0xff] %vm3849_vm1, %v5056_v50 }
 0x582   :  { %v4889_v22 = vpop.permute.xlu0 %4888  ;;  %5123 = vst.msk [vmem:[#allocation2 + $0xb8] sm:$0xff] %vm3849_vm1, %v5059_v20 }
 0x583   :  { %v5058_v38 = vadd.f32 %v4889_v22, %v4738_v37  ;;  %5186 = vst.msk [vmem:[#allocation4 + $0xb0] sm:$0xff] %vm3849_vm1, %v4889_v22  ;;  %v4895_v59 = vpop.permute.xlu1 %4894  ;;  %v4760_v22 = vld [vmem:[%s10722_s2 + $0x160] sm:$0xff] }
 0x584   :  { %v5061_v7 = vadd.f32 %v4895_v59, %v4741_v60  ;;  %5189 = vst.msk [vmem:[#allocation4 + $0xc8] sm:$0xff] %vm3849_vm1, %v4895_v59  ;;  %v4763_v59 = vld [vmem:[%s10722_s2 + $0x178] sm:$0xff] }
 0x585   :  { %5122 = vst.msk [vmem:[#allocation2 + $0xb0] sm:$0xff] %vm3849_vm1, %v5058_v38 }
 0x586   :  { %v4893_v18 = vpop.permute.xlu0 %4892  ;;  %5125 = vst.msk [vmem:[#allocation2 + $0xc8] sm:$0xff] %vm3849_vm1, %v5061_v7 }
 0x587   :  { %v5060_v25 = vadd.f32 %v4893_v18, %v4740_v8  ;;  %5188 = vst.msk [vmem:[#allocation4 + $0xc0] sm:$0xff] %vm3849_vm1, %v4893_v18  ;;  %v4899_v13 = vpop.permute.xlu1 %4898  ;;  %v4762_v18 = vld [vmem:[%s10722_s2 + $0x170] sm:$0xff] }
 0x588   :  { %v5063_v17 = vadd.f32 %v4899_v13, %v4743_v24  ;;  %5191 = vst.msk [vmem:[#allocation4 + $0xd8] sm:$0xff] %vm3849_vm1, %v4899_v13  ;;  %v4765_v13 = vld [vmem:[%s10722_s2 + $0x188] sm:$0xff] }
 0x589   :  { %5124 = vst.msk [vmem:[#allocation2 + $0xc0] sm:$0xff] %vm3849_vm1, %v5060_v25 }
 0x58a   :  { %v4897_v43 = vpop.permute.xlu0 %4896  ;;  %5127 = vst.msk [vmem:[#allocation2 + $0xd8] sm:$0xff] %vm3849_vm1, %v5063_v17 }
 0x58b   :  { %v5062_v57 = vadd.f32 %v4897_v43, %v4742_v62  ;;  %5190 = vst.msk [vmem:[#allocation4 + $0xd0] sm:$0xff] %vm3849_vm1, %v4897_v43  ;;  %v4903_v1 = vpop.permute.xlu1 %4902  ;;  %v4764_v43 = vld [vmem:[%s10722_s2 + $0x180] sm:$0xff] }
 0x58c   :  { %v5065_v47 = vadd.f32 %v4903_v1, %v4745_v10  ;;  %5193 = vst.msk [vmem:[#allocation4 + $0xe8] sm:$0xff] %vm3849_vm1, %v4903_v1  ;;  %v4767_v1 = vld [vmem:[%s10722_s2 + $0x198] sm:$0xff] }
 0x58d   :  { %5126 = vst.msk [vmem:[#allocation2 + $0xd0] sm:$0xff] %vm3849_vm1, %v5062_v57 }
 0x58e   :  { %v4901_v61 = vpop.permute.xlu0 %4900  ;;  %5129 = vst.msk [vmem:[#allocation2 + $0xe8] sm:$0xff] %vm3849_vm1, %v5065_v47 }
 0x58f   :  { %v5064_v3 = vadd.f32 %v4901_v61, %v4744_v6  ;;  %5192 = vst.msk [vmem:[#allocation4 + $0xe0] sm:$0xff] %vm3849_vm1, %v4901_v61  ;;  %v4907_v5 = vpop.permute.xlu1 %4906  ;;  %v4766_v61 = vld [vmem:[%s10722_s2 + $0x190] sm:$0xff] }
 0x590   :  { %v5067_v31 = vadd.f32 %v4907_v5, %v4747_v55  ;;  %5195 = vst.msk [vmem:[#allocation4 + $0xf8] sm:$0xff] %vm3849_vm1, %v4907_v5  ;;  %v4769_v5 = vld [vmem:[%s10722_s2 + $0x1a8] sm:$0xff] }
 0x591   :  { %5128 = vst.msk [vmem:[#allocation2 + $0xe0] sm:$0xff] %vm3849_vm1, %v5064_v3 }
 0x592   :  { %v4905_v49 = vpop.permute.xlu0 %4904  ;;  %5131 = vst.msk [vmem:[#allocation2 + $0xf8] sm:$0xff] %vm3849_vm1, %v5067_v31 }
 0x593   :  { %v5066_v19 = vadd.f32 %v4905_v49, %v4746_v52  ;;  %5194 = vst.msk [vmem:[#allocation4 + $0xf0] sm:$0xff] %vm3849_vm1, %v4905_v49  ;;  %v4911_v9 = vpop.permute.xlu1 %4910  ;;  %v4768_v49 = vld [vmem:[%s10722_s2 + $0x1a0] sm:$0xff] }
 0x594   :  { %v5069_v56 = vadd.f32 %v4911_v9, %v4749_v21  ;;  %5197 = vst.msk [vmem:[#allocation4 + $0x108] sm:$0xff] %vm3849_vm1, %v4911_v9  ;;  %v4771_v9 = vld [vmem:[%s10722_s2 + $0x1b8] sm:$0xff] }
 0x595   :  { %5130 = vst.msk [vmem:[#allocation2 + $0xf0] sm:$0xff] %vm3849_vm1, %v5066_v19 }
 0x596   :  { %v4909_v36 = vpop.permute.xlu0 %4908  ;;  %5133 = vst.msk [vmem:[#allocation2 + $0x108] sm:$0xff] %vm3849_vm1, %v5069_v56 }
 0x597   :  { %v5068_v12 = vadd.f32 %v4909_v36, %v4748_v51  ;;  %5196 = vst.msk [vmem:[#allocation4 + $0x100] sm:$0xff] %vm3849_vm1, %v4909_v36  ;;  %v4915_v63 = vpop.permute.xlu1 %4914  ;;  %v4770_v36 = vld [vmem:[%s10722_s2 + $0x1b0] sm:$0xff] }
 0x598   :  { %v5071_v23 = vadd.f32 %v4915_v63, %v4751_v41  ;;  %5199 = vst.msk [vmem:[#allocation4 + $0x118] sm:$0xff] %vm3849_vm1, %v4915_v63  ;;  %v4773_v63 = vld [vmem:[%s10722_s2 + $0x1c8] sm:$0xff] }
 0x599   :  { %5132 = vst.msk [vmem:[#allocation2 + $0x100] sm:$0xff] %vm3849_vm1, %v5068_v12 }
 0x59a   :  { %v4913_v39 = vpop.permute.xlu0 %4912  ;;  %5135 = vst.msk [vmem:[#allocation2 + $0x118] sm:$0xff] %vm3849_vm1, %v5071_v23 }
 0x59b   :  { %v5070_v27 = vadd.f32 %v4913_v39, %v4750_v44  ;;  %5198 = vst.msk [vmem:[#allocation4 + $0x110] sm:$0xff] %vm3849_vm1, %v4913_v39  ;;  %v4919_v46 = vpop.permute.xlu1 %4918  ;;  %v4772_v39 = vld [vmem:[%s10722_s2 + $0x1c0] sm:$0xff] }
 0x59c   :  { %v5073_v14 = vadd.f32 %v4919_v46, %v4753_v33  ;;  %5201 = vst.msk [vmem:[#allocation4 + $0x128] sm:$0xff] %vm3849_vm1, %v4919_v46  ;;  %v4775_v46 = vld [vmem:[%s10722_s2 + $0x1d8] sm:$0xff] }
 0x59d   :  { %5134 = vst.msk [vmem:[#allocation2 + $0x110] sm:$0xff] %vm3849_vm1, %v5070_v27 }
 0x59e   :  { %v4917_v2 = vpop.permute.xlu0 %4916  ;;  %5137 = vst.msk [vmem:[#allocation2 + $0x128] sm:$0xff] %vm3849_vm1, %v5073_v14 }
 0x59f   :  { %v5072_v4 = vadd.f32 %v4917_v2, %v4752_v16  ;;  %5200 = vst.msk [vmem:[#allocation4 + $0x120] sm:$0xff] %vm3849_vm1, %v4917_v2  ;;  %v4923_v54 = vpop.permute.xlu1 %4922  ;;  %v4774_v2 = vld [vmem:[%s10722_s2 + $0x1d0] sm:$0xff] }
 0x5a0   :  { %v5075_v29 = vadd.f32 %v4923_v54, %v4755_v30  ;;  %5203 = vst.msk [vmem:[#allocation4 + $0x138] sm:$0xff] %vm3849_vm1, %v4923_v54  ;;  %v4777_v54 = vld [vmem:[%s10722_s2 + $0x1e8] sm:$0xff] }
 0x5a1   :  { %5136 = vst.msk [vmem:[#allocation2 + $0x120] sm:$0xff] %vm3849_vm1, %v5072_v4 }
 0x5a2   :  { %v4921_v45 = vpop.permute.xlu0 %4920  ;;  %5139 = vst.msk [vmem:[#allocation2 + $0x138] sm:$0xff] %vm3849_vm1, %v5075_v29 }
 0x5a3   :  { %v5074_v0 = vadd.f32 %v4921_v45, %v4754_v53  ;;  %5202 = vst.msk [vmem:[#allocation4 + $0x130] sm:$0xff] %vm3849_vm1, %v4921_v45  ;;  %v4927_v58 = vpop.permute.xlu1 %4926  ;;  %v4776_v45 = vld [vmem:[%s10722_s2 + $0x1e0] sm:$0xff] }
 0x5a4   :  { %v5077_v28 = vadd.f32 %v4927_v58, %v4757_v15  ;;  %5205 = vst.msk [vmem:[#allocation4 + $0x148] sm:$0xff] %vm3849_vm1, %v4927_v58  ;;  %v4779_v58 = vld [vmem:[%s10722_s2 + $0x1f8] sm:$0xff] }
 0x5a5   :  { %5138 = vst.msk [vmem:[#allocation2 + $0x130] sm:$0xff] %vm3849_vm1, %v5074_v0 }
 0x5a6   :  { %v4925_v42 = vpop.permute.xlu0 %4924  ;;  %5141 = vst.msk [vmem:[#allocation2 + $0x148] sm:$0xff] %vm3849_vm1, %v5077_v28 }
 0x5a7   :  { %v5076_v26 = vadd.f32 %v4925_v42, %v4756_v11  ;;  %5204 = vst.msk [vmem:[#allocation4 + $0x140] sm:$0xff] %vm3849_vm1, %v4925_v42  ;;  %v4931_v34 = vpop.permute.xlu1 %4930  ;;  %v4778_v42 = vld [vmem:[%s10722_s2 + $0x1f0] sm:$0xff] }
 0x5a8   :  { %v5079_v35 = vadd.f32 %v4931_v34, %v4759_v32  ;;  %5207 = vst.msk [vmem:[#allocation4 + $0x158] sm:$0xff] %vm3849_vm1, %v4931_v34 }
 0x5a9   :  { %5140 = vst.msk [vmem:[#allocation2 + $0x140] sm:$0xff] %vm3849_vm1, %v5076_v26 }
 0x5aa   :  { %v4929_v50 = vpop.permute.xlu0 %4928  ;;  %5143 = vst.msk [vmem:[#allocation2 + $0x158] sm:$0xff] %vm3849_vm1, %v5079_v35 }
 0x5ab   :  { %v5078_v37 = vadd.f32 %v4929_v50, %v4758_v48  ;;  %5206 = vst.msk [vmem:[#allocation4 + $0x150] sm:$0xff] %vm3849_vm1, %v4929_v50  ;;  %v4935_v20 = vpop.permute.xlu1 %4934 }
 0x5ac   :  { %v5081_v60 = vadd.f32 %v4935_v20, %v4761_v40  ;;  %5209 = vst.msk [vmem:[#allocation4 + $0x168] sm:$0xff] %vm3849_vm1, %v4935_v20 }
 0x5ad   :  { %5142 = vst.msk [vmem:[#allocation2 + $0x150] sm:$0xff] %vm3849_vm1, %v5078_v37 }
 0x5ae   :  { %v4933_v38 = vpop.permute.xlu0 %4932  ;;  %5145 = vst.msk [vmem:[#allocation2 + $0x168] sm:$0xff] %vm3849_vm1, %v5081_v60 }
 0x5af   :  { %v5080_v8 = vadd.f32 %v4933_v38, %v4760_v22  ;;  %5208 = vst.msk [vmem:[#allocation4 + $0x160] sm:$0xff] %vm3849_vm1, %v4933_v38  ;;  %v4939_v7 = vpop.permute.xlu1 %4938 }
 0x5b0   :  { %v5083_v24 = vadd.f32 %v4939_v7, %v4763_v59  ;;  %5211 = vst.msk [vmem:[#allocation4 + $0x178] sm:$0xff] %vm3849_vm1, %v4939_v7 }
 0x5b1   :  { %5144 = vst.msk [vmem:[#allocation2 + $0x160] sm:$0xff] %vm3849_vm1, %v5080_v8 }
 0x5b2   :  { %v4937_v25 = vpop.permute.xlu0 %4936  ;;  %5147 = vst.msk [vmem:[#allocation2 + $0x178] sm:$0xff] %vm3849_vm1, %v5083_v24 }
 0x5b3   :  { %v5082_v62 = vadd.f32 %v4937_v25, %v4762_v18  ;;  %5210 = vst.msk [vmem:[#allocation4 + $0x170] sm:$0xff] %vm3849_vm1, %v4937_v25  ;;  %v4943_v17 = vpop.permute.xlu1 %4942 }
 0x5b4   :  { %v5085_v10 = vadd.f32 %v4943_v17, %v4765_v13  ;;  %5213 = vst.msk [vmem:[#allocation4 + $0x188] sm:$0xff] %vm3849_vm1, %v4943_v17 }
 0x5b5   :  { %5146 = vst.msk [vmem:[#allocation2 + $0x170] sm:$0xff] %vm3849_vm1, %v5082_v62 }
 0x5b6   :  { %v4941_v57 = vpop.permute.xlu0 %4940  ;;  %5149 = vst.msk [vmem:[#allocation2 + $0x188] sm:$0xff] %vm3849_vm1, %v5085_v10 }
 0x5b7   :  { %v5084_v6 = vadd.f32 %v4941_v57, %v4764_v43  ;;  %5212 = vst.msk [vmem:[#allocation4 + $0x180] sm:$0xff] %vm3849_vm1, %v4941_v57  ;;  %v4947_v47 = vpop.permute.xlu1 %4946 }
 0x5b8   :  { %v5087_v55 = vadd.f32 %v4947_v47, %v4767_v1  ;;  %5215 = vst.msk [vmem:[#allocation4 + $0x198] sm:$0xff] %vm3849_vm1, %v4947_v47 }
 0x5b9   :  { %5148 = vst.msk [vmem:[#allocation2 + $0x180] sm:$0xff] %vm3849_vm1, %v5084_v6 }
 0x5ba   :  { %v4945_v3 = vpop.permute.xlu0 %4944  ;;  %5151 = vst.msk [vmem:[#allocation2 + $0x198] sm:$0xff] %vm3849_vm1, %v5087_v55 }
 0x5bb   :  { %v5086_v52 = vadd.f32 %v4945_v3, %v4766_v61  ;;  %5214 = vst.msk [vmem:[#allocation4 + $0x190] sm:$0xff] %vm3849_vm1, %v4945_v3  ;;  %v4951_v31 = vpop.permute.xlu1 %4950 }
 0x5bc   :  { %v5089_v21 = vadd.f32 %v4951_v31, %v4769_v5  ;;  %5217 = vst.msk [vmem:[#allocation4 + $0x1a8] sm:$0xff] %vm3849_vm1, %v4951_v31 }
 0x5bd   :  { %5150 = vst.msk [vmem:[#allocation2 + $0x190] sm:$0xff] %vm3849_vm1, %v5086_v52 }
 0x5be   :  { %v4949_v19 = vpop.permute.xlu0 %4948  ;;  %5153 = vst.msk [vmem:[#allocation2 + $0x1a8] sm:$0xff] %vm3849_vm1, %v5089_v21 }
 0x5bf   :  { %v5088_v51 = vadd.f32 %v4949_v19, %v4768_v49  ;;  %5216 = vst.msk [vmem:[#allocation4 + $0x1a0] sm:$0xff] %vm3849_vm1, %v4949_v19  ;;  %v4955_v56 = vpop.permute.xlu1 %4954 }
 0x5c0   :  { %v5091_v41 = vadd.f32 %v4955_v56, %v4771_v9  ;;  %5219 = vst.msk [vmem:[#allocation4 + $0x1b8] sm:$0xff] %vm3849_vm1, %v4955_v56 }
 0x5c1   :  { %5152 = vst.msk [vmem:[#allocation2 + $0x1a0] sm:$0xff] %vm3849_vm1, %v5088_v51 }
 0x5c2   :  { %v4953_v12 = vpop.permute.xlu0 %4952  ;;  %5155 = vst.msk [vmem:[#allocation2 + $0x1b8] sm:$0xff] %vm3849_vm1, %v5091_v41 }
 0x5c3   :  { %v5090_v44 = vadd.f32 %v4953_v12, %v4770_v36  ;;  %5218 = vst.msk [vmem:[#allocation4 + $0x1b0] sm:$0xff] %vm3849_vm1, %v4953_v12  ;;  %v4959_v23 = vpop.permute.xlu1 %4958 }
 0x5c4   :  { %v5093_v33 = vadd.f32 %v4959_v23, %v4773_v63  ;;  %5221 = vst.msk [vmem:[#allocation4 + $0x1c8] sm:$0xff] %vm3849_vm1, %v4959_v23 }
 0x5c5   :  { %5154 = vst.msk [vmem:[#allocation2 + $0x1b0] sm:$0xff] %vm3849_vm1, %v5090_v44 }
 0x5c6   :  { %v4957_v27 = vpop.permute.xlu0 %4956  ;;  %5157 = vst.msk [vmem:[#allocation2 + $0x1c8] sm:$0xff] %vm3849_vm1, %v5093_v33 }
 0x5c7   :  { %v5092_v16 = vadd.f32 %v4957_v27, %v4772_v39  ;;  %5220 = vst.msk [vmem:[#allocation4 + $0x1c0] sm:$0xff] %vm3849_vm1, %v4957_v27  ;;  %v4963_v14 = vpop.permute.xlu1 %4962 }
 0x5c8   :  { %v5095_v30 = vadd.f32 %v4963_v14, %v4775_v46  ;;  %5223 = vst.msk [vmem:[#allocation4 + $0x1d8] sm:$0xff] %vm3849_vm1, %v4963_v14 }
 0x5c9   :  { %5156 = vst.msk [vmem:[#allocation2 + $0x1c0] sm:$0xff] %vm3849_vm1, %v5092_v16 }
 0x5ca   :  { %v4961_v4 = vpop.permute.xlu0 %4960  ;;  %5159 = vst.msk [vmem:[#allocation2 + $0x1d8] sm:$0xff] %vm3849_vm1, %v5095_v30 }
 0x5cb   :  { %v5094_v53 = vadd.f32 %v4961_v4, %v4774_v2  ;;  %5222 = vst.msk [vmem:[#allocation4 + $0x1d0] sm:$0xff] %vm3849_vm1, %v4961_v4  ;;  %v4967_v29 = vpop.permute.xlu1 %4966 }
 0x5cc   :  { %v5097_v15 = vadd.f32 %v4967_v29, %v4777_v54  ;;  %5225 = vst.msk [vmem:[#allocation4 + $0x1e8] sm:$0xff] %vm3849_vm1, %v4967_v29 }
 0x5cd   :  { %5158 = vst.msk [vmem:[#allocation2 + $0x1d0] sm:$0xff] %vm3849_vm1, %v5094_v53 }
 0x5ce   :  { %v4965_v0 = vpop.permute.xlu0 %4964  ;;  %5161 = vst.msk [vmem:[#allocation2 + $0x1e8] sm:$0xff] %vm3849_vm1, %v5097_v15 }
 0x5cf   :  { %v5096_v11 = vadd.f32 %v4965_v0, %v4776_v45  ;;  %5224 = vst.msk [vmem:[#allocation4 + $0x1e0] sm:$0xff] %vm3849_vm1, %v4965_v0  ;;  %v4971_v28 = vpop.permute.xlu1 %4970 }
 0x5d0   :  { %v5099_v32 = vadd.f32 %v4971_v28, %v4779_v58  ;;  %5227 = vst.msk [vmem:[#allocation4 + $0x1f8] sm:$0xff] %vm3849_vm1, %v4971_v28 }
 0x5d1   :  { %5160 = vst.msk [vmem:[#allocation2 + $0x1e0] sm:$0xff] %vm3849_vm1, %v5096_v11 }
 0x5d2   :  { %v4969_v26 = vpop.permute.xlu0 %4968  ;;  %5163 = vst.msk [vmem:[#allocation2 + $0x1f8] sm:$0xff] %vm3849_vm1, %v5099_v32 }
 0x5d3   :  { %v5098_v34 = vadd.f32 %v4969_v26, %v4778_v42  ;;  %5226 = vst.msk [vmem:[#allocation4 + $0x1f0] sm:$0xff] %vm3849_vm1, %v4969_v26 }
 0x5d4   :  { %6646 = shalt.err (!%p6643_p4)
}
 0x5d5   :  { %s6647_s4 = scalar_lea.hbm %s10729_s9, 8192 }
 0x5d6   :  { %p6648_p5 = scmp.ne.s32.totalorder %s10729_s9, %s6647_s4  ;;  %p6651_p6 = scmp.lt.u32.totalorder %s6647_s4, %s10729_s9 }
 0x5d8   :  { %p6653_p7 = pnand %p6651_p6, %p6648_p5 }
 0x5da   :  { %6656 = shalt.err (!%p6653_p7)
}
 0x5db   :  { %s6711_s13 = smov 128   ;;  %s6712_s14 = smov 8   ;;  %5162 = vst.msk [vmem:[#allocation2 + $0x1f0] sm:$0xff] %vm3849_vm1, %v5098_v34 }
 0x5dc   :  { %5315 = dma.vmem_to_hbm [thread:$0]  %s5310_s24, 8192, %s10729_s9, [#allocation5], %s6711_s13, %s6711_s13, %s6712_s14  }
 0x5dd   :  { %s6657_s16 = scalar_lea.vmem %s10658_s26, 8192  ;;  %p6662_p9 = scmp.lt.s32.totalorder %s10658_s26, %s10658_s26 }
 0x5de   :  { %p6658_p8 = scmp.ne.s32.totalorder %s10658_s26, %s6657_s16  ;;  %p6663_p10 = scmp.lt.s32.totalorder %s6657_s16, %s6657_s16 }
 0x5e0   :  { %p6664_p11 = por %p6663_p10, %p6662_p9 }
 0x5e2   :  { %p6665_p12 = pnand %p6664_p11, %p6658_p8 }
 0x5e4   :  { %6668 = shalt.err (!%p6665_p12)
}
 0x5e5   :  { %s6669_s19 = scalar_lea.hbm %s10730_s10, 8192 }
 0x5e6   :  { %p6670_p13 = scmp.ne.s32.totalorder %s10730_s10, %s6669_s19  ;;  %p6673_p0 = scmp.lt.u32.totalorder %s6669_s19, %s10730_s10 }
 0x5e8   :  { %p6675_p1 = pnand %p6673_p0, %p6670_p13 }
 0x5ea   :  { %6678 = shalt.err (!%p6675_p1)
}
 0x5eb   :  { %5327 = dma.vmem_to_hbm [thread:$0]  %s10658_s26, 8192, %s10730_s10, [#allocation5], %s6711_s13, %s6711_s13, %s6712_s14  }
 0x5ec   :  { %s6679_s24 = scalar_lea.vmem %s10662_s29, 8192  ;;  %p6684_p3 = scmp.lt.s32.totalorder %s10662_s29, %s10662_s29 }
 0x5ed   :  { %p6680_p2 = scmp.ne.s32.totalorder %s10662_s29, %s6679_s24  ;;  %p6685_p4 = scmp.lt.s32.totalorder %s6679_s24, %s6679_s24 }
 0x5ef   :  { %p6686_p5 = por %p6685_p4, %p6684_p3 }
 0x5f1   :  { %p6687_p6 = pnand %p6686_p5, %p6680_p2 }
 0x5f3   :  { %6690 = shalt.err (!%p6687_p6)
}
 0x5f4   :  { %s6691_s27 = scalar_lea.hbm %s10728_s8, 8192 }
 0x5f5   :  { %p6692_p7 = scmp.ne.s32.totalorder %s10728_s8, %s6691_s27  ;;  %p6695_p8 = scmp.lt.u32.totalorder %s6691_s27, %s10728_s8 }
 0x5f7   :  { %p6697_p9 = pnand %p6695_p8, %p6692_p7 }
 0x5f9   :  { %6700 = shalt.err (!%p6697_p9)
}
 0x5fa   :  { %5303 = dma.vmem_to_hbm [thread:$0]  %s10662_s29, 8192, %s10728_s8, [#allocation3], %s6711_s13, %s6711_s13, %s6712_s14  }
 0x5fb   :  { %6701 = dma.done.wait [#allocation3], 8192  }
 0x5fc   :  { %6702 = vsyncadd [#allocation3], 4294959104 }
 0x5fd   :  { %6703 = dma.done.wait [#allocation5], 16384  }
 0x5fe   :  { %6704 = vsyncadd [#allocation5], 4294950912 }
 0x5ff   :  { %5337 = vsyncpa [#allocation3], 1 }
 0x600   :  { %5338 = vsyncpa [#allocation5], 1 }

</bundles_post_ra>
